<compile_context>
chip_gen: v6e
topology: v6e:2x2x1
jax: 0.10.0
libtpu: 0.0.40
codegen_flags: <defaults>
</compile_context>

<pallas_src>
import jax
import jax.numpy as jnp
from jax.experimental import pallas as pl
from jax.experimental.pallas import tpu as pltpu

_VMEM_LIMIT_BYTES = 32 * 1024 * 1024   # safe on v5e / v6e / v7x
_VMEM_BUDGET_BYTES = 24 * 1024 * 1024  # headroom below the limit


def _round_up(x, m):
    return (x + m - 1) // m * m


def _gated_attn_kernel(x_ref, wab_ref, bab_ref, wct_ref, bc_ref, out_ref):
    """One row tile of the fused gated-attention head.

    x_ref:   (tn, L)      input rows (full L, un-tiled)
    wab_ref: (L, 2*Dp)    [Wa.T | Wb.T], VMEM-resident
    bab_ref: (1, 2*Dp)    [ba | bb] as f32
    wct_ref: (Dp, Cp)     Wc.T, VMEM-resident
    bc_ref:  (1, Cp)      bc as f32
    out_ref: (tn, Cp)     attention logits
    """
    d_pad = wct_ref.shape[0]                       # Dp (multiple of 128)

    z = jnp.dot(x_ref[...], wab_ref[...],
                preferred_element_type=jnp.float32)
    z = z + bab_ref[...]

    a = jnp.tanh(z[:, :d_pad])
    # sigmoid(z) == 0.5 * (tanh(0.5 * z) + 1): one EUP transcendental.
    b = 0.5 * (jnp.tanh(0.5 * z[:, d_pad:]) + 1.0)
    gated = (a * b).astype(wct_ref.dtype)

    attn = jnp.dot(gated, wct_ref[...],
                   preferred_element_type=jnp.float32)
    out_ref[...] = (attn + bc_ref[...]).astype(out_ref.dtype)


def attn_net_gated(x, wa, ba, wb, bb, wc, bc, *, tile_n=512):
    """x: (N, L); wa/wb: (D, L); ba/bb: (D,); wc: (C, D); bc: (C,).

    Returns (A, x) with A: (N, C), matching Attn_Net_Gated.forward.
    """
    N, L = x.shape
    D = wa.shape[0]
    C = wc.shape[0]
    dtype = x.dtype
    itemsize = jnp.dtype(dtype).itemsize

    # ---- lane-dense padded sizes for the projected dims ---------------------
    Dp = _round_up(D, 128)
    Cp = _round_up(C, 128)

    # ---- weight / bias prep (done once, tiny vs. x) --------------------------
    wat = jnp.pad(wa.T, ((0, 0), (0, Dp - D)))               # (L, Dp)
    wbt = jnp.pad(wb.T, ((0, 0), (0, Dp - D)))               # (L, Dp)
    wab = jnp.concatenate([wat, wbt], axis=1)                # (L, 2*Dp)
    bab = jnp.concatenate([jnp.pad(ba, (0, Dp - D)),
                           jnp.pad(bb, (0, Dp - D))]
                          ).astype(jnp.float32).reshape(1, 2 * Dp)
    wct = jnp.pad(wc.T, ((0, Dp - D), (0, Cp - C)))          # (Dp, Cp)
    bcp = jnp.pad(bc, (0, Cp - C)).astype(jnp.float32).reshape(1, Cp)

    # ---- row-tile selection ---------------------------------------------------
    # sublane multiple depends on dtype packing (f32: 8, bf16: 16, int8/fp8: 32)
    sub = {4: 8, 2: 16, 1: 32}.get(itemsize, 8)
    # keep at least 2 row tiles so the "parallel" axis can shard across both
    # TensorCores on v7x, but never exceed tile_n.
    tn = max(sub, min(tile_n, _round_up(pl.cdiv(N, 2), sub)))

    w_itemsize = jnp.dtype(wab.dtype).itemsize

    def _vmem_estimate(rows):
        x_b = 2 * rows * L * itemsize                   # double-buffered x stream
        w_b = 2 * (L * 2 * Dp + Dp * Cp) * w_itemsize   # resident weights (conservative)
        bias_b = 2 * (2 * Dp + Cp) * 4
        out_b = 2 * rows * Cp * itemsize
        interm = 3 * rows * 2 * Dp * 4                  # z, a*b, attn temporaries
        return x_b + w_b + bias_b + out_b + interm

    while tn > sub and _vmem_estimate(tn) > _VMEM_BUDGET_BYTES:
        tn = max(sub, _round_up(tn // 2, sub))

    grid = (pl.cdiv(N, tn),)

    cost = pl.CostEstimate(
        flops=2 * N * L * (2 * Dp) + 2 * N * Dp * Cp + 6 * N * Dp,
        transcendentals=2 * N * Dp,
        bytes_accessed=(itemsize * (N * L + N * Cp)
                        + w_itemsize * (L * 2 * Dp + Dp * Cp)
                        + 4 * (2 * Dp + Cp)),
    )

    out = pl.pallas_call(
        _gated_attn_kernel,
        out_shape=jax.ShapeDtypeStruct((N, Cp), dtype),
        grid_spec=pltpu.PrefetchScalarGridSpec(
            num_scalar_prefetch=0,
            grid=grid,
            in_specs=[
                pl.BlockSpec((tn, L), lambda i: (i, 0)),        # x (streamed)
                pl.BlockSpec((L, 2 * Dp), lambda i: (0, 0)),    # [Wa.T|Wb.T] (resident)
                pl.BlockSpec((1, 2 * Dp), lambda i: (0, 0)),    # [ba|bb]
                pl.BlockSpec((Dp, Cp), lambda i: (0, 0)),       # Wc.T (resident)
                pl.BlockSpec((1, Cp), lambda i: (0, 0)),        # bc
            ],
            out_specs=pl.BlockSpec((tn, Cp), lambda i: (i, 0)),
        ),
        compiler_params=pltpu.CompilerParams(
            dimension_semantics=("parallel",),
            vmem_limit_bytes=_VMEM_LIMIT_BYTES),
        cost_estimate=cost,
    )(x, wab, bab, wct, bcp)

    A = out[:, :C]
    return A, x


def _reference(x, wa, ba, wb, bb, wc, bc):
    a = jnp.tanh(jnp.dot(x, wa.T) + ba)
    b = jax.nn.sigmoid(jnp.dot(x, wb.T) + bb)
    A = jnp.dot(a * b, wc.T) + bc
    return A, x


if __name__ == "__main__":
    # Module-default shapes (L=1024, D=256, 1 class); N=200 bag instances
    # exercises the partial last row tile and the >=2-row-tile logic.
    N, L, D, n_classes = 200, 1024, 256, 1

    key = jax.random.PRNGKey(0)
    kx, ka, kb, kc = jax.random.split(key, 4)

    x = jax.random.normal(kx, (N, L), dtype=jnp.float32)
    wa = jax.random.normal(ka, (D, L), dtype=jnp.float32) * 0.03
    ba = jnp.linspace(-0.1, 0.1, D, dtype=jnp.float32)
    wb = jax.random.normal(kb, (D, L), dtype=jnp.float32) * 0.03
    bb = jnp.linspace(0.1, -0.1, D, dtype=jnp.float32)
    wc = jax.random.normal(kc, (n_classes, D), dtype=jnp.float32) * 0.05
    bc = jnp.full((n_classes,), 0.02, dtype=jnp.float32)

    A, x_out = attn_net_gated(x, wa, ba, wb, bb, wc, bc)
    A = jax.block_until_ready(A)

    A_ref, _ = _reference(x, wa, ba, wb, bb, wc, bc)
    assert A.shape == (N, n_classes), A.shape
    assert x_out.shape == x.shape

    max_err = float(jnp.max(jnp.abs(A - A_ref)))
    assert jnp.allclose(A, A_ref, atol=1e-2, rtol=1e-2), f"mismatch: {max_err}"
    assert jnp.array_equal(x_out, x)

    print("KERNEL_OK")
</pallas_src>

<mosaic_0001>
module attributes {stable_mosaic.version = 11 : i64} {
  func.func @_gated_attn_kernel(%arg0: i32, %arg1: memref<104x1024xf32, #tpu.memory_space<vmem>>, %arg2: memref<1024x512xf32, #tpu.memory_space<vmem>>, %arg3: memref<1x512xf32, #tpu.memory_space<vmem>>, %arg4: memref<256x128xf32, #tpu.memory_space<vmem>>, %arg5: memref<1x128xf32, #tpu.memory_space<vmem>>, %arg6: memref<104x128xf32, #tpu.memory_space<vmem>>) attributes {dimension_semantics = [#tpu.dimension_semantics<parallel>], iteration_bounds = array<i64: 2>, scalar_prefetch = 0 : i64, scratch_operands = 0 : i64, tpu.core_type = #tpu.core_type<tc>, window_params = [{transform_indices = @transform_0, window_bounds = array<i64: 104, 1024>}, {pipeline_mode = #tpu.pipeline_mode<synchronous>, transform_indices = @transform_1, window_bounds = array<i64: 1024, 512>}, {pipeline_mode = #tpu.pipeline_mode<synchronous>, transform_indices = @transform_2, window_bounds = array<i64: 1, 512>}, {pipeline_mode = #tpu.pipeline_mode<synchronous>, transform_indices = @transform_3, window_bounds = array<i64: 256, 128>}, {pipeline_mode = #tpu.pipeline_mode<synchronous>, transform_indices = @transform_4, window_bounds = array<i64: 1, 128>}, {transform_indices = @transform_5, window_bounds = array<i64: 104, 128>}]} {
    %c0 = arith.constant 0 : index
    %c0_0 = arith.constant 0 : index
    %0 = vector.load %arg1[%c0, %c0_0] : memref<104x1024xf32, #tpu.memory_space<vmem>>, vector<104x1024xf32>
    %c0_1 = arith.constant 0 : index
    %c0_2 = arith.constant 0 : index
    %1 = vector.load %arg2[%c0_1, %c0_2] : memref<1024x512xf32, #tpu.memory_space<vmem>>, vector<1024x512xf32>
    %cst = arith.constant dense<0.000000e+00> : vector<104x512xf32>
    %2 = tpu.matmul %0, %1, %cst {dimension_numbers = #tpu.dot_dimension_numbers<[1], [0], [0], [1], [0, 0, 1, 1], [], []>} : vector<104x1024xf32>, vector<1024x512xf32>, vector<104x512xf32> -> vector<104x512xf32>
    %c0_3 = arith.constant 0 : index
    %c0_4 = arith.constant 0 : index
    %3 = vector.load %arg3[%c0_3, %c0_4] : memref<1x512xf32, #tpu.memory_space<vmem>>, vector<1x512xf32>
    %4 = vector.broadcast %3 : vector<1x512xf32> to vector<104x512xf32>
    %5 = arith.addf %2, %4 : vector<104x512xf32>
    %6 = vector.extract_strided_slice %5 {offsets = [0, 0], sizes = [104, 256], strides = [1, 1]} : vector<104x512xf32> to vector<104x256xf32>
    %7 = math.tanh %6 : vector<104x256xf32>
    %8 = vector.extract_strided_slice %5 {offsets = [0, 256], sizes = [104, 256], strides = [1, 1]} : vector<104x512xf32> to vector<104x256xf32>
    %cst_5 = arith.constant 5.000000e-01 : f32
    %9 = vector.broadcast %cst_5 : f32 to vector<104x256xf32>
    %10 = arith.mulf %9, %8 : vector<104x256xf32>
    %11 = math.tanh %10 : vector<104x256xf32>
    %cst_6 = arith.constant 1.000000e+00 : f32
    %12 = vector.broadcast %cst_6 : f32 to vector<104x256xf32>
    %13 = arith.addf %11, %12 : vector<104x256xf32>
    %cst_7 = arith.constant 5.000000e-01 : f32
    %14 = vector.broadcast %cst_7 : f32 to vector<104x256xf32>
    %15 = arith.mulf %14, %13 : vector<104x256xf32>
    %16 = arith.mulf %7, %15 : vector<104x256xf32>
    %c0_8 = arith.constant 0 : index
    %c0_9 = arith.constant 0 : index
    %17 = vector.load %arg4[%c0_8, %c0_9] : memref<256x128xf32, #tpu.memory_space<vmem>>, vector<256x128xf32>
    %cst_10 = arith.constant dense<0.000000e+00> : vector<104x128xf32>
    %18 = tpu.matmul %16, %17, %cst_10 {dimension_numbers = #tpu.dot_dimension_numbers<[1], [0], [0], [1], [0, 0, 1, 1], [], []>} : vector<104x256xf32>, vector<256x128xf32>, vector<104x128xf32> -> vector<104x128xf32>
    %c0_11 = arith.constant 0 : index
    %c0_12 = arith.constant 0 : index
    %19 = vector.load %arg5[%c0_11, %c0_12] : memref<1x128xf32, #tpu.memory_space<vmem>>, vector<1x128xf32>
    %20 = vector.broadcast %19 : vector<1x128xf32> to vector<104x128xf32>
    %21 = arith.addf %18, %20 : vector<104x128xf32>
    %c0_13 = arith.constant 0 : index
    %c0_14 = arith.constant 0 : index
    %22 = vector.load %arg6[%c0_13, %c0_14] : memref<104x128xf32, #tpu.memory_space<vmem>>, vector<104x128xf32>
    tpu.vector_store %arg6[%c0_13, %c0_14], %21 {strides = array<i32>} : memref<104x128xf32, #tpu.memory_space<vmem>>, vector<104x128xf32>,
    return
  }
  func.func @transform_0(%arg0: i32) -> (i32, i32) {
    %c0_i32 = arith.constant 0 : i32
    %c0_i32_0 = arith.constant 0 : i32
    return %arg0, %c0_i32 : i32, i32
  }
  func.func @transform_1(%arg0: i32) -> (i32, i32) {
    %c0_i32 = arith.constant 0 : i32
    %c0_i32_0 = arith.constant 0 : i32
    %c0_i32_1 = arith.constant 0 : i32
    return %c0_i32, %c0_i32_0 : i32, i32
  }
  func.func @transform_2(%arg0: i32) -> (i32, i32) {
    %c0_i32 = arith.constant 0 : i32
    %c0_i32_0 = arith.constant 0 : i32
    %c0_i32_1 = arith.constant 0 : i32
    return %c0_i32, %c0_i32_0 : i32, i32
  }
  func.func @transform_3(%arg0: i32) -> (i32, i32) {
    %c0_i32 = arith.constant 0 : i32
    %c0_i32_0 = arith.constant 0 : i32
    %c0_i32_1 = arith.constant 0 : i32
    return %c0_i32, %c0_i32_0 : i32, i32
  }
  func.func @transform_4(%arg0: i32) -> (i32, i32) {
    %c0_i32 = arith.constant 0 : i32
    %c0_i32_0 = arith.constant 0 : i32
    %c0_i32_1 = arith.constant 0 : i32
    return %c0_i32, %c0_i32_0 : i32, i32
  }
  func.func @transform_5(%arg0: i32) -> (i32, i32) {
    %c0_i32 = arith.constant 0 : i32
    %c0_i32_0 = arith.constant 0 : i32
    return %arg0, %c0_i32 : i32, i32
  }
}

</mosaic_0001>

<bundles_post_ra>
// kernel: tpu_custom_call.1
= control target key start
LH: loop header
LB: loop body
LE: loop exit
PB: predicated region body
PF: predicated region fallthrough
CT: control target
= control target key end

     0   :  { %10 = vsyncpa [#allocation3], 0  ;;  %s4181_s0 = inlined_call_operand.hbm [shape: f32[200,1024], index: 0, kind: input, shape index: {}]   ;;  %s4182_s1 = inlined_call_operand.hbm [shape: f32[1024,512], index: 1, kind: input, shape index: {}]   ;;  %s4183_s2 = inlined_call_operand.hbm [shape: f32[1,512], index: 2, kind: input, shape index: {}]   ;;  %s4184_s3 = inlined_call_operand.hbm [shape: f32[256,128], index: 3, kind: input, shape index: {}]   ;;  %s4185_s4 = inlined_call_operand.hbm [shape: f32[1,128], index: 4, kind: input, shape index: {}]   ;;  %s4186_s5 = inlined_call_operand.hbm [shape: f32[200,128], index: 5, kind: output, shape index: {}]  }
   0x1   :  { %12 = vsyncpa [#allocation3 + $0x1], 0 }
   0x2   :  { %13 = vsyncpa [#allocation6], 0 }
   0x3   :  { %14 = vsyncpa [#allocation9], 0 }
   0x4   :  { %15 = vsyncpa [#allocation4], 0 }
   0x5   :  { %17 = vsyncpa [#allocation4 + $0x1], 0  ;;  %s3250_s18 = smov 0   ;;  %s3252_s19 = smov 0  }
   0x6   :  { %s3254_s20 = smov 0   ;;  %s3256_s21 = smov 0  }
   0x7 LB: > { %s3271_s22 = sadd.s32 4294967295, %s3204_s21   ;;  %s2567_s23 = sadd.s32 4294967294, %s3204_s21   ;;  %s3204_s21 = sphi %s3256_s21, %s4239_s21   ;;  %s3200_s20 = sphi %s3254_s20, %s4238_s20   ;;  %s3196_s19 = sphi %s3252_s19, %s4237_s19   ;;  %s3192_s18 = sphi %s3250_s18, %s4236_s18  }
   0x8   : > { %s3275_s24 = sadd.s32 1, %s3204_s21   ;;  %s30_s25 = sadd.s32 1, %s3200_s20 }
   0x9   : > { %s27_s26 = ssub.s32 %s3204_s21, %s3275_s24  ;;  %p37_p0 = scmp.ne.s32.totalorder %s3200_s20, %s3196_s19 }
   0xa   : > { %p28_p1 = scmp.eq.s32.totalorder %s27_s26, 0  ;;  %p38_p2 = scmp.eq.s32.totalorder %s3204_s21, 0 }
   0xb   : > { %p43_p3 = scmp.ne.s32.totalorder %s3196_s19, %s3192_s18  ;;  %p4187_p4 = scmp.eq.s32.totalorder %s3271_s22, 0 }
   0xc   : > { %s3287_s27 = scalar_select %p28_p1, %s3200_s20, %s30_s25  }
   0xd   : > { %p3289_p5 = por %p38_p2, %p37_p0  ;;  %p3295_p6 = por %p4187_p4, %p43_p3 }
   0xe   : > { %p151_p7 = scmp.eq.s32.totalorder %s3271_s22, 1  ;;  %p157_p8 = scmp.eq.s32.totalorder %s2567_s23, 1 }
   0xf   : > { %s4190_s29 = scalar_select %p3295_p6, 1, 0 }
  0x10   : > { %p2568_p9 = scmp.ge.s32.totalorder %s3204_s21, 1  ;;  %p164_p10 = scmp.lt.s32.totalorder %s3204_s21, 3 }
  0x11   : > { %p3302_p11 = por %p151_p7, %p37_p0  ;;  %p3306_p12 = por %p157_p8, %p43_p3 }
  0x12   : > { %p3310_p13 = pnand %p2568_p9, %p164_p10  ;;  %s3206_s8 = smov [#allocation5]  }
  0x13   : > { %s4191_s30 = scalar_select %p3302_p11, 1, 0 }
  0x14   : > { %s4192_s6 = scalar_select %p3306_p12, 1, 0 }
  0x15   : > { %p2723_p1 = pneg %p3310_p13  ;;  %s176_s9 = sshll.u32 %s3206_s8, 4  ;;  %s177_s9 = int_to_ptr.vmem [resolvable:$true] %s176_s9 }
  0x16   : > { %s3207_s11 = smov [#allocation8]   ;;  %s3013_s13 = scalar_lea.vmem %s177_s9, 65536 }
  0x17   : > { %p3318_p2 = pnand %p2723_p1, %p4187_p4  ;;  %s200_s12 = sshll.u32 %s3207_s11, 4  ;;  %s201_s12 = int_to_ptr.vmem [resolvable:$true] %s200_s12 }
  0x18   : > { %p3014_p3 = scmp.ne.s32.totalorder %s177_s9, %s3013_s13  ;;  %p3021_p9 = scmp.lt.s32.totalorder %s177_s9, %s177_s9 }
  0x19   : > { %p3004_p0 = pneg %p3318_p2  ;;  %p3022_p10 = scmp.lt.s32.totalorder %s3013_s13, %s3013_s13 }
  0x1b   : > { %p3016_p7 = pnand %p3014_p3, %p3004_p0  ;;  %p3023_p12 = por %p3022_p10, %p3021_p9 }
  0x1d   : > { %p3017_p8 = pneg %p3016_p7 }
  0x1f   : > { %p3024_p1 = pnand %p3023_p12, %p3017_p8 }
  0x21   : > { %3027 = shalt.err (!%p3024_p1)
}
  0x22   : > { %s3208_s14 = smov 512   ;;  %s3209_s15 = smov 32  }
  0x23   : > { %2726 = dma.hbm_to_vmem [thread:$0]  (!%p3318_p2), %s4182_s1, 65536, %s177_s9, [#allocation6], %s3208_s14, %s3208_s14, %s3209_s15  }
  0x24   : > { %s3039_s23 = scalar_lea.vmem %s201_s12, 4096  ;;  %p3047_p11 = scmp.lt.s32.totalorder %s201_s12, %s201_s12 }
  0x25   : > { %p3040_p4 = scmp.ne.s32.totalorder %s201_s12, %s3039_s23  ;;  %p3048_p6 = scmp.lt.s32.totalorder %s3039_s23, %s3039_s23 }
  0x27   : > { %p3042_p3 = pnand %p3040_p4, %p3004_p0  ;;  %p3049_p9 = por %p3048_p6, %p3047_p11 }
  0x29   : > { %p3043_p7 = pneg %p3042_p3 }
  0x2b   : > { %p3050_p12 = pnand %p3049_p9, %p3043_p7 }
  0x2d   : > { %3053 = shalt.err (!%p3050_p12)
}
  0x2e   : > { %s3210_s25 = smov 128   ;;  %s3211_s26 = smov 8  }
  0x2f   : > { %2732 = dma.hbm_to_vmem [thread:$0]  (!%p3318_p2), %s4184_s3, 4096, %s201_s12, [#allocation9], %s3210_s25, %s3210_s25, %s3211_s26  }
  0x30   : > { %s3212_s9 = smov [#allocation7]   ;;  %s3213_s14 = smov [#allocation10]  }
  0x31   : > { %s190_s13 = sshll.u32 %s3212_s9, 4  ;;  %s214_s15 = sshll.u32 %s3213_s14, 4  ;;  %s191_s13 = int_to_ptr.vmem [resolvable:$true] %s190_s13  ;;  %s215_s15 = int_to_ptr.vmem [resolvable:$true] %s214_s15 }
  0x32   : > { %s3065_s16 = scalar_lea.vmem %s191_s13, 64  ;;  %p3073_p8 = scmp.lt.s32.totalorder %s191_s13, %s191_s13 }
  0x33   : > { %p3066_p4 = scmp.ne.s32.totalorder %s191_s13, %s3065_s16  ;;  %p3074_p10 = scmp.lt.s32.totalorder %s3065_s16, %s3065_s16 }
  0x35   : > { %p3068_p6 = pnand %p3066_p4, %p3004_p0  ;;  %p3075_p1 = por %p3074_p10, %p3073_p8 }
  0x37   : > { %p3069_p11 = pneg %p3068_p6 }
  0x39   : > { %p3076_p3 = pnand %p3075_p1, %p3069_p11 }
  0x3b   : > { %3079 = shalt.err (!%p3076_p3)
}
  0x3c   : > { %2729 = dma.hbm_to_vmem [thread:$0]  (!%p3318_p2), %s4183_s2, 64, %s191_s13, [#allocation6]  }
  0x3d   : > { %s3091_s23 = scalar_lea.vmem %s215_s15, 16  ;;  %s3098_s25 = scalar_lea.vmem %s215_s15, 32 }
  0x3e   : > { %p3092_p7 = scmp.ne.s32.totalorder %s215_s15, %s3091_s23  ;;  %p3099_p4 = scmp.lt.s32.totalorder %s215_s15, %s215_s15 }
  0x3f   : > { %p3100_p6 = scmp.lt.s32.totalorder %s3098_s25, %s3091_s23 }
  0x40   : > { %p3094_p9 = pnand %p3092_p7, %p3004_p0 }
  0x41   : > { %p3101_p8 = por %p3100_p6, %p3099_p4 }
  0x42   : > { %p3095_p12 = pneg %p3094_p9 }
  0x44   : > { %p3102_p11 = pnand %p3101_p8, %p3095_p12 }
  0x46   : > { %3105 = shalt.err (!%p3102_p11)
}
  0x47   : > { %2735 = dma.hbm_to_vmem [thread:$0]  (!%p3318_p2), %s4185_s4, 16, %s215_s15, [#allocation9]  }
  0x48   : > { %p2573_p10 = scmp.ge.s32.totalorder %s3204_s21, 2 }
  0x4a   : > { %221 = sbr.rel (%p2573_p10) target bundleno = 113 (0x71), region = 32 }
  0x4f   : > { %224 = sbr.rel (!%p3289_p5) target bundleno = 113 (0x71), region = 36  ;;  %s225_s11 = sand.u32 (%p3289_p5), 1, %s3200_s20  }
  0x50   : > { %s230_s9 = smul.u32 (%p3289_p5), 13, %s3204_s21  ;;  %s3366_s16 = scalar_lea.sflag (%p3289_p5), [#allocation3], %s225_s11 }
  0x51   : > { %s2702_s13 = smul.u32 (%p3289_p5), 832, %s225_s11 }
  0x52   : > { %s231_s14 = ssub.s32 (%p3289_p5), 25, %s230_s9 }
  0x53   : > { %p232_p0 = scmp.lt.s32.totalorder (%p3289_p5), %s231_s14, 13  ;;  %s229_s17 = scalar_lea.vmem (%p3289_p5), [#allocation2], %s2702_s13 }
  0x55   : > { %s4241_s14 = smov (!%p232_p0, %s231_s14), 13 }
  0x56   : > { %s3363_s10 = sshll.u32 %s4241_s14, 10 }
  0x57   : > { %s237_s15 = ssub.s32 13312, %s3363_s10 }
  0x58   : > { %238 = vsyncadd %s3366_s16, %s237_s15  ;;  %p2576_p5 = scmp.ne.s32.totalorder %s3363_s10, 0  ;;  %s2598_s28 = smul.u32 13312, %s3204_s21 }
  0x59   : > { %s244_s12 = sshll.u32 %s229_s17, 4  ;;  %s3110_s13 = scalar_lea.hbm %s4181_s0, 25600  ;;  %s3376_s12 = int_to_ptr.vmem [resolvable:$true] %s244_s12 }
  0x5a   : > { %s3374_s26 = scalar_lea.hbm %s4181_s0, %s2598_s28 }
  0x5b   : > { %s3106_s8 = scalar_lea.hbm %s3374_s26, %s3363_s10  ;;  %p3111_p7 = scmp.lt.s32.totalorder %s3374_s26, %s4181_s0 }
  0x5c   : > { %p3107_p2 = scmp.ne.s32.totalorder %s3374_s26, %s3106_s8  ;;  %p3112_p9 = scmp.lt.s32.totalorder %s3110_s13, %s3106_s8 }
  0x5e   : > { %p3108_p1 = pnand %p3107_p2, %p2576_p5  ;;  %p3113_p12 = por %p3112_p9, %p3111_p7 }
  0x60   : > { %p3109_p3 = pneg %p3108_p1 }
  0x62   : > { %p3114_p4 = pnand %p3113_p12, %p3109_p3 }
  0x64   : > { %3117 = shalt.err (!%p3114_p4)
}
  0x65   : > { %s3118_s17 = scalar_lea.vmem %s3376_s12, %s3363_s10  ;;  %s3214_s28 = smov [#allocation2]  }
  0x66   : > { %p3119_p6 = scmp.ne.s32.totalorder %s3376_s12, %s3118_s17  ;;  %s3122_s23 = sshll.u32 %s3214_s28, 4  ;;  %s3123_s23 = int_to_ptr.vmem [resolvable:$false] %s3122_s23 }
  0x67   : > { %s3124_s25 = scalar_lea.vmem %s3123_s23, 26624  ;;  %p3125_p0 = scmp.lt.s32.totalorder %s3376_s12, %s3123_s23 }
  0x68   : > { %p3120_p8 = pnand %p3119_p6, %p2576_p5  ;;  %p3126_p2 = scmp.lt.s32.totalorder %s3124_s25, %s3118_s17 }
  0x6a   : > { %p3121_p11 = pneg %p3120_p8  ;;  %p3127_p1 = por %p3126_p2, %p3125_p0 }
  0x6c   : > { %p3128_p7 = pnand %p3127_p1, %p3121_p11 }
  0x6e   : > { %3131 = shalt.err (!%p3128_p7)
}
  0x6f   : > { %s3215_s8 = smov 1024   ;;  %s3216_s11 = smov 64  }
  0x70   : > { %250 = dma.hbm_to_vmem [thread:$0]  (%p2576_p5), %s3374_s26, %s3363_s10, %s3376_s12, %s3366_s16, %s3215_s8, %s3215_s8, %s3216_s11  }
  0x71 PF: > { %256 = sbr.rel (%p3310_p13) target bundleno = 963 (0x3c3), region = 40 }
  0x76   : > { %s3405_s9 = sand.u32 1, %s3196_s19   ;;  %p4195_p3 = scmp.ne.s32.totalorder %s4190_s29, 0 }
  0x77   : > { %s2703_s13 = smul.u32 832, %s3405_s9  ;;  %s259_s14 = scalar_lea.sflag [#allocation3], %s3405_s9 }
  0x79   : > { %s3409_s15 = scalar_lea.vmem [#allocation2], %s2703_s13 }
  0x7a   : > { %3175 = dma.done.wait (%p4195_p3), %s259_s14, 13312  }
  0x7b   : > { %3177 = vsyncadd (%p4195_p3), %s259_s14, 4294953984  ;;  %p4196_p5 = scmp.eq.s32.totalorder %s3271_s22, 0 }
  0x7d   : > { %3179 = dma.done.wait (%p4196_p5), [#allocation6], 65600   ;;  %p4197_p13 = pmov %p4196_p5 }
  0x7e   : > { %p4198_p9 = pmov %p4196_p5 }
  0x7f   : > { %3181 = vsyncadd (%p4197_p13), [#allocation6], 4294901696 }
  0x80   : > { %3183 = dma.done.wait (%p4198_p9), [#allocation9], 4112   ;;  %p4199_p12 = pmov %p4196_p5 }
  0x81   : > { %v481_v0 = vld [vmem:[#allocation5 + $0x1e8] sm:$0xff]  ;;  %v480_v2 = vld [vmem:[#allocation5 + $0x1e0] sm:$0xff]  ;;  %s2704_s29 = smul.u32 104, %s3405_s9  ;;  %s2437_s10 = scalar_lea.sflag [#allocation4], %s3405_s9 }
  0x82   : > { %3185 = vsyncadd (%p4199_p12), [#allocation9], 4294963184  ;;  %v609_v1 = vld [vmem:[#allocation5 + $0x5e8] sm:$0xff]  ;;  %954 = vmatprep.subr.mxu0 %v481_v0  ;;  %v608_v3 = vld [vmem:[#allocation5 + $0x5e0] sm:$0xff]  ;;  %p4234_p4 = scmp.ne.s32.totalorder %s4191_s30, 0 }
  0x83   : > { %1097 = vmatprep.subr.mxu1 %v609_v1  ;;  %v477_v4 = vld [vmem:[#allocation5 + $0x1c8] sm:$0xff]  ;;  %955 = vmatpush1.msra.mxu0 %v480_v2  ;;  %v476_v6 = vld [vmem:[#allocation5 + $0x1c0] sm:$0xff]  ;;  %s4092_s7 = scalar_lea.vmem [#allocation11], %s2704_s29  ;;  %s2444_s16 = smul.u32 (%p4234_p4), 13, %s3271_s22 }
  0x84   : > { %v605_v5 = vld [vmem:[#allocation5 + $0x5c8] sm:$0xff]  ;;  %1098 = vmatpush1.msra.mxu1 %v608_v3  ;;  %v604_v7 = vld [vmem:[#allocation5 + $0x5c0] sm:$0xff]  ;;  %956 = vmatprep.subr.mxu0 %v477_v4 }
  0x85   : > { %v473_v8 = vld [vmem:[#allocation5 + $0x1a8] sm:$0xff]  ;;  %1099 = vmatprep.subr.mxu1 %v605_v5  ;;  %v472_v10 = vld [vmem:[#allocation5 + $0x1a0] sm:$0xff]  ;;  %957 = vmatpush1.msra.mxu0 %v476_v6  ;;  %s2445_s12 = ssub.s32 (%p4234_p4), 25, %s2444_s16 }
  0x86   : > { %v601_v9 = vld [vmem:[#allocation5 + $0x5a8] sm:$0xff]  ;;  %v600_v11 = vld [vmem:[#allocation5 + $0x5a0] sm:$0xff]  ;;  %1100 = vmatpush1.msra.mxu1 %v604_v7  ;;  %958 = vmatprep.subr.mxu0 %v473_v8  ;;  %p2446_p6 = scmp.lt.s32.totalorder (%p4234_p4), %s2445_s12, 13 }
  0x87   : > { %v469_v12 = vld [vmem:[#allocation5 + $0x188] sm:$0xff]  ;;  %1101 = vmatprep.subr.mxu1 %v601_v9  ;;  %v468_v14 = vld [vmem:[#allocation5 + $0x180] sm:$0xff]  ;;  %959 = vmatpush1.msra.mxu0 %v472_v10 }
  0x88   : > { %v597_v13 = vld [vmem:[#allocation5 + $0x588] sm:$0xff]  ;;  %v596_v15 = vld [vmem:[#allocation5 + $0x580] sm:$0xff]  ;;  %1102 = vmatpush1.msra.mxu1 %v600_v11  ;;  %960 = vmatprep.subr.mxu0 %v469_v12 }
  0x89   : > { %v465_v16 = vld [vmem:[#allocation5 + $0x168] sm:$0xff]  ;;  %1103 = vmatprep.subr.mxu1 %v597_v13  ;;  %v464_v18 = vld [vmem:[#allocation5 + $0x160] sm:$0xff]  ;;  %961 = vmatpush1.msra.mxu0 %v468_v14 }
  0x8a   : > { %v593_v17 = vld [vmem:[#allocation5 + $0x568] sm:$0xff]  ;;  %v592_v19 = vld [vmem:[#allocation5 + $0x560] sm:$0xff]  ;;  %1104 = vmatpush1.msra.mxu1 %v596_v15  ;;  %962 = vmatprep.subr.mxu0 %v465_v16 }
  0x8b   : > { %v461_v20 = vld [vmem:[#allocation5 + $0x148] sm:$0xff]  ;;  %1105 = vmatprep.subr.mxu1 %v593_v17  ;;  %v460_v22 = vld [vmem:[#allocation5 + $0x140] sm:$0xff]  ;;  %963 = vmatpush1.msra.mxu0 %v464_v18 }
  0x8c   : > { %v589_v21 = vld [vmem:[#allocation5 + $0x548] sm:$0xff]  ;;  %v588_v23 = vld [vmem:[#allocation5 + $0x540] sm:$0xff]  ;;  %1106 = vmatpush1.msra.mxu1 %v592_v19  ;;  %964 = vmatprep.subr.mxu0 %v461_v20 }
  0x8d   : > { %v457_v24 = vld [vmem:[#allocation5 + $0x128] sm:$0xff]  ;;  %1107 = vmatprep.subr.mxu1 %v589_v21  ;;  %v456_v26 = vld [vmem:[#allocation5 + $0x120] sm:$0xff]  ;;  %965 = vmatpush1.msra.mxu0 %v460_v22 }
  0x8e   : > { %v585_v25 = vld [vmem:[#allocation5 + $0x528] sm:$0xff]  ;;  %v584_v27 = vld [vmem:[#allocation5 + $0x520] sm:$0xff]  ;;  %1108 = vmatpush1.msra.mxu1 %v588_v23  ;;  %966 = vmatprep.subr.mxu0 %v457_v24 }
  0x8f   : > { %v453_v28 = vld [vmem:[#allocation5 + $0x108] sm:$0xff]  ;;  %1109 = vmatprep.subr.mxu1 %v585_v25  ;;  %v452_v30 = vld [vmem:[#allocation5 + $0x100] sm:$0xff]  ;;  %967 = vmatpush1.msra.mxu0 %v456_v26 }
  0x90   : > { %v581_v29 = vld [vmem:[#allocation5 + $0x508] sm:$0xff]  ;;  %v580_v31 = vld [vmem:[#allocation5 + $0x500] sm:$0xff]  ;;  %1110 = vmatpush1.msra.mxu1 %v584_v27  ;;  %968 = vmatprep.subr.mxu0 %v453_v28 }
  0x91   : > { %v449_v32 = vld [vmem:[#allocation5 + $0xe8] sm:$0xff]  ;;  %1111 = vmatprep.subr.mxu1 %v581_v29  ;;  %v448_v34 = vld [vmem:[#allocation5 + $0xe0] sm:$0xff]  ;;  %969 = vmatpush1.msra.mxu0 %v452_v30 }
  0x92   : > { %v577_v33 = vld [vmem:[#allocation5 + $0x4e8] sm:$0xff]  ;;  %v576_v35 = vld [vmem:[#allocation5 + $0x4e0] sm:$0xff]  ;;  %1112 = vmatpush1.msra.mxu1 %v580_v31  ;;  %970 = vmatprep.subr.mxu0 %v449_v32 }
  0x93   : > { %v445_v36 = vld [vmem:[#allocation5 + $0xc8] sm:$0xff]  ;;  %1113 = vmatprep.subr.mxu1 %v577_v33  ;;  %v444_v38 = vld [vmem:[#allocation5 + $0xc0] sm:$0xff]  ;;  %971 = vmatpush1.msra.mxu0 %v448_v34 }
  0x94   : > { %v573_v37 = vld [vmem:[#allocation5 + $0x4c8] sm:$0xff]  ;;  %v572_v39 = vld [vmem:[#allocation5 + $0x4c0] sm:$0xff]  ;;  %1114 = vmatpush1.msra.mxu1 %v576_v35  ;;  %972 = vmatprep.subr.mxu0 %v445_v36 }
  0x95   : > { %v441_v40 = vld [vmem:[#allocation5 + $0xa8] sm:$0xff]  ;;  %1115 = vmatprep.subr.mxu1 %v573_v37  ;;  %v440_v42 = vld [vmem:[#allocation5 + $0xa0] sm:$0xff]  ;;  %973 = vmatpush1.msra.mxu0 %v444_v38 }
  0x96   : > { %v569_v41 = vld [vmem:[#allocation5 + $0x4a8] sm:$0xff]  ;;  %v568_v43 = vld [vmem:[#allocation5 + $0x4a0] sm:$0xff]  ;;  %1116 = vmatpush1.msra.mxu1 %v572_v39  ;;  %974 = vmatprep.subr.mxu0 %v441_v40 }
  0x97   : > { %v437_v44 = vld [vmem:[#allocation5 + $0x88] sm:$0xff]  ;;  %1117 = vmatprep.subr.mxu1 %v569_v41  ;;  %v436_v46 = vld [vmem:[#allocation5 + $0x80] sm:$0xff]  ;;  %975 = vmatpush1.msra.mxu0 %v440_v42 }
  0x98   : > { %v565_v45 = vld [vmem:[#allocation5 + $0x488] sm:$0xff]  ;;  %v564_v47 = vld [vmem:[#allocation5 + $0x480] sm:$0xff]  ;;  %1118 = vmatpush1.msra.mxu1 %v568_v43  ;;  %976 = vmatprep.subr.mxu0 %v437_v44 }
  0x99   : > { %v433_v48 = vld [vmem:[#allocation5 + $0x68] sm:$0xff]  ;;  %1119 = vmatprep.subr.mxu1 %v565_v45  ;;  %v432_v50 = vld [vmem:[#allocation5 + $0x60] sm:$0xff]  ;;  %977 = vmatpush1.msra.mxu0 %v436_v46 }
  0x9a   : > { %v561_v49 = vld [vmem:[#allocation5 + $0x468] sm:$0xff]  ;;  %v560_v51 = vld [vmem:[#allocation5 + $0x460] sm:$0xff]  ;;  %1120 = vmatpush1.msra.mxu1 %v564_v47  ;;  %978 = vmatprep.subr.mxu0 %v433_v48 }
  0x9b   : > { %v429_v52 = vld [vmem:[#allocation5 + $0x48] sm:$0xff]  ;;  %1121 = vmatprep.subr.mxu1 %v561_v49  ;;  %v428_v54 = vld [vmem:[#allocation5 + $0x40] sm:$0xff]  ;;  %979 = vmatpush1.msra.mxu0 %v432_v50 }
  0x9c   : > { %v557_v53 = vld [vmem:[#allocation5 + $0x448] sm:$0xff]  ;;  %v556_v55 = vld [vmem:[#allocation5 + $0x440] sm:$0xff]  ;;  %1122 = vmatpush1.msra.mxu1 %v560_v51  ;;  %980 = vmatprep.subr.mxu0 %v429_v52 }
  0x9d   : > { %v425_v56 = vld [vmem:[#allocation5 + $0x28] sm:$0xff]  ;;  %1123 = vmatprep.subr.mxu1 %v557_v53  ;;  %v424_v58 = vld [vmem:[#allocation5 + $0x20] sm:$0xff]  ;;  %981 = vmatpush1.msra.mxu0 %v428_v54 }
  0x9e   : > { %v553_v57 = vld [vmem:[#allocation5 + $0x428] sm:$0xff]  ;;  %v552_v59 = vld [vmem:[#allocation5 + $0x420] sm:$0xff]  ;;  %1124 = vmatpush1.msra.mxu1 %v556_v55  ;;  %982 = vmatprep.subr.mxu0 %v425_v56 }
  0x9f   : > { %v421_v60 = vld [vmem:[#allocation5 + $0x8] sm:$0xff]  ;;  %1125 = vmatprep.subr.mxu1 %v553_v57  ;;  %v420_v62 = vld [vmem:[#allocation5] sm:$0xff]  ;;  %983 = vmatpush1.msra.mxu0 %v424_v58 }
  0xa0   : > { %v549_v61 = vld [vmem:[#allocation5 + $0x408] sm:$0xff]  ;;  %v548_v63 = vld [vmem:[#allocation5 + $0x400] sm:$0xff]  ;;  %1126 = vmatpush1.msra.mxu1 %v552_v59  ;;  %984 = vmatprep.subr.mxu0 %v421_v60 }
  0xa1   : > { %v545_v0 = vld [vmem:[#allocation5 + $0x3e8] sm:$0xff]  ;;  %1127 = vmatprep.subr.mxu1 %v549_v61  ;;  %v544_v2 = vld [vmem:[#allocation5 + $0x3e0] sm:$0xff]  ;;  %985 = vmatpush1.msra.mxu0 %v420_v62 }
  0xa2   : > { %v673_v1 = vld [vmem:[#allocation5 + $0x7e8] sm:$0xff]  ;;  %v672_v3 = vld [vmem:[#allocation5 + $0x7e0] sm:$0xff]  ;;  %1128 = vmatpush1.msra.mxu1 %v548_v63  ;;  %986 = vmatprep.subr.mxu0 %v545_v0 }
  0xa3   : > { %v541_v4 = vld [vmem:[#allocation5 + $0x3c8] sm:$0xff]  ;;  %1129 = vmatprep.subr.mxu1 %v673_v1  ;;  %v540_v6 = vld [vmem:[#allocation5 + $0x3c0] sm:$0xff]  ;;  %987 = vmatpush2.msra.mxu0 %v544_v2  ;;  %v319_v2 = vld [vmem:[%s3409_s15 + $0x18] sm:$0xff] }
  0xa4   : > { %v669_v5 = vld [vmem:[#allocation5 + $0x7c8] sm:$0xff]  ;;  %v668_v7 = vld [vmem:[#allocation5 + $0x7c0] sm:$0xff]  ;;  %1130 = vmatpush2.msra.mxu1 %v672_v3  ;;  %988 = vmatprep.subr.mxu0 %v541_v4 }
  0xa5   : > { %v537_v8 = vld [vmem:[#allocation5 + $0x3a8] sm:$0xff]  ;;  %1131 = vmatprep.subr.mxu1 %v669_v5  ;;  %v536_v10 = vld [vmem:[#allocation5 + $0x3a0] sm:$0xff]  ;;  %989 = vmatpush2.msra.mxu0 %v540_v6  ;;  %v318_v5 = vld [vmem:[%s3409_s15 + $0x10] sm:$0xff] }
  0xa6   : > { %v665_v9 = vld [vmem:[#allocation5 + $0x7a8] sm:$0xff]  ;;  %v664_v11 = vld [vmem:[#allocation5 + $0x7a0] sm:$0xff]  ;;  %1132 = vmatpush2.msra.mxu1 %v668_v7  ;;  %990 = vmatprep.subr.mxu0 %v537_v8 }
  0xa7   : > { %v533_v12 = vld [vmem:[#allocation5 + $0x388] sm:$0xff]  ;;  %1133 = vmatprep.subr.mxu1 %v665_v9  ;;  %v532_v14 = vld [vmem:[#allocation5 + $0x380] sm:$0xff]  ;;  %991 = vmatpush2.msra.mxu0 %v536_v10 }
  0xa8   : > { %v661_v13 = vld [vmem:[#allocation5 + $0x788] sm:$0xff]  ;;  %v660_v15 = vld [vmem:[#allocation5 + $0x780] sm:$0xff]  ;;  %1134 = vmatpush2.msra.mxu1 %v664_v11  ;;  %992 = vmatprep.subr.mxu0 %v533_v12 }
  0xa9   : > { %v529_v16 = vld [vmem:[#allocation5 + $0x368] sm:$0xff]  ;;  %1135 = vmatprep.subr.mxu1 %v661_v13  ;;  %v528_v18 = vld [vmem:[#allocation5 + $0x360] sm:$0xff]  ;;  %993 = vmatpush2.msra.mxu0 %v532_v14 }
  0xaa   : > { %v657_v17 = vld [vmem:[#allocation5 + $0x768] sm:$0xff]  ;;  %v656_v19 = vld [vmem:[#allocation5 + $0x760] sm:$0xff]  ;;  %1136 = vmatpush2.msra.mxu1 %v660_v15  ;;  %994 = vmatprep.subr.mxu0 %v529_v16 }
  0xab   : > { %v525_v20 = vld [vmem:[#allocation5 + $0x348] sm:$0xff]  ;;  %1137 = vmatprep.subr.mxu1 %v657_v17  ;;  %v524_v22 = vld [vmem:[#allocation5 + $0x340] sm:$0xff]  ;;  %995 = vmatpush2.msra.mxu0 %v528_v18 }
  0xac   : > { %v653_v21 = vld [vmem:[#allocation5 + $0x748] sm:$0xff]  ;;  %v652_v23 = vld [vmem:[#allocation5 + $0x740] sm:$0xff]  ;;  %1138 = vmatpush2.msra.mxu1 %v656_v19  ;;  %996 = vmatprep.subr.mxu0 %v525_v20 }
  0xad   : > { %v521_v24 = vld [vmem:[#allocation5 + $0x328] sm:$0xff]  ;;  %1139 = vmatprep.subr.mxu1 %v653_v21  ;;  %v520_v26 = vld [vmem:[#allocation5 + $0x320] sm:$0xff]  ;;  %997 = vmatpush2.msra.mxu0 %v524_v22 }
  0xae   : > { %v649_v25 = vld [vmem:[#allocation5 + $0x728] sm:$0xff]  ;;  %v648_v27 = vld [vmem:[#allocation5 + $0x720] sm:$0xff]  ;;  %1140 = vmatpush2.msra.mxu1 %v652_v23  ;;  %998 = vmatprep.subr.mxu0 %v521_v24 }
  0xaf   : > { %v517_v28 = vld [vmem:[#allocation5 + $0x308] sm:$0xff]  ;;  %1141 = vmatprep.subr.mxu1 %v649_v25  ;;  %v516_v30 = vld [vmem:[#allocation5 + $0x300] sm:$0xff]  ;;  %999 = vmatpush2.msra.mxu0 %v520_v26 }
  0xb0   : > { %v645_v29 = vld [vmem:[#allocation5 + $0x708] sm:$0xff]  ;;  %v644_v31 = vld [vmem:[#allocation5 + $0x700] sm:$0xff]  ;;  %1142 = vmatpush2.msra.mxu1 %v648_v27  ;;  %1000 = vmatprep.subr.mxu0 %v517_v28 }
  0xb1   : > { %v513_v32 = vld [vmem:[#allocation5 + $0x2e8] sm:$0xff]  ;;  %1143 = vmatprep.subr.mxu1 %v645_v29  ;;  %v512_v34 = vld [vmem:[#allocation5 + $0x2e0] sm:$0xff]  ;;  %1001 = vmatpush2.msra.mxu0 %v516_v30 }
  0xb2   : > { %v641_v33 = vld [vmem:[#allocation5 + $0x6e8] sm:$0xff]  ;;  %v640_v35 = vld [vmem:[#allocation5 + $0x6e0] sm:$0xff]  ;;  %1144 = vmatpush2.msra.mxu1 %v644_v31  ;;  %1002 = vmatprep.subr.mxu0 %v513_v32 }
  0xb3   : > { %v509_v36 = vld [vmem:[#allocation5 + $0x2c8] sm:$0xff]  ;;  %1145 = vmatprep.subr.mxu1 %v641_v33  ;;  %v508_v38 = vld [vmem:[#allocation5 + $0x2c0] sm:$0xff]  ;;  %1003 = vmatpush2.msra.mxu0 %v512_v34 }
  0xb4   : > { %v637_v37 = vld [vmem:[#allocation5 + $0x6c8] sm:$0xff]  ;;  %v636_v39 = vld [vmem:[#allocation5 + $0x6c0] sm:$0xff]  ;;  %1146 = vmatpush2.msra.mxu1 %v640_v35  ;;  %1004 = vmatprep.subr.mxu0 %v509_v36 }
  0xb5   : > { %v505_v40 = vld [vmem:[#allocation5 + $0x2a8] sm:$0xff]  ;;  %1147 = vmatprep.subr.mxu1 %v637_v37  ;;  %v504_v42 = vld [vmem:[#allocation5 + $0x2a0] sm:$0xff]  ;;  %1005 = vmatpush2.msra.mxu0 %v508_v38  ;;  %v327_v38 = vld [vmem:[%s3409_s15 + $0x58] sm:$0xff] }
  0xb6   : > { %v633_v41 = vld [vmem:[#allocation5 + $0x6a8] sm:$0xff]  ;;  %v632_v43 = vld [vmem:[#allocation5 + $0x6a0] sm:$0xff]  ;;  %1148 = vmatpush2.msra.mxu1 %v636_v39  ;;  %1006 = vmatprep.subr.mxu0 %v505_v40 }
  0xb7   : > { %v501_v44 = vld [vmem:[#allocation5 + $0x288] sm:$0xff]  ;;  %1149 = vmatprep.subr.mxu1 %v633_v41  ;;  %v500_v46 = vld [vmem:[#allocation5 + $0x280] sm:$0xff]  ;;  %1007 = vmatpush2.msra.mxu0 %v504_v42  ;;  %v326_v41 = vld [vmem:[%s3409_s15 + $0x50] sm:$0xff] }
  0xb8   : > { %v629_v45 = vld [vmem:[#allocation5 + $0x688] sm:$0xff]  ;;  %v628_v47 = vld [vmem:[#allocation5 + $0x680] sm:$0xff]  ;;  %1150 = vmatpush2.msra.mxu1 %v632_v43  ;;  %1008 = vmatprep.subr.mxu0 %v501_v44 }
  0xb9   : > { %v497_v48 = vld [vmem:[#allocation5 + $0x268] sm:$0xff]  ;;  %1151 = vmatprep.subr.mxu1 %v629_v45  ;;  %v496_v50 = vld [vmem:[#allocation5 + $0x260] sm:$0xff]  ;;  %1009 = vmatpush2.msra.mxu0 %v500_v46 }
  0xba   : > { %v625_v49 = vld [vmem:[#allocation5 + $0x668] sm:$0xff]  ;;  %v624_v51 = vld [vmem:[#allocation5 + $0x660] sm:$0xff]  ;;  %1152 = vmatpush2.msra.mxu1 %v628_v47  ;;  %1010 = vmatprep.subr.mxu0 %v497_v48 }
  0xbb   : > { %v493_v52 = vld [vmem:[#allocation5 + $0x248] sm:$0xff]  ;;  %1153 = vmatprep.subr.mxu1 %v625_v49  ;;  %v492_v54 = vld [vmem:[#allocation5 + $0x240] sm:$0xff]  ;;  %1011 = vmatpush2.msra.mxu0 %v496_v50  ;;  %v335_v50 = vld [vmem:[%s3409_s15 + $0x98] sm:$0xff] }
  0xbc   : > { %v621_v53 = vld [vmem:[#allocation5 + $0x648] sm:$0xff]  ;;  %v620_v55 = vld [vmem:[#allocation5 + $0x640] sm:$0xff]  ;;  %1154 = vmatpush2.msra.mxu1 %v624_v51  ;;  %1012 = vmatprep.subr.mxu0 %v493_v52 }
  0xbd   : > { %v489_v56 = vld [vmem:[#allocation5 + $0x228] sm:$0xff]  ;;  %1155 = vmatprep.subr.mxu1 %v621_v53  ;;  %v488_v58 = vld [vmem:[#allocation5 + $0x220] sm:$0xff]  ;;  %1013 = vmatpush2.msra.mxu0 %v492_v54  ;;  %v334_v53 = vld [vmem:[%s3409_s15 + $0x90] sm:$0xff] }
  0xbe   : > { %v617_v57 = vld [vmem:[#allocation5 + $0x628] sm:$0xff]  ;;  %v616_v59 = vld [vmem:[#allocation5 + $0x620] sm:$0xff]  ;;  %1156 = vmatpush2.msra.mxu1 %v620_v55  ;;  %1014 = vmatprep.subr.mxu0 %v489_v56 }
  0xbf   : > { %v485_v60 = vld [vmem:[#allocation5 + $0x208] sm:$0xff]  ;;  %1157 = vmatprep.subr.mxu1 %v617_v57  ;;  %v484_v62 = vld [vmem:[#allocation5 + $0x200] sm:$0xff]  ;;  %1015 = vmatpush2.msra.mxu0 %v488_v58 }
  0xc0   : > { %v613_v61 = vld [vmem:[#allocation5 + $0x608] sm:$0xff]  ;;  %1158 = vmatpush2.msra.mxu1 %v616_v59  ;;  %v612_v0 = vld [vmem:[#allocation5 + $0x600] sm:$0xff]  ;;  %1016 = vmatprep.subr.mxu0 %v485_v60 }
  0xc1   : > { %v317_v63 = vld [vmem:[%s3409_s15 + $0x8] sm:$0xff]  ;;  %v316_v1 = vld [vmem:[%s3409_s15] sm:$0xff]  ;;  %1159 = vmatprep.subr.mxu1 %v613_v61  ;;  %1017 = vmatpush2.msra.mxu0 %v484_v62  ;;  %v343_v62 = vld [vmem:[%s3409_s15 + $0xd8] sm:$0xff] }
  0xc2   : > { %v737_v3 = vld [vmem:[#allocation5 + $0x9e8] sm:$0xff]  ;;  %1018 = vmatprep.mubr.f32.mxu0 %v317_v63  ;;  %1160 = vmatpush2.msra.mxu1 %v612_v0  ;;  %v736_v6 = vld [vmem:[#allocation5 + $0x9e0] sm:$0xff] }
  0xc3   : > { %v865_v4 = vld [vmem:[#allocation5 + $0xde8] sm:$0xff]  ;;  %1019 = vmatmul.mubr.f32.vlgmr.msra.gmra.mxu0 %v316_v1  ;;  %v864_v7 = vld [vmem:[#allocation5 + $0xde0] sm:$0xff]  ;;  %1161 = vmatprep.mubr.f32.mxu1 %v319_v2  ;;  %v342_v1 = vld [vmem:[%s3409_s15 + $0xd0] sm:$0xff] }
  0xc4   : > { %1240 = vmatprep.subr.mxu0 %v737_v3  ;;  %v733_v8 = vld [vmem:[#allocation5 + $0x9c8] sm:$0xff]  ;;  %1383 = vmatprep.subr.mxu1 %v865_v4  ;;  %v732_v10 = vld [vmem:[#allocation5 + $0x9c0] sm:$0xff] }
  0xc5   : > { %v861_v9 = vld [vmem:[#allocation5 + $0xdc8] sm:$0xff]  ;;  %1162 = vmatmul.mubr.f32.vlgmr.msra.gmra.mxu1 %v318_v5  ;;  %v860_v11 = vld [vmem:[#allocation5 + $0xdc0] sm:$0xff]  ;;  %1241 = vmatpush1.msra.mxu0 %v736_v6 }
  0xc6   : > { %1384 = vmatpush1.msra.mxu1 %v864_v7  ;;  %v729_v12 = vld [vmem:[#allocation5 + $0x9a8] sm:$0xff]  ;;  %1242 = vmatprep.subr.mxu0 %v733_v8  ;;  %v728_v14 = vld [vmem:[#allocation5 + $0x9a0] sm:$0xff] }
  0xc7   : > { %v857_v13 = vld [vmem:[#allocation5 + $0xda8] sm:$0xff]  ;;  %1385 = vmatprep.subr.mxu1 %v861_v9  ;;  %v856_v15 = vld [vmem:[#allocation5 + $0xda0] sm:$0xff]  ;;  %1243 = vmatpush1.msra.mxu0 %v732_v10  ;;  %v351_v10 = vld [vmem:[%s3409_s15 + $0x118] sm:$0xff] }
  0xc8   : > { %1386 = vmatpush1.msra.mxu1 %v860_v11  ;;  %v725_v16 = vld [vmem:[#allocation5 + $0x988] sm:$0xff]  ;;  %1244 = vmatprep.subr.mxu0 %v729_v12  ;;  %v724_v18 = vld [vmem:[#allocation5 + $0x980] sm:$0xff] }
  0xc9   : > { %v853_v17 = vld [vmem:[#allocation5 + $0xd88] sm:$0xff]  ;;  %1387 = vmatprep.subr.mxu1 %v857_v13  ;;  %v852_v19 = vld [vmem:[#allocation5 + $0xd80] sm:$0xff]  ;;  %1245 = vmatpush1.msra.mxu0 %v728_v14  ;;  %v350_v13 = vld [vmem:[%s3409_s15 + $0x110] sm:$0xff] }
  0xca   : > { %1388 = vmatpush1.msra.mxu1 %v856_v15  ;;  %v721_v20 = vld [vmem:[#allocation5 + $0x968] sm:$0xff]  ;;  %1246 = vmatprep.subr.mxu0 %v725_v16  ;;  %v720_v22 = vld [vmem:[#allocation5 + $0x960] sm:$0xff] }
  0xcb   : > { %v849_v21 = vld [vmem:[#allocation5 + $0xd68] sm:$0xff]  ;;  %1389 = vmatprep.subr.mxu1 %v853_v17  ;;  %v848_v23 = vld [vmem:[#allocation5 + $0xd60] sm:$0xff]  ;;  %1247 = vmatpush1.msra.mxu0 %v724_v18 }
  0xcc   : > { %1390 = vmatpush1.msra.mxu1 %v852_v19  ;;  %v717_v24 = vld [vmem:[#allocation5 + $0x948] sm:$0xff]  ;;  %1248 = vmatprep.subr.mxu0 %v721_v20  ;;  %v716_v26 = vld [vmem:[#allocation5 + $0x940] sm:$0xff] }
  0xcd   : > { %v845_v25 = vld [vmem:[#allocation5 + $0xd48] sm:$0xff]  ;;  %1391 = vmatprep.subr.mxu1 %v849_v21  ;;  %v844_v27 = vld [vmem:[#allocation5 + $0xd40] sm:$0xff]  ;;  %1249 = vmatpush1.msra.mxu0 %v720_v22  ;;  %v359_v22 = vld [vmem:[%s3409_s15 + $0x158] sm:$0xff] }
  0xce   : > { %1392 = vmatpush1.msra.mxu1 %v848_v23  ;;  %v713_v28 = vld [vmem:[#allocation5 + $0x928] sm:$0xff]  ;;  %1250 = vmatprep.subr.mxu0 %v717_v24  ;;  %v712_v30 = vld [vmem:[#allocation5 + $0x920] sm:$0xff] }
  0xcf   : > { %v841_v29 = vld [vmem:[#allocation5 + $0xd28] sm:$0xff]  ;;  %1393 = vmatprep.subr.mxu1 %v845_v25  ;;  %v840_v31 = vld [vmem:[#allocation5 + $0xd20] sm:$0xff]  ;;  %1251 = vmatpush1.msra.mxu0 %v716_v26  ;;  %v358_v25 = vld [vmem:[%s3409_s15 + $0x150] sm:$0xff] }
  0xd0   : > { %1394 = vmatpush1.msra.mxu1 %v844_v27  ;;  %v325_v32 = vld [vmem:[%s3409_s15 + $0x48] sm:$0xff]  ;;  %1252 = vmatprep.subr.mxu0 %v713_v28  ;;  %v324_v35 = vld [vmem:[%s3409_s15 + $0x40] sm:$0xff] }
  0xd1   : > { %v709_v33 = vld [vmem:[#allocation5 + $0x908] sm:$0xff]  ;;  %1395 = vmatprep.subr.mxu1 %v841_v29  ;;  %1253 = vmatpush1.msra.mxu0 %v712_v30  ;;  %v708_v36 = vld [vmem:[#allocation5 + $0x900] sm:$0xff] }
  0xd2   : > { %v837_v34 = vld [vmem:[#allocation5 + $0xd08] sm:$0xff]  ;;  %1396 = vmatpush1.msra.mxu1 %v840_v31  ;;  %v836_v37 = vld [vmem:[#allocation5 + $0xd00] sm:$0xff]  ;;  %1024 = vmatprep.mubr.f32.mxu0 %v325_v32 }
  0xd3   : > { %1254 = vmatprep.subr.mxu0 %v709_v33  ;;  %v705_v39 = vld [vmem:[#allocation5 + $0x8e8] sm:$0xff]  ;;  %1397 = vmatprep.subr.mxu1 %v837_v34  ;;  %v704_v42 = vld [vmem:[#allocation5 + $0x8e0] sm:$0xff]  ;;  %v367_v34 = vld [vmem:[%s3409_s15 + $0x198] sm:$0xff] }
  0xd4   : > { %1025 = vmatmul.mubr.f32.gmra.mxu0 %v324_v35  ;;  %v833_v40 = vld [vmem:[#allocation5 + $0xce8] sm:$0xff]  ;;  %1398 = vmatpush1.msra.mxu1 %v836_v37  ;;  %v832_v43 = vld [vmem:[#allocation5 + $0xce0] sm:$0xff]  ;;  %v366_v37 = vld [vmem:[%s3409_s15 + $0x190] sm:$0xff] }
  0xd5   : > { %1255 = vmatpush1.msra.mxu0 %v708_v36  ;;  %1167 = vmatprep.mubr.f32.mxu1 %v327_v38  ;;  %v333_v44 = vld [vmem:[%s3409_s15 + $0x88] sm:$0xff]  ;;  %v332_v47 = vld [vmem:[%s3409_s15 + $0x80] sm:$0xff] }
  0xd6   : > { %1256 = vmatprep.subr.mxu0 %v705_v39  ;;  %v701_v45 = vld [vmem:[#allocation5 + $0x8c8] sm:$0xff]  ;;  %1399 = vmatprep.subr.mxu1 %v833_v40  ;;  %v700_v48 = vld [vmem:[#allocation5 + $0x8c0] sm:$0xff] }
  0xd7   : > { %1168 = vmatmul.mubr.f32.gmra.mxu1 %v326_v41  ;;  %v829_v46 = vld [vmem:[#allocation5 + $0xcc8] sm:$0xff]  ;;  %1257 = vmatpush1.msra.mxu0 %v704_v42  ;;  %v828_v49 = vld [vmem:[#allocation5 + $0xcc0] sm:$0xff] }
  0xd8   : > { %1400 = vmatpush1.msra.mxu1 %v832_v43  ;;  %1030 = vmatprep.mubr.f32.mxu0 %v333_v44  ;;  %v697_v51 = vld [vmem:[#allocation5 + $0x8a8] sm:$0xff]  ;;  %v696_v54 = vld [vmem:[#allocation5 + $0x8a0] sm:$0xff] }
  0xd9   : > { %1258 = vmatprep.subr.mxu0 %v701_v45  ;;  %1401 = vmatprep.subr.mxu1 %v829_v46  ;;  %v825_v52 = vld [vmem:[#allocation5 + $0xca8] sm:$0xff]  ;;  %v824_v55 = vld [vmem:[#allocation5 + $0xca0] sm:$0xff]  ;;  %v375_v46 = vld [vmem:[%s3409_s15 + $0x1d8] sm:$0xff] }
  0xda   : > { %1031 = vmatmul.mubr.f32.gmra.mxu0 %v332_v47  ;;  %1402 = vmatpush1.msra.mxu1 %v828_v49  ;;  %v341_v56 = vld [vmem:[%s3409_s15 + $0xc8] sm:$0xff]  ;;  %v340_v59 = vld [vmem:[%s3409_s15 + $0xc0] sm:$0xff]  ;;  %v374_v49 = vld [vmem:[%s3409_s15 + $0x1d0] sm:$0xff] }
  0xdb   : > { %1259 = vmatpush1.msra.mxu0 %v700_v48  ;;  %1173 = vmatprep.mubr.f32.mxu1 %v335_v50  ;;  %v693_v57 = vld [vmem:[#allocation5 + $0x888] sm:$0xff]  ;;  %v692_v60 = vld [vmem:[#allocation5 + $0x880] sm:$0xff] }
  0xdc   : > { %1260 = vmatprep.subr.mxu0 %v697_v51  ;;  %1403 = vmatprep.subr.mxu1 %v825_v52  ;;  %v821_v58 = vld [vmem:[#allocation5 + $0xc88] sm:$0xff]  ;;  %v820_v61 = vld [vmem:[#allocation5 + $0xc80] sm:$0xff] }
  0xdd   : > { %1174 = vmatmul.mubr.f32.gmra.mxu1 %v334_v53  ;;  %1261 = vmatpush1.msra.mxu0 %v696_v54  ;;  %v689_v63 = vld [vmem:[#allocation5 + $0x868] sm:$0xff]  ;;  %v688_v2 = vld [vmem:[#allocation5 + $0x860] sm:$0xff] }
  0xde   : > { %1404 = vmatpush1.msra.mxu1 %v824_v55  ;;  %1036 = vmatprep.mubr.f32.mxu0 %v341_v56  ;;  %v817_v0 = vld [vmem:[#allocation5 + $0xc68] sm:$0xff]  ;;  %v816_v3 = vld [vmem:[#allocation5 + $0xc60] sm:$0xff] }
  0xdf   : > { %1262 = vmatprep.subr.mxu0 %v693_v57  ;;  %1405 = vmatprep.subr.mxu1 %v821_v58  ;;  %v349_v4 = vld [vmem:[%s3409_s15 + $0x108] sm:$0xff]  ;;  %v348_v7 = vld [vmem:[%s3409_s15 + $0x100] sm:$0xff]  ;;  %v383_v58 = vld [vmem:[%s3409_s15 + $0x218] sm:$0xff] }
  0xe0   : > { %1037 = vmatmul.mubr.f32.gmra.mxu0 %v340_v59  ;;  %1406 = vmatpush1.msra.mxu1 %v820_v61  ;;  %v685_v5 = vld [vmem:[#allocation5 + $0x848] sm:$0xff]  ;;  %v684_v8 = vld [vmem:[#allocation5 + $0x840] sm:$0xff]  ;;  %v382_v61 = vld [vmem:[%s3409_s15 + $0x210] sm:$0xff] }
  0xe1   : > { %1263 = vmatpush1.msra.mxu0 %v692_v60  ;;  %1179 = vmatprep.mubr.f32.mxu1 %v343_v62  ;;  %v813_v6 = vld [vmem:[#allocation5 + $0xc48] sm:$0xff]  ;;  %v812_v9 = vld [vmem:[#allocation5 + $0xc40] sm:$0xff] }
  0xe2   : > { %1264 = vmatprep.subr.mxu0 %v689_v63  ;;  %1407 = vmatprep.subr.mxu1 %v817_v0  ;;  %v681_v11 = vld [vmem:[#allocation5 + $0x828] sm:$0xff]  ;;  %v680_v14 = vld [vmem:[#allocation5 + $0x820] sm:$0xff] }
  0xe3   : > { %1180 = vmatmul.mubr.f32.gmra.mxu1 %v342_v1  ;;  %1265 = vmatpush1.msra.mxu0 %v688_v2  ;;  %v809_v12 = vld [vmem:[#allocation5 + $0xc28] sm:$0xff]  ;;  %v808_v15 = vld [vmem:[#allocation5 + $0xc20] sm:$0xff] }
  0xe4   : > { %1408 = vmatpush1.msra.mxu1 %v816_v3  ;;  %1042 = vmatprep.mubr.f32.mxu0 %v349_v4  ;;  %v357_v16 = vld [vmem:[%s3409_s15 + $0x148] sm:$0xff]  ;;  %v356_v19 = vld [vmem:[%s3409_s15 + $0x140] sm:$0xff] }
  0xe5   : > { %1266 = vmatprep.subr.mxu0 %v685_v5  ;;  %1409 = vmatprep.subr.mxu1 %v813_v6  ;;  %v677_v17 = vld [vmem:[#allocation5 + $0x808] sm:$0xff]  ;;  %v676_v20 = vld [vmem:[#allocation5 + $0x800] sm:$0xff]  ;;  %v391_v6 = vld [vmem:[%s3409_s15 + $0x258] sm:$0xff] }
  0xe6   : > { %1043 = vmatmul.mubr.f32.gmra.mxu0 %v348_v7  ;;  %1410 = vmatpush1.msra.mxu1 %v812_v9  ;;  %v805_v18 = vld [vmem:[#allocation5 + $0xc08] sm:$0xff]  ;;  %v804_v21 = vld [vmem:[#allocation5 + $0xc00] sm:$0xff]  ;;  %v390_v9 = vld [vmem:[%s3409_s15 + $0x250] sm:$0xff] }
  0xe7   : > { %1267 = vmatpush1.msra.mxu0 %v684_v8  ;;  %1185 = vmatprep.mubr.f32.mxu1 %v351_v10  ;;  %v801_v23 = vld [vmem:[#allocation5 + $0xbe8] sm:$0xff]  ;;  %v800_v26 = vld [vmem:[#allocation5 + $0xbe0] sm:$0xff] }
  0xe8   : > { %1268 = vmatprep.subr.mxu0 %v681_v11  ;;  %1411 = vmatprep.subr.mxu1 %v809_v12  ;;  %v929_v24 = vld [vmem:[#allocation5 + $0xfe8] sm:$0xff]  ;;  %v928_v27 = vld [vmem:[#allocation5 + $0xfe0] sm:$0xff] }
  0xe9   : > { %1186 = vmatmul.mubr.f32.gmra.mxu1 %v350_v13  ;;  %1269 = vmatpush1.msra.mxu0 %v680_v14  ;;  %v365_v28 = vld [vmem:[%s3409_s15 + $0x188] sm:$0xff]  ;;  %v364_v31 = vld [vmem:[%s3409_s15 + $0x180] sm:$0xff] }
  0xea   : > { %1412 = vmatpush1.msra.mxu1 %v808_v15  ;;  %1048 = vmatprep.mubr.f32.mxu0 %v357_v16  ;;  %v797_v29 = vld [vmem:[#allocation5 + $0xbc8] sm:$0xff]  ;;  %v796_v32 = vld [vmem:[#allocation5 + $0xbc0] sm:$0xff] }
  0xeb   : > { %1270 = vmatprep.subr.mxu0 %v677_v17  ;;  %1413 = vmatprep.subr.mxu1 %v805_v18  ;;  %v925_v30 = vld [vmem:[#allocation5 + $0xfc8] sm:$0xff]  ;;  %v924_v33 = vld [vmem:[#allocation5 + $0xfc0] sm:$0xff]  ;;  %v399_v18 = vld [vmem:[%s3409_s15 + $0x298] sm:$0xff] }
  0xec   : > { %1049 = vmatmul.mubr.f32.gmra.mxu0 %v356_v19  ;;  %1414 = vmatpush1.msra.mxu1 %v804_v21  ;;  %v793_v35 = vld [vmem:[#allocation5 + $0xba8] sm:$0xff]  ;;  %v792_v38 = vld [vmem:[#allocation5 + $0xba0] sm:$0xff]  ;;  %v398_v21 = vld [vmem:[%s3409_s15 + $0x290] sm:$0xff] }
  0xed   : > { %1271 = vmatpush1.msra.mxu0 %v676_v20  ;;  %1191 = vmatprep.mubr.f32.mxu1 %v359_v22  ;;  %v921_v36 = vld [vmem:[#allocation5 + $0xfa8] sm:$0xff]  ;;  %v920_v39 = vld [vmem:[#allocation5 + $0xfa0] sm:$0xff] }
  0xee   : > { %1272 = vmatprep.subr.mxu0 %v801_v23  ;;  %1415 = vmatprep.subr.mxu1 %v929_v24  ;;  %v373_v40 = vld [vmem:[%s3409_s15 + $0x1c8] sm:$0xff]  ;;  %v372_v43 = vld [vmem:[%s3409_s15 + $0x1c0] sm:$0xff] }
  0xef   : > { %1192 = vmatmul.mubr.f32.gmra.mxu1 %v358_v25  ;;  %1273 = vmatpush2.msra.mxu0 %v800_v26  ;;  %v789_v41 = vld [vmem:[#allocation5 + $0xb88] sm:$0xff]  ;;  %v788_v44 = vld [vmem:[#allocation5 + $0xb80] sm:$0xff] }
  0xf0   : > { %1416 = vmatpush2.msra.mxu1 %v928_v27  ;;  %1054 = vmatprep.mubr.f32.mxu0 %v365_v28  ;;  %v917_v42 = vld [vmem:[#allocation5 + $0xf88] sm:$0xff]  ;;  %v916_v45 = vld [vmem:[#allocation5 + $0xf80] sm:$0xff] }
  0xf1   : > { %1274 = vmatprep.subr.mxu0 %v797_v29  ;;  %1417 = vmatprep.subr.mxu1 %v925_v30  ;;  %v785_v47 = vld [vmem:[#allocation5 + $0xb68] sm:$0xff]  ;;  %v784_v50 = vld [vmem:[#allocation5 + $0xb60] sm:$0xff]  ;;  %v407_v30 = vld [vmem:[%s3409_s15 + $0x2d8] sm:$0xff] }
  0xf2   : > { %1055 = vmatmul.mubr.f32.gmra.mxu0 %v364_v31  ;;  %1418 = vmatpush2.msra.mxu1 %v924_v33  ;;  %v913_v48 = vld [vmem:[#allocation5 + $0xf68] sm:$0xff]  ;;  %v912_v51 = vld [vmem:[#allocation5 + $0xf60] sm:$0xff]  ;;  %v406_v33 = vld [vmem:[%s3409_s15 + $0x2d0] sm:$0xff] }
  0xf3   : > { %1275 = vmatpush2.msra.mxu0 %v796_v32  ;;  %1197 = vmatprep.mubr.f32.mxu1 %v367_v34  ;;  %v381_v52 = vld [vmem:[%s3409_s15 + $0x208] sm:$0xff]  ;;  %v380_v55 = vld [vmem:[%s3409_s15 + $0x200] sm:$0xff] }
  0xf4   : > { %1276 = vmatprep.subr.mxu0 %v793_v35  ;;  %1419 = vmatprep.subr.mxu1 %v921_v36  ;;  %v781_v53 = vld [vmem:[#allocation5 + $0xb48] sm:$0xff]  ;;  %v780_v56 = vld [vmem:[#allocation5 + $0xb40] sm:$0xff] }
  0xf5   : > { %1198 = vmatmul.mubr.f32.gmra.mxu1 %v366_v37  ;;  %1277 = vmatpush2.msra.mxu0 %v792_v38  ;;  %v909_v54 = vld [vmem:[#allocation5 + $0xf48] sm:$0xff]  ;;  %v908_v57 = vld [vmem:[#allocation5 + $0xf40] sm:$0xff] }
  0xf6   : > { %1420 = vmatpush2.msra.mxu1 %v920_v39  ;;  %1060 = vmatprep.mubr.f32.mxu0 %v373_v40  ;;  %v777_v59 = vld [vmem:[#allocation5 + $0xb28] sm:$0xff]  ;;  %v776_v62 = vld [vmem:[#allocation5 + $0xb20] sm:$0xff] }
  0xf7   : > { %1278 = vmatprep.subr.mxu0 %v789_v41  ;;  %1421 = vmatprep.subr.mxu1 %v917_v42  ;;  %v905_v60 = vld [vmem:[#allocation5 + $0xf28] sm:$0xff]  ;;  %v904_v63 = vld [vmem:[#allocation5 + $0xf20] sm:$0xff]  ;;  %v415_v42 = vld [vmem:[%s3409_s15 + $0x318] sm:$0xff] }
  0xf8   : > { %1061 = vmatmul.mubr.f32.gmra.mxu0 %v372_v43  ;;  %1422 = vmatpush2.msra.mxu1 %v916_v45  ;;  %v389_v0 = vld [vmem:[%s3409_s15 + $0x248] sm:$0xff]  ;;  %v388_v3 = vld [vmem:[%s3409_s15 + $0x240] sm:$0xff]  ;;  %v414_v45 = vld [vmem:[%s3409_s15 + $0x310] sm:$0xff] }
  0xf9   : > { %1279 = vmatpush2.msra.mxu0 %v788_v44  ;;  %1203 = vmatprep.mubr.f32.mxu1 %v375_v46  ;;  %v773_v1 = vld [vmem:[#allocation5 + $0xb08] sm:$0xff]  ;;  %v772_v4 = vld [vmem:[#allocation5 + $0xb00] sm:$0xff] }
  0xfa   : > { %1280 = vmatprep.subr.mxu0 %v785_v47  ;;  %1423 = vmatprep.subr.mxu1 %v913_v48  ;;  %v901_v2 = vld [vmem:[#allocation5 + $0xf08] sm:$0xff]  ;;  %v900_v5 = vld [vmem:[#allocation5 + $0xf00] sm:$0xff] }
  0xfb   : > { %1204 = vmatmul.mubr.f32.gmra.mxu1 %v374_v49  ;;  %1281 = vmatpush2.msra.mxu0 %v784_v50  ;;  %v769_v7 = vld [vmem:[#allocation5 + $0xae8] sm:$0xff]  ;;  %v768_v10 = vld [vmem:[#allocation5 + $0xae0] sm:$0xff] }
  0xfc   : > { %1424 = vmatpush2.msra.mxu1 %v912_v51  ;;  %1066 = vmatprep.mubr.f32.mxu0 %v381_v52  ;;  %v897_v8 = vld [vmem:[#allocation5 + $0xee8] sm:$0xff]  ;;  %v896_v11 = vld [vmem:[#allocation5 + $0xee0] sm:$0xff] }
  0xfd   : > { %1282 = vmatprep.subr.mxu0 %v781_v53  ;;  %1425 = vmatprep.subr.mxu1 %v909_v54  ;;  %v397_v12 = vld [vmem:[%s3409_s15 + $0x288] sm:$0xff]  ;;  %v396_v15 = vld [vmem:[%s3409_s15 + $0x280] sm:$0xff]  ;;  %v323_v54 = vld [vmem:[%s3409_s15 + $0x38] sm:$0xff] }
  0xfe   : > { %1067 = vmatmul.mubr.f32.gmra.mxu0 %v380_v55  ;;  %1426 = vmatpush2.msra.mxu1 %v908_v57  ;;  %v765_v13 = vld [vmem:[#allocation5 + $0xac8] sm:$0xff]  ;;  %v764_v16 = vld [vmem:[#allocation5 + $0xac0] sm:$0xff]  ;;  %v483_v55 = vld [vmem:[#allocation5 + $0x1f8] sm:$0xff] }
  0xff   : > { %1283 = vmatpush2.msra.mxu0 %v780_v56  ;;  %1209 = vmatprep.mubr.f32.mxu1 %v383_v58  ;;  %v893_v14 = vld [vmem:[#allocation5 + $0xec8] sm:$0xff]  ;;  %v892_v17 = vld [vmem:[#allocation5 + $0xec0] sm:$0xff]  ;;  %v611_v56 = vld [vmem:[#allocation5 + $0x5f8] sm:$0xff] }
 0x100   : > { %1284 = vmatprep.subr.mxu0 %v777_v59  ;;  %1427 = vmatprep.subr.mxu1 %v905_v60  ;;  %v761_v19 = vld [vmem:[#allocation5 + $0xaa8] sm:$0xff]  ;;  %v760_v22 = vld [vmem:[#allocation5 + $0xaa0] sm:$0xff]  ;;  %v322_v57 = vld [vmem:[%s3409_s15 + $0x30] sm:$0xff] }
 0x101   : > { %1210 = vmatmul.mubr.f32.gmra.mxu1 %v382_v61  ;;  %1285 = vmatpush2.msra.mxu0 %v776_v62  ;;  %v889_v20 = vld [vmem:[#allocation5 + $0xea8] sm:$0xff]  ;;  %v888_v23 = vld [vmem:[#allocation5 + $0xea0] sm:$0xff]  ;;  %v482_v58 = vld [vmem:[#allocation5 + $0x1f0] sm:$0xff] }
 0x102   : > { %1428 = vmatpush2.msra.mxu1 %v904_v63  ;;  %1072 = vmatprep.mubr.f32.mxu0 %v389_v0  ;;  %v405_v24 = vld [vmem:[%s3409_s15 + $0x2c8] sm:$0xff]  ;;  %v404_v27 = vld [vmem:[%s3409_s15 + $0x2c0] sm:$0xff]  ;;  %v610_v59 = vld [vmem:[#allocation5 + $0x5f0] sm:$0xff] }
 0x103   : > { %1286 = vmatprep.subr.mxu0 %v773_v1  ;;  %1429 = vmatprep.subr.mxu1 %v901_v2  ;;  %v757_v25 = vld [vmem:[#allocation5 + $0xa88] sm:$0xff]  ;;  %v756_v28 = vld [vmem:[#allocation5 + $0xa80] sm:$0xff]  ;;  %v479_v60 = vld [vmem:[#allocation5 + $0x1d8] sm:$0xff] }
 0x104   : > { %1073 = vmatmul.mubr.f32.gmra.mxu0 %v388_v3  ;;  %1430 = vmatpush2.msra.mxu1 %v900_v5  ;;  %v885_v26 = vld [vmem:[#allocation5 + $0xe88] sm:$0xff]  ;;  %v884_v29 = vld [vmem:[#allocation5 + $0xe80] sm:$0xff]  ;;  %v607_v61 = vld [vmem:[#allocation5 + $0x5d8] sm:$0xff] }
 0x105   : > { %1287 = vmatpush2.msra.mxu0 %v772_v4  ;;  %1215 = vmatprep.mubr.f32.mxu1 %v391_v6  ;;  %v753_v31 = vld [vmem:[#allocation5 + $0xa68] sm:$0xff]  ;;  %v752_v34 = vld [vmem:[#allocation5 + $0xa60] sm:$0xff]  ;;  %v478_v63 = vld [vmem:[#allocation5 + $0x1d0] sm:$0xff] }
 0x106   : > { %1288 = vmatprep.subr.mxu0 %v769_v7  ;;  %1431 = vmatprep.subr.mxu1 %v897_v8  ;;  %v881_v32 = vld [vmem:[#allocation5 + $0xe68] sm:$0xff]  ;;  %v880_v35 = vld [vmem:[#allocation5 + $0xe60] sm:$0xff]  ;;  %v606_v0 = vld [vmem:[#allocation5 + $0x5d0] sm:$0xff] }
 0x107   : > { %1216 = vmatmul.mubr.f32.gmra.mxu1 %v390_v9  ;;  %1289 = vmatpush2.msra.mxu0 %v768_v10  ;;  %v413_v36 = vld [vmem:[%s3409_s15 + $0x308] sm:$0xff]  ;;  %v412_v39 = vld [vmem:[%s3409_s15 + $0x300] sm:$0xff]  ;;  %v475_v2 = vld [vmem:[#allocation5 + $0x1b8] sm:$0xff] }
 0x108   : > { %1432 = vmatpush2.msra.mxu1 %v896_v11  ;;  %1078 = vmatprep.mubr.f32.mxu0 %v397_v12  ;;  %v749_v37 = vld [vmem:[#allocation5 + $0xa48] sm:$0xff]  ;;  %v748_v40 = vld [vmem:[#allocation5 + $0xa40] sm:$0xff]  ;;  %v603_v3 = vld [vmem:[#allocation5 + $0x5b8] sm:$0xff] }
 0x109   : > { %1290 = vmatprep.subr.mxu0 %v765_v13  ;;  %1433 = vmatprep.subr.mxu1 %v893_v14  ;;  %v877_v38 = vld [vmem:[#allocation5 + $0xe48] sm:$0xff]  ;;  %v876_v41 = vld [vmem:[#allocation5 + $0xe40] sm:$0xff]  ;;  %v331_v4 = vld [vmem:[%s3409_s15 + $0x78] sm:$0xff] }
 0x10a   : > { %1079 = vmatmul.mubr.f32.gmra.mxu0 %v396_v15  ;;  %1434 = vmatpush2.msra.mxu1 %v892_v17  ;;  %v745_v43 = vld [vmem:[#allocation5 + $0xa28] sm:$0xff]  ;;  %v744_v46 = vld [vmem:[#allocation5 + $0xa20] sm:$0xff]  ;;  %v474_v5 = vld [vmem:[#allocation5 + $0x1b0] sm:$0xff] }
 0x10b   : > { %1291 = vmatpush2.msra.mxu0 %v764_v16  ;;  %1221 = vmatprep.mubr.f32.mxu1 %v399_v18  ;;  %v873_v44 = vld [vmem:[#allocation5 + $0xe28] sm:$0xff]  ;;  %v872_v47 = vld [vmem:[#allocation5 + $0xe20] sm:$0xff]  ;;  %v602_v6 = vld [vmem:[#allocation5 + $0x5b0] sm:$0xff] }
 0x10c   : > { %1292 = vmatprep.subr.mxu0 %v761_v19  ;;  %1435 = vmatprep.subr.mxu1 %v889_v20  ;;  %v741_v48 = vld [vmem:[#allocation5 + $0xa08] sm:$0xff]  ;;  %v740_v50 = vld [vmem:[#allocation5 + $0xa00] sm:$0xff]  ;;  %v471_v7 = vld [vmem:[#allocation5 + $0x198] sm:$0xff] }
 0x10d   : > { %1222 = vmatmul.mubr.f32.gmra.mxu1 %v398_v21  ;;  %1293 = vmatpush2.msra.mxu0 %v760_v22  ;;  %v869_v49 = vld [vmem:[#allocation5 + $0xe08] sm:$0xff]  ;;  %v868_v52 = vld [vmem:[#allocation5 + $0xe00] sm:$0xff]  ;;  %v330_v8 = vld [vmem:[%s3409_s15 + $0x70] sm:$0xff] }
 0x10e   : > { %1436 = vmatpush2.msra.mxu1 %v888_v23  ;;  %1084 = vmatprep.mubr.f32.mxu0 %v405_v24  ;;  %v321_v51 = vld [vmem:[%s3409_s15 + $0x28] sm:$0xff]  ;;  %v320_v53 = vld [vmem:[%s3409_s15 + $0x20] sm:$0xff]  ;;  %v599_v9 = vld [vmem:[#allocation5 + $0x598] sm:$0xff] }
 0x10f   : > { %1294 = vmatprep.subr.mxu0 %v757_v25  ;;  %1437 = vmatprep.subr.mxu1 %v885_v26  ;;  %v329_v62 = vld [vmem:[%s3409_s15 + $0x68] sm:$0xff]  ;;  %v328_v1 = vld [vmem:[%s3409_s15 + $0x60] sm:$0xff]  ;;  %v470_v11 = vld [vmem:[#allocation5 + $0x190] sm:$0xff] }
 0x110   : > { %1085 = vmatmul.mubr.f32.gmra.mxu0 %v404_v27  ;;  %1438 = vmatpush2.msra.mxu1 %v884_v29  ;;  %v337_v10 = vld [vmem:[%s3409_s15 + $0xa8] sm:$0xff]  ;;  %v598_v12 = vld [vmem:[#allocation5 + $0x590] sm:$0xff]  ;;  %v336_v13 = vld [vmem:[%s3409_s15 + $0xa0] sm:$0xff] }
 0x111   : > { %1295 = vmatpush2.msra.mxu0 %v756_v28  ;;  %1227 = vmatprep.mubr.f32.mxu1 %v407_v30  ;;  %v467_v14 = vld [vmem:[#allocation5 + $0x178] sm:$0xff]  ;;  %v466_v17 = vld [vmem:[#allocation5 + $0x170] sm:$0xff]  ;;  %v345_v22 = vld [vmem:[%s3409_s15 + $0xe8] sm:$0xff] }
 0x112   : > { %1296 = vmatprep.subr.mxu0 %v753_v31  ;;  %1439 = vmatprep.subr.mxu1 %v881_v32  ;;  %v595_v15 = vld [vmem:[#allocation5 + $0x578] sm:$0xff]  ;;  %v594_v18 = vld [vmem:[#allocation5 + $0x570] sm:$0xff]  ;;  %v344_v25 = vld [vmem:[%s3409_s15 + $0xe0] sm:$0xff] }
 0x113   : > { %1228 = vmatmul.mubr.f32.gmra.mxu1 %v406_v33  ;;  %1297 = vmatpush2.msra.mxu0 %v752_v34  ;;  %v339_v16 = vld [vmem:[%s3409_s15 + $0xb8] sm:$0xff]  ;;  %v338_v20 = vld [vmem:[%s3409_s15 + $0xb0] sm:$0xff]  ;;  %v353_v34 = vld [vmem:[%s3409_s15 + $0x128] sm:$0xff] }
 0x114   : > { %1440 = vmatpush2.msra.mxu1 %v880_v35  ;;  %1090 = vmatprep.mubr.f32.mxu0 %v413_v36  ;;  %v463_v19 = vld [vmem:[#allocation5 + $0x158] sm:$0xff]  ;;  %v462_v23 = vld [vmem:[#allocation5 + $0x150] sm:$0xff] }
 0x115   : > { %1298 = vmatprep.subr.mxu0 %v749_v37  ;;  %1441 = vmatprep.subr.mxu1 %v877_v38  ;;  %v591_v21 = vld [vmem:[#allocation5 + $0x558] sm:$0xff]  ;;  %v590_v24 = vld [vmem:[#allocation5 + $0x550] sm:$0xff]  ;;  %v352_v37 = vld [vmem:[%s3409_s15 + $0x120] sm:$0xff] }
 0x116   : > { %1091 = vmatmul.mubr.f32.gmra.mxu0 %v412_v39  ;;  %1442 = vmatpush2.msra.mxu1 %v876_v41  ;;  %v459_v26 = vld [vmem:[#allocation5 + $0x138] sm:$0xff]  ;;  %v458_v29 = vld [vmem:[#allocation5 + $0x130] sm:$0xff] }
 0x117   : > { %1299 = vmatpush2.msra.mxu0 %v748_v40  ;;  %1233 = vmatprep.mubr.f32.mxu1 %v415_v42  ;;  %v587_v27 = vld [vmem:[#allocation5 + $0x538] sm:$0xff]  ;;  %v586_v30 = vld [vmem:[#allocation5 + $0x530] sm:$0xff] }
 0x118   : > { %1300 = vmatprep.subr.mxu0 %v745_v43  ;;  %1443 = vmatprep.subr.mxu1 %v873_v44  ;;  %v347_v28 = vld [vmem:[%s3409_s15 + $0xf8] sm:$0xff]  ;;  %v346_v32 = vld [vmem:[%s3409_s15 + $0xf0] sm:$0xff] }
 0x119   : > { %1234 = vmatmul.mubr.f32.gmra.mxu1 %v414_v45  ;;  %1301 = vmatpush2.msra.mxu0 %v744_v46  ;;  %v455_v31 = vld [vmem:[#allocation5 + $0x118] sm:$0xff]  ;;  %v454_v35 = vld [vmem:[#allocation5 + $0x110] sm:$0xff]  ;;  %v361_v46 = vld [vmem:[%s3409_s15 + $0x168] sm:$0xff] }
 0x11a   : > { %1444 = vmatpush2.msra.mxu1 %v872_v47  ;;  %1302 = vmatprep.subr.mxu0 %v741_v48  ;;  %v583_v33 = vld [vmem:[#allocation5 + $0x518] sm:$0xff]  ;;  %v582_v36 = vld [vmem:[#allocation5 + $0x510] sm:$0xff] }
 0x11b   : > { %1445 = vmatprep.subr.mxu1 %v869_v49  ;;  %1303 = vmatpush2.msra.mxu0 %v740_v50  ;;  %v451_v38 = vld [vmem:[#allocation5 + $0xf8] sm:$0xff]  ;;  %v450_v41 = vld [vmem:[#allocation5 + $0xf0] sm:$0xff]  ;;  %v360_v49 = vld [vmem:[%s3409_s15 + $0x160] sm:$0xff] }
 0x11c   : > { %1304 = vmatprep.mubr.f32.mxu0 %v321_v51  ;;  %1446 = vmatpush2.msra.mxu1 %v868_v52  ;;  %v579_v39 = vld [vmem:[#allocation5 + $0x4f8] sm:$0xff]  ;;  %v578_v42 = vld [vmem:[#allocation5 + $0x4f0] sm:$0xff] }
 0x11d   : > { %1305 = vmatmul.mubr.f32.vlgmr.msra.gmra.mxu0 %v320_v53  ;;  %1447 = vmatprep.mubr.f32.mxu1 %v323_v54  ;;  %v355_v40 = vld [vmem:[%s3409_s15 + $0x138] sm:$0xff]  ;;  %v354_v44 = vld [vmem:[%s3409_s15 + $0x130] sm:$0xff] }
 0x11e   : > { %1526 = vmatprep.subr.mxu0 %v483_v55  ;;  %1669 = vmatprep.subr.mxu1 %v611_v56  ;;  %v447_v43 = vld [vmem:[#allocation5 + $0xd8] sm:$0xff]  ;;  %v446_v47 = vld [vmem:[#allocation5 + $0xd0] sm:$0xff] }
 0x11f   : > { %1448 = vmatmul.mubr.f32.vlgmr.msra.gmra.mxu1 %v322_v57  ;;  %1527 = vmatpush1.msra.mxu0 %v482_v58  ;;  %v575_v45 = vld [vmem:[#allocation5 + $0x4d8] sm:$0xff]  ;;  %v574_v48 = vld [vmem:[#allocation5 + $0x4d0] sm:$0xff]  ;;  %v369_v58 = vld [vmem:[%s3409_s15 + $0x1a8] sm:$0xff] }
 0x120   : > { %1670 = vmatpush1.msra.mxu1 %v610_v59  ;;  %1528 = vmatprep.subr.mxu0 %v479_v60  ;;  %v443_v50 = vld [vmem:[#allocation5 + $0xb8] sm:$0xff]  ;;  %v442_v53 = vld [vmem:[#allocation5 + $0xb0] sm:$0xff] }
 0x121   : > { %1671 = vmatprep.subr.mxu1 %v607_v61  ;;  %1310 = vmatprep.mubr.f32.mxu0 %v329_v62  ;;  %v571_v51 = vld [vmem:[#allocation5 + $0x4b8] sm:$0xff]  ;;  %v570_v54 = vld [vmem:[#allocation5 + $0x4b0] sm:$0xff]  ;;  %v368_v61 = vld [vmem:[%s3409_s15 + $0x1a0] sm:$0xff] }
 0x122   : > { %1529 = vmatpush1.msra.mxu0 %v478_v63  ;;  %1672 = vmatpush1.msra.mxu1 %v606_v0  ;;  %v363_v52 = vld [vmem:[%s3409_s15 + $0x178] sm:$0xff]  ;;  %v362_v56 = vld [vmem:[%s3409_s15 + $0x170] sm:$0xff] }
 0x123   : > { %1311 = vmatmul.mubr.f32.gmra.mxu0 %v328_v1  ;;  %1530 = vmatprep.subr.mxu0 %v475_v2  ;;  %v439_v55 = vld [vmem:[#allocation5 + $0x98] sm:$0xff]  ;;  %v438_v59 = vld [vmem:[#allocation5 + $0x90] sm:$0xff] }
 0x124   : > { %1673 = vmatprep.subr.mxu1 %v603_v3  ;;  %1453 = vmatprep.mubr.f32.mxu1 %v331_v4  ;;  %v567_v57 = vld [vmem:[#allocation5 + $0x498] sm:$0xff]  ;;  %v566_v60 = vld [vmem:[#allocation5 + $0x490] sm:$0xff] }
 0x125   : > { %1531 = vmatpush1.msra.mxu0 %v474_v5  ;;  %1674 = vmatpush1.msra.mxu1 %v602_v6  ;;  %v435_v62 = vld [vmem:[#allocation5 + $0x78] sm:$0xff]  ;;  %v434_v1 = vld [vmem:[#allocation5 + $0x70] sm:$0xff]  ;;  %v377_v6 = vld [vmem:[%s3409_s15 + $0x1e8] sm:$0xff] }
 0x126   : > { %1532 = vmatprep.subr.mxu0 %v471_v7  ;;  %1454 = vmatmul.mubr.f32.gmra.mxu1 %v330_v8  ;;  %v563_v63 = vld [vmem:[#allocation5 + $0x478] sm:$0xff]  ;;  %v562_v2 = vld [vmem:[#allocation5 + $0x470] sm:$0xff] }
 0x127   : > { %1675 = vmatprep.subr.mxu1 %v599_v9  ;;  %1316 = vmatprep.mubr.f32.mxu0 %v337_v10  ;;  %v371_v0 = vld [vmem:[%s3409_s15 + $0x1b8] sm:$0xff]  ;;  %v370_v4 = vld [vmem:[%s3409_s15 + $0x1b0] sm:$0xff]  ;;  %v376_v9 = vld [vmem:[%s3409_s15 + $0x1e0] sm:$0xff] }
 0x128   : > { %1533 = vmatpush1.msra.mxu0 %v470_v11  ;;  %1676 = vmatpush1.msra.mxu1 %v598_v12  ;;  %v431_v3 = vld [vmem:[#allocation5 + $0x58] sm:$0xff]  ;;  %v430_v7 = vld [vmem:[#allocation5 + $0x50] sm:$0xff] }
 0x129   : > { %1317 = vmatmul.mubr.f32.gmra.mxu0 %v336_v13  ;;  %1534 = vmatprep.subr.mxu0 %v467_v14  ;;  %v559_v5 = vld [vmem:[#allocation5 + $0x458] sm:$0xff]  ;;  %v558_v8 = vld [vmem:[#allocation5 + $0x450] sm:$0xff] }
 0x12a   : > { %1677 = vmatprep.subr.mxu1 %v595_v15  ;;  %1459 = vmatprep.mubr.f32.mxu1 %v339_v16  ;;  %v427_v10 = vld [vmem:[#allocation5 + $0x38] sm:$0xff]  ;;  %v426_v13 = vld [vmem:[#allocation5 + $0x30] sm:$0xff] }
 0x12b   : > { %1535 = vmatpush1.msra.mxu0 %v466_v17  ;;  %1678 = vmatpush1.msra.mxu1 %v594_v18  ;;  %v555_v11 = vld [vmem:[#allocation5 + $0x438] sm:$0xff]  ;;  %v554_v14 = vld [vmem:[#allocation5 + $0x430] sm:$0xff]  ;;  %v385_v18 = vld [vmem:[%s3409_s15 + $0x228] sm:$0xff] }
 0x12c   : > { %1536 = vmatprep.subr.mxu0 %v463_v19  ;;  %1460 = vmatmul.mubr.f32.gmra.mxu1 %v338_v20  ;;  %v379_v12 = vld [vmem:[%s3409_s15 + $0x1f8] sm:$0xff]  ;;  %v378_v16 = vld [vmem:[%s3409_s15 + $0x1f0] sm:$0xff] }
 0x12d   : > { %1679 = vmatprep.subr.mxu1 %v591_v21  ;;  %1322 = vmatprep.mubr.f32.mxu0 %v345_v22  ;;  %v423_v15 = vld [vmem:[#allocation5 + $0x18] sm:$0xff]  ;;  %v422_v19 = vld [vmem:[#allocation5 + $0x10] sm:$0xff]  ;;  %v384_v21 = vld [vmem:[%s3409_s15 + $0x220] sm:$0xff] }
 0x12e   : > { %1537 = vmatpush1.msra.mxu0 %v462_v23  ;;  %1680 = vmatpush1.msra.mxu1 %v590_v24  ;;  %v551_v17 = vld [vmem:[#allocation5 + $0x418] sm:$0xff]  ;;  %v550_v20 = vld [vmem:[#allocation5 + $0x410] sm:$0xff] }
 0x12f   : > { %1323 = vmatmul.mubr.f32.gmra.mxu0 %v344_v25  ;;  %1538 = vmatprep.subr.mxu0 %v459_v26  ;;  %v547_v22 = vld [vmem:[#allocation5 + $0x3f8] sm:$0xff]  ;;  %v546_v25 = vld [vmem:[#allocation5 + $0x3f0] sm:$0xff] }
 0x130   : > { %1681 = vmatprep.subr.mxu1 %v587_v27  ;;  %1465 = vmatprep.mubr.f32.mxu1 %v347_v28  ;;  %v675_v23 = vld [vmem:[#allocation5 + $0x7f8] sm:$0xff]  ;;  %v674_v26 = vld [vmem:[#allocation5 + $0x7f0] sm:$0xff] }
 0x131   : > { %1539 = vmatpush1.msra.mxu0 %v458_v29  ;;  %1682 = vmatpush1.msra.mxu1 %v586_v30  ;;  %v387_v24 = vld [vmem:[%s3409_s15 + $0x238] sm:$0xff]  ;;  %v386_v28 = vld [vmem:[%s3409_s15 + $0x230] sm:$0xff]  ;;  %v393_v30 = vld [vmem:[%s3409_s15 + $0x268] sm:$0xff] }
 0x132   : > { %1540 = vmatprep.subr.mxu0 %v455_v31  ;;  %1466 = vmatmul.mubr.f32.gmra.mxu1 %v346_v32  ;;  %v543_v27 = vld [vmem:[#allocation5 + $0x3d8] sm:$0xff]  ;;  %v542_v31 = vld [vmem:[#allocation5 + $0x3d0] sm:$0xff] }
 0x133   : > { %1683 = vmatprep.subr.mxu1 %v583_v33  ;;  %1328 = vmatprep.mubr.f32.mxu0 %v353_v34  ;;  %v671_v29 = vld [vmem:[#allocation5 + $0x7d8] sm:$0xff]  ;;  %v670_v32 = vld [vmem:[#allocation5 + $0x7d0] sm:$0xff]  ;;  %v392_v33 = vld [vmem:[%s3409_s15 + $0x260] sm:$0xff] }
 0x134   : > { %1541 = vmatpush1.msra.mxu0 %v454_v35  ;;  %1684 = vmatpush1.msra.mxu1 %v582_v36  ;;  %v539_v34 = vld [vmem:[#allocation5 + $0x3b8] sm:$0xff] }
 0x135   : > { %1329 = vmatmul.mubr.f32.gmra.mxu0 %v352_v37  ;;  %1542 = vmatprep.subr.mxu0 %v451_v38  ;;  %v667_v35 = vld [vmem:[#allocation5 + $0x7b8] sm:$0xff]  ;;  %v538_v37 = vld [vmem:[#allocation5 + $0x3b0] sm:$0xff] }
 0x136   : > { %1685 = vmatprep.subr.mxu1 %v579_v39  ;;  %1471 = vmatprep.mubr.f32.mxu1 %v355_v40  ;;  %v395_v36 = vld [vmem:[%s3409_s15 + $0x278] sm:$0xff]  ;;  %v666_v38 = vld [vmem:[#allocation5 + $0x7b0] sm:$0xff] }
 0x137   : > { %1543 = vmatpush1.msra.mxu0 %v450_v41  ;;  %1686 = vmatpush1.msra.mxu1 %v578_v42  ;;  %v535_v39 = vld [vmem:[#allocation5 + $0x398] sm:$0xff]  ;;  %v394_v40 = vld [vmem:[%s3409_s15 + $0x270] sm:$0xff]  ;;  %v401_v42 = vld [vmem:[%s3409_s15 + $0x2a8] sm:$0xff] }
 0x138   : > { %1544 = vmatprep.subr.mxu0 %v447_v43  ;;  %1472 = vmatmul.mubr.f32.gmra.mxu1 %v354_v44  ;;  %v663_v41 = vld [vmem:[#allocation5 + $0x798] sm:$0xff]  ;;  %v534_v43 = vld [vmem:[#allocation5 + $0x390] sm:$0xff] }
 0x139   : > { %1687 = vmatprep.subr.mxu1 %v575_v45  ;;  %1334 = vmatprep.mubr.f32.mxu0 %v361_v46  ;;  %v662_v44 = vld [vmem:[#allocation5 + $0x790] sm:$0xff]  ;;  %v400_v45 = vld [vmem:[%s3409_s15 + $0x2a0] sm:$0xff]  ;;  %v531_v46 = vld [vmem:[#allocation5 + $0x378] sm:$0xff] }
 0x13a   : > { %1545 = vmatpush1.msra.mxu0 %v446_v47  ;;  %1688 = vmatpush1.msra.mxu1 %v574_v48  ;;  %v659_v47 = vld [vmem:[#allocation5 + $0x778] sm:$0xff] }
 0x13b   : > { %1335 = vmatmul.mubr.f32.gmra.mxu0 %v360_v49  ;;  %1546 = vmatprep.subr.mxu0 %v443_v50  ;;  %v403_v48 = vld [vmem:[%s3409_s15 + $0x2b8] sm:$0xff]  ;;  %v530_v49 = vld [vmem:[#allocation5 + $0x370] sm:$0xff] }
 0x13c   : > { %1689 = vmatprep.subr.mxu1 %v571_v51  ;;  %1477 = vmatprep.mubr.f32.mxu1 %v363_v52  ;;  %v658_v50 = vld [vmem:[#allocation5 + $0x770] sm:$0xff]  ;;  %v527_v51 = vld [vmem:[#allocation5 + $0x358] sm:$0xff] }
 0x13d   : > { %1547 = vmatpush1.msra.mxu0 %v442_v53  ;;  %1690 = vmatpush1.msra.mxu1 %v570_v54  ;;  %v402_v52 = vld [vmem:[%s3409_s15 + $0x2b0] sm:$0xff]  ;;  %v655_v53 = vld [vmem:[#allocation5 + $0x758] sm:$0xff]  ;;  %v409_v54 = vld [vmem:[%s3409_s15 + $0x2e8] sm:$0xff] }
 0x13e   : > { %1548 = vmatprep.subr.mxu0 %v439_v55  ;;  %1478 = vmatmul.mubr.f32.gmra.mxu1 %v362_v56  ;;  %v526_v55 = vld [vmem:[#allocation5 + $0x350] sm:$0xff] }
 0x13f   : > { %1691 = vmatprep.subr.mxu1 %v567_v57  ;;  %1340 = vmatprep.mubr.f32.mxu0 %v369_v58  ;;  %v654_v56 = vld [vmem:[#allocation5 + $0x750] sm:$0xff]  ;;  %v408_v57 = vld [vmem:[%s3409_s15 + $0x2e0] sm:$0xff]  ;;  %v523_v58 = vld [vmem:[#allocation5 + $0x338] sm:$0xff] }
 0x140   : > { %1549 = vmatpush1.msra.mxu0 %v438_v59  ;;  %1692 = vmatpush1.msra.mxu1 %v566_v60  ;;  %v651_v59 = vld [vmem:[#allocation5 + $0x738] sm:$0xff] }
 0x141   : > { %1341 = vmatmul.mubr.f32.gmra.mxu0 %v368_v61  ;;  %1550 = vmatprep.subr.mxu0 %v435_v62  ;;  %v411_v60 = vld [vmem:[%s3409_s15 + $0x2f8] sm:$0xff]  ;;  %v522_v61 = vld [vmem:[#allocation5 + $0x330] sm:$0xff] }
 0x142   : > { %1693 = vmatprep.subr.mxu1 %v563_v63  ;;  %1483 = vmatprep.mubr.f32.mxu1 %v371_v0  ;;  %v650_v62 = vld [vmem:[#allocation5 + $0x730] sm:$0xff]  ;;  %v519_v63 = vld [vmem:[#allocation5 + $0x318] sm:$0xff] }
 0x143   : > { %1551 = vmatpush1.msra.mxu0 %v434_v1  ;;  %1694 = vmatpush1.msra.mxu1 %v562_v2  ;;  %v410_v0 = vld [vmem:[%s3409_s15 + $0x2f0] sm:$0xff]  ;;  %v647_v1 = vld [vmem:[#allocation5 + $0x718] sm:$0xff]  ;;  %v417_v2 = vld [vmem:[%s3409_s15 + $0x328] sm:$0xff] }
 0x144   : > { %1552 = vmatprep.subr.mxu0 %v431_v3  ;;  %1484 = vmatmul.mubr.f32.gmra.mxu1 %v370_v4  ;;  %v518_v3 = vld [vmem:[#allocation5 + $0x310] sm:$0xff] }
 0x145   : > { %1695 = vmatprep.subr.mxu1 %v559_v5  ;;  %1346 = vmatprep.mubr.f32.mxu0 %v377_v6  ;;  %v646_v4 = vld [vmem:[#allocation5 + $0x710] sm:$0xff]  ;;  %v416_v5 = vld [vmem:[%s3409_s15 + $0x320] sm:$0xff]  ;;  %v515_v6 = vld [vmem:[#allocation5 + $0x2f8] sm:$0xff] }
 0x146   : > { %1553 = vmatpush1.msra.mxu0 %v430_v7  ;;  %1696 = vmatpush1.msra.mxu1 %v558_v8  ;;  %v643_v7 = vld [vmem:[#allocation5 + $0x6f8] sm:$0xff] }
 0x147   : > { %1347 = vmatmul.mubr.f32.gmra.mxu0 %v376_v9  ;;  %1554 = vmatprep.subr.mxu0 %v427_v10  ;;  %v419_v8 = vld [vmem:[%s3409_s15 + $0x338] sm:$0xff]  ;;  %v514_v9 = vld [vmem:[#allocation5 + $0x2f0] sm:$0xff] }
 0x148   : > { %1697 = vmatprep.subr.mxu1 %v555_v11  ;;  %1489 = vmatprep.mubr.f32.mxu1 %v379_v12  ;;  %v642_v10 = vld [vmem:[#allocation5 + $0x6f0] sm:$0xff]  ;;  %v511_v11 = vld [vmem:[#allocation5 + $0x2d8] sm:$0xff] }
 0x149   : > { %1555 = vmatpush1.msra.mxu0 %v426_v13  ;;  %1698 = vmatpush1.msra.mxu1 %v554_v14  ;;  %v418_v12 = vld [vmem:[%s3409_s15 + $0x330] sm:$0xff]  ;;  %v639_v13 = vld [vmem:[#allocation5 + $0x6d8] sm:$0xff] }
 0x14a   : > { %1556 = vmatprep.subr.mxu0 %v423_v15  ;;  %1490 = vmatmul.mubr.f32.gmra.mxu1 %v378_v16  ;;  %v510_v14 = vld [vmem:[#allocation5 + $0x2d0] sm:$0xff]  ;;  %v507_v16 = vld [vmem:[#allocation5 + $0x2b8] sm:$0xff] }
 0x14b   : > { %1699 = vmatprep.subr.mxu1 %v551_v17  ;;  %1352 = vmatprep.mubr.f32.mxu0 %v385_v18  ;;  %v638_v15 = vld [vmem:[#allocation5 + $0x6d0] sm:$0xff]  ;;  %v635_v17 = vld [vmem:[#allocation5 + $0x6b8] sm:$0xff] }
 0x14c   : > { %1557 = vmatpush1.msra.mxu0 %v422_v19  ;;  %1700 = vmatpush1.msra.mxu1 %v550_v20  ;;  %v506_v18 = vld [vmem:[#allocation5 + $0x2b0] sm:$0xff]  ;;  %v503_v20 = vld [vmem:[#allocation5 + $0x298] sm:$0xff] }
 0x14d   : > { %1353 = vmatmul.mubr.f32.gmra.mxu0 %v384_v21  ;;  %1558 = vmatprep.subr.mxu0 %v547_v22  ;;  %v634_v19 = vld [vmem:[#allocation5 + $0x6b0] sm:$0xff]  ;;  %v631_v21 = vld [vmem:[#allocation5 + $0x698] sm:$0xff] }
 0x14e   : > { %1701 = vmatprep.subr.mxu1 %v675_v23  ;;  %1495 = vmatprep.mubr.f32.mxu1 %v387_v24  ;;  %v502_v22 = vld [vmem:[#allocation5 + $0x290] sm:$0xff]  ;;  %v499_v24 = vld [vmem:[#allocation5 + $0x278] sm:$0xff] }
 0x14f   : > { %1559 = vmatpush2.msra.mxu0 %v546_v25  ;;  %1702 = vmatpush2.msra.mxu1 %v674_v26  ;;  %v630_v23 = vld [vmem:[#allocation5 + $0x690] sm:$0xff]  ;;  %v627_v25 = vld [vmem:[#allocation5 + $0x678] sm:$0xff] }
 0x150   : > { %1560 = vmatprep.subr.mxu0 %v543_v27  ;;  %1496 = vmatmul.mubr.f32.gmra.mxu1 %v386_v28  ;;  %v498_v26 = vld [vmem:[#allocation5 + $0x270] sm:$0xff]  ;;  %v495_v28 = vld [vmem:[#allocation5 + $0x258] sm:$0xff] }
 0x151   : > { %1703 = vmatprep.subr.mxu1 %v671_v29  ;;  %1358 = vmatprep.mubr.f32.mxu0 %v393_v30  ;;  %v626_v27 = vld [vmem:[#allocation5 + $0x670] sm:$0xff]  ;;  %v623_v29 = vld [vmem:[#allocation5 + $0x658] sm:$0xff] }
 0x152   : > { %1561 = vmatpush2.msra.mxu0 %v542_v31  ;;  %1704 = vmatpush2.msra.mxu1 %v670_v32  ;;  %v494_v30 = vld [vmem:[#allocation5 + $0x250] sm:$0xff]  ;;  %v491_v32 = vld [vmem:[#allocation5 + $0x238] sm:$0xff] }
 0x153   : > { %1359 = vmatmul.mubr.f32.gmra.mxu0 %v392_v33  ;;  %1562 = vmatprep.subr.mxu0 %v539_v34  ;;  %v622_v31 = vld [vmem:[#allocation5 + $0x650] sm:$0xff]  ;;  %v619_v33 = vld [vmem:[#allocation5 + $0x638] sm:$0xff] }
 0x154   : > { %1705 = vmatprep.subr.mxu1 %v667_v35  ;;  %1501 = vmatprep.mubr.f32.mxu1 %v395_v36  ;;  %v490_v34 = vld [vmem:[#allocation5 + $0x230] sm:$0xff]  ;;  %v487_v36 = vld [vmem:[#allocation5 + $0x218] sm:$0xff] }
 0x155   : > { %1563 = vmatpush2.msra.mxu0 %v538_v37  ;;  %1706 = vmatpush2.msra.mxu1 %v666_v38  ;;  %v618_v35 = vld [vmem:[#allocation5 + $0x630] sm:$0xff]  ;;  %v615_v37 = vld [vmem:[#allocation5 + $0x618] sm:$0xff] }
 0x156   : > { %1564 = vmatprep.subr.mxu0 %v535_v39  ;;  %1502 = vmatmul.mubr.f32.gmra.mxu1 %v394_v40  ;;  %v486_v38 = vld [vmem:[#allocation5 + $0x210] sm:$0xff]  ;;  %v934_v40 = vlaneseq }
 0x157   : > { %1707 = vmatprep.subr.mxu1 %v663_v41  ;;  %1364 = vmatprep.mubr.f32.mxu0 %v401_v42  ;;  %v614_v39 = vld [vmem:[#allocation5 + $0x610] sm:$0xff]  ;;  %v739_v41 = vld [vmem:[#allocation5 + $0x9f8] sm:$0xff]  ;;  %v2897_v42 = vld [vmem:[%s3409_s15 + $0x8] sm:$0xff] }
 0x158   : > { %1565 = vmatpush2.msra.mxu0 %v534_v43  ;;  %1708 = vmatpush2.msra.mxu1 %v662_v44  ;;  %v867_v43 = vld [vmem:[#allocation5 + $0xdf8] sm:$0xff]  ;;  %v2898_v44 = vld [vmem:[%s3409_s15] sm:$0xff] }
 0x159   : > { %1365 = vmatmul.mubr.f32.gmra.mxu0 %v400_v45  ;;  %1566 = vmatprep.subr.mxu0 %v531_v46  ;;  %v738_v45 = vld [vmem:[#allocation5 + $0x9f0] sm:$0xff] }
 0x15a   : > { %1709 = vmatprep.subr.mxu1 %v659_v47  ;;  %1507 = vmatprep.mubr.f32.mxu1 %v403_v48  ;;  %v866_v46 = vld [vmem:[#allocation5 + $0xdf0] sm:$0xff]  ;;  %v2899_v47 = vld [vmem:[%s3409_s15 + $0x18] sm:$0xff] }
 0x15b   : > { %1567 = vmatpush2.msra.mxu0 %v530_v49  ;;  %1710 = vmatpush2.msra.mxu1 %v658_v50  ;;  %v735_v48 = vld [vmem:[#allocation5 + $0x9d8] sm:$0xff]  ;;  %v3530_v50 = vshrl.u32 %v934_v40, 7  ;;  %v2908_v40 = vld [vmem:[%s3409_s15 + $0x90] sm:$0xff] }
 0x15c   : > { %1568 = vmatprep.subr.mxu0 %v527_v51  ;;  %1508 = vmatmul.mubr.f32.gmra.mxu1 %v402_v52  ;;  %v863_v49 = vld [vmem:[#allocation5 + $0xdd8] sm:$0xff]  ;;  %v2900_v51 = vld [vmem:[%s3409_s15 + $0x10] sm:$0xff] }
 0x15d   : > { %1711 = vmatprep.subr.mxu1 %v655_v53  ;;  %1370 = vmatprep.mubr.f32.mxu0 %v409_v54  ;;  %v734_v52 = vld [vmem:[#allocation5 + $0x9d0] sm:$0xff]  ;;  %v731_v54 = vld [vmem:[#allocation5 + $0x9b8] sm:$0xff] }
 0x15e   : > { %1569 = vmatpush2.msra.mxu0 %v526_v55  ;;  %1712 = vmatpush2.msra.mxu1 %v654_v56  ;;  %v862_v53 = vld [vmem:[#allocation5 + $0xdd0] sm:$0xff]  ;;  %v859_v55 = vld [vmem:[#allocation5 + $0xdb8] sm:$0xff] }
 0x15f   : > { %1371 = vmatmul.mubr.f32.gmra.mxu0 %v408_v57  ;;  %1570 = vmatprep.subr.mxu0 %v523_v58  ;;  %v730_v56 = vld [vmem:[#allocation5 + $0x9b0] sm:$0xff]  ;;  %v727_v58 = vld [vmem:[#allocation5 + $0x998] sm:$0xff] }
 0x160   : > { %1713 = vmatprep.subr.mxu1 %v651_v59  ;;  %1513 = vmatprep.mubr.f32.mxu1 %v411_v60  ;;  %v858_v57 = vld [vmem:[#allocation5 + $0xdb0] sm:$0xff]  ;;  %v855_v59 = vld [vmem:[#allocation5 + $0xd98] sm:$0xff]  ;;  %v936_v60 = vsub.s32 0, %v3530_v50 }
 0x161   : > { %1571 = vmatpush2.msra.mxu0 %v522_v61  ;;  %1714 = vmatpush2.msra.mxu1 %v650_v62  ;;  %v726_v61 = vld [vmem:[#allocation5 + $0x990] sm:$0xff] }
 0x162   : > { %1572 = vmatprep.subr.mxu0 %v519_v63  ;;  %1514 = vmatmul.mubr.f32.gmra.mxu1 %v410_v0  ;;  %v854_v62 = vld [vmem:[#allocation5 + $0xd90] sm:$0xff]  ;;  %v3534_v63 = vld [vmem:[#allocation7] sm:$0xf]  ;;  %v723_v0 = vld [vmem:[#allocation5 + $0x978] sm:$0xff] }
 0x163   : > { %1715 = vmatprep.subr.mxu1 %v647_v1  ;;  %1376 = vmatprep.mubr.f32.mxu0 %v417_v2  ;;  %v851_v1 = vld [vmem:[#allocation5 + $0xd78] sm:$0xff]  ;;  %v722_v2 = vld [vmem:[#allocation5 + $0x970] sm:$0xff] }
 0x164   : > { %1573 = vmatpush2.msra.mxu0 %v518_v3  ;;  %1716 = vmatpush2.msra.mxu1 %v646_v4  ;;  %v850_v3 = vld [vmem:[#allocation5 + $0xd70] sm:$0xff]  ;;  %v719_v4 = vld [vmem:[#allocation5 + $0x958] sm:$0xff] }
 0x165   : > { %1377 = vmatmul.mubr.f32.gmra.mxu0 %v416_v5  ;;  %1574 = vmatprep.subr.mxu0 %v515_v6  ;;  %v847_v5 = vld [vmem:[#allocation5 + $0xd58] sm:$0xff]  ;;  %v3537_v6 = vrot.slane %v3534_v63, %v936_v60 }
 0x166   : > { %1717 = vmatprep.subr.mxu1 %v643_v7  ;;  %1519 = vmatprep.mubr.f32.mxu1 %v419_v8  ;;  %v718_v7 = vld [vmem:[#allocation5 + $0x950] sm:$0xff]  ;;  %v815_v60 = vld [vmem:[#allocation5 + $0xc58] sm:$0xff] }
 0x167   : > { %1575 = vmatpush2.msra.mxu0 %v514_v9  ;;  %1718 = vmatpush2.msra.mxu1 %v642_v10  ;;  %v846_v8 = vld [vmem:[#allocation5 + $0xd50] sm:$0xff]  ;;  %v715_v9 = vld [vmem:[#allocation5 + $0x938] sm:$0xff] }
 0x168   : > { %1576 = vmatprep.subr.mxu0 %v511_v11  ;;  %1520 = vmatmul.mubr.f32.gmra.mxu1 %v418_v12  ;;  %v843_v10 = vld [vmem:[#allocation5 + $0xd38] sm:$0xff]  ;;  %v714_v11 = vld [vmem:[#allocation5 + $0x930] sm:$0xff] }
 0x169   : > { %1719 = vmatprep.subr.mxu1 %v639_v13  ;;  %1577 = vmatpush2.msra.mxu0 %v510_v14  ;;  %v842_v13 = vld [vmem:[#allocation5 + $0xd30] sm:$0xff] }
 0x16a   : > { %1720 = vmatpush2.msra.mxu1 %v638_v15  ;;  %1578 = vmatprep.subr.mxu0 %v507_v16  ;;  %v711_v15 = vld [vmem:[#allocation5 + $0x918] sm:$0xff] }
 0x16b   : > { %1721 = vmatprep.subr.mxu1 %v635_v17  ;;  %1579 = vmatpush2.msra.mxu0 %v506_v18  ;;  %v839_v16 = vld [vmem:[#allocation5 + $0xd18] sm:$0xff]  ;;  %v2901_v18 = vld [vmem:[%s3409_s15 + $0x48] sm:$0xff] }
 0x16c   : > { %1722 = vmatpush2.msra.mxu1 %v634_v19  ;;  %1580 = vmatprep.subr.mxu0 %v503_v20  ;;  %v710_v19 = vld [vmem:[#allocation5 + $0x910] sm:$0xff] }
 0x16d   : > { %1723 = vmatprep.subr.mxu1 %v631_v21  ;;  %1581 = vmatpush2.msra.mxu0 %v502_v22  ;;  %v2902_v21 = vld [vmem:[%s3409_s15 + $0x40] sm:$0xff]  ;;  %v838_v22 = vld [vmem:[#allocation5 + $0xd10] sm:$0xff] }
 0x16e   : > { %1724 = vmatpush2.msra.mxu1 %v630_v23  ;;  %1582 = vmatprep.subr.mxu0 %v499_v24  ;;  %v707_v23 = vld [vmem:[#allocation5 + $0x8f8] sm:$0xff] }
 0x16f   : > { %1725 = vmatprep.subr.mxu1 %v627_v25  ;;  %1583 = vmatpush2.msra.mxu0 %v498_v26  ;;  %v835_v24 = vld [vmem:[#allocation5 + $0xcf8] sm:$0xff]  ;;  %v706_v26 = vld [vmem:[#allocation5 + $0x8f0] sm:$0xff] }
 0x170   : > { %1726 = vmatpush2.msra.mxu1 %v626_v27  ;;  %1584 = vmatprep.subr.mxu0 %v495_v28  ;;  %v2903_v25 = vld [vmem:[%s3409_s15 + $0x58] sm:$0xff]  ;;  %v834_v27 = vld [vmem:[#allocation5 + $0xcf0] sm:$0xff] }
 0x171   : > { %1727 = vmatprep.subr.mxu1 %v623_v29  ;;  %1585 = vmatpush2.msra.mxu0 %v494_v30  ;;  %v2904_v28 = vld [vmem:[%s3409_s15 + $0x50] sm:$0xff]  ;;  %v703_v29 = vld [vmem:[#allocation5 + $0x8d8] sm:$0xff] }
 0x172   : > { %1728 = vmatpush2.msra.mxu1 %v622_v31  ;;  %1586 = vmatprep.subr.mxu0 %v491_v32  ;;  %v831_v30 = vld [vmem:[#allocation5 + $0xcd8] sm:$0xff]  ;;  %v2905_v31 = vld [vmem:[%s3409_s15 + $0x88] sm:$0xff]  ;;  %v702_v32 = vld [vmem:[#allocation5 + $0x8d0] sm:$0xff] }
 0x173   : > { %1729 = vmatprep.subr.mxu1 %v619_v33  ;;  %1587 = vmatpush2.msra.mxu0 %v490_v34  ;;  %v2906_v33 = vld [vmem:[%s3409_s15 + $0x80] sm:$0xff]  ;;  %v830_v34 = vld [vmem:[#allocation5 + $0xcd0] sm:$0xff] }
 0x174   : > { %1730 = vmatpush2.msra.mxu1 %v618_v35  ;;  %1588 = vmatprep.subr.mxu0 %v487_v36  ;;  %v699_v35 = vld [vmem:[#allocation5 + $0x8b8] sm:$0xff] }
 0x175   : > { %1731 = vmatprep.subr.mxu1 %v615_v37  ;;  %1589 = vmatpush2.msra.mxu0 %v486_v38  ;;  %v827_v36 = vld [vmem:[#allocation5 + $0xcb8] sm:$0xff]  ;;  %v698_v38 = vld [vmem:[#allocation5 + $0x8b0] sm:$0xff] }
 0x176   : > { %1590 = vmatprep.mubr.f32.mxu0 %v2897_v42  ;;  %1732 = vmatpush2.msra.mxu1 %v614_v39  ;;  %v2907_v37 = vld [vmem:[%s3409_s15 + $0x98] sm:$0xff]  ;;  %v826_v39 = vld [vmem:[#allocation5 + $0xcb0] sm:$0xff] }
 0x177   : > { %1591 = vmatmul.mubr.f32.vlgmr.msra.gmra.mxu0 %v2898_v44  ;;  %1733 = vmatprep.mubr.f32.mxu1 %v2899_v47  ;;  %v823_v42 = vld [vmem:[#allocation5 + $0xc98] sm:$0xff]  ;;  %v694_v44 = vld [vmem:[#allocation5 + $0x890] sm:$0xff] }
 0x178   : > { %1812 = vmatprep.subr.mxu0 %v739_v41  ;;  %1955 = vmatprep.subr.mxu1 %v867_v43  ;;  %v695_v41 = vld [vmem:[#allocation5 + $0x898] sm:$0xff]  ;;  %v2909_v43 = vld [vmem:[%s3409_s15 + $0xc8] sm:$0xff]  ;;  %v822_v47 = vld [vmem:[#allocation5 + $0xc90] sm:$0xff] }
 0x179   : > { %1734 = vmatmul.mubr.f32.vlgmr.msra.gmra.mxu1 %v2900_v51  ;;  %1813 = vmatpush1.msra.mxu0 %v738_v45 }
 0x17a   : > { %1956 = vmatpush1.msra.mxu1 %v866_v46  ;;  %1814 = vmatprep.subr.mxu0 %v735_v48  ;;  %v2910_v46 = vld [vmem:[%s3409_s15 + $0xc0] sm:$0xff]  ;;  %v691_v48 = vld [vmem:[#allocation5 + $0x878] sm:$0xff] }
 0x17b   : > { %1957 = vmatprep.subr.mxu1 %v863_v49  ;;  %1815 = vmatpush1.msra.mxu0 %v734_v52  ;;  %v819_v49 = vld [vmem:[#allocation5 + $0xc78] sm:$0xff] }
 0x17c   : > { %1958 = vmatpush1.msra.mxu1 %v862_v53  ;;  %1816 = vmatprep.subr.mxu0 %v731_v54  ;;  %v2911_v52 = vld [vmem:[%s3409_s15 + $0xd8] sm:$0xff]  ;;  %v690_v53 = vld [vmem:[#allocation5 + $0x870] sm:$0xff] }
 0x17d   : > { %1959 = vmatprep.subr.mxu1 %v859_v55  ;;  %1817 = vmatpush1.msra.mxu0 %v730_v56  ;;  %v818_v56 = vld [vmem:[#allocation5 + $0xc70] sm:$0xff] }
 0x17e   : > { %1960 = vmatpush1.msra.mxu1 %v858_v57  ;;  %1818 = vmatprep.subr.mxu0 %v727_v58  ;;  %v2912_v58 = vld [vmem:[%s3409_s15 + $0xd0] sm:$0xff] }
 0x17f   : > { %1961 = vmatprep.subr.mxu1 %v855_v59  ;;  %1819 = vmatpush1.msra.mxu0 %v726_v61  ;;  %v687_v59 = vld [vmem:[#allocation5 + $0x858] sm:$0xff] }
 0x180   : > { %1962 = vmatpush1.msra.mxu1 %v854_v62  ;;  %1820 = vmatprep.subr.mxu0 %v723_v0  ;;  %v2913_v62 = vld [vmem:[%s3409_s15 + $0x108] sm:$0xff]  ;;  %v686_v0 = vld [vmem:[#allocation5 + $0x850] sm:$0xff] }
 0x181   : > { %1963 = vmatprep.subr.mxu1 %v851_v1  ;;  %1821 = vmatpush1.msra.mxu0 %v722_v2  ;;  %v2914_v2 = vld [vmem:[%s3409_s15 + $0x100] sm:$0xff] }
 0x182   : > { %1964 = vmatpush1.msra.mxu1 %v850_v3  ;;  %1822 = vmatprep.subr.mxu0 %v719_v4  ;;  %v814_v3 = vld [vmem:[#allocation5 + $0xc50] sm:$0xff]  ;;  %v683_v4 = vld [vmem:[#allocation5 + $0x838] sm:$0xff] }
 0x183   : > { %1965 = vmatprep.subr.mxu1 %v847_v5  ;;  %v1020_v12 = vpop.f32.mrf.mxu0  ;;  %1823 = vmatpush1.msra.mxu0 %v718_v7  ;;  %v811_v7 = vld [vmem:[#allocation5 + $0xc38] sm:$0xff] }
 0x184   : > { %1966 = vmatpush1.msra.mxu1 %v846_v8  ;;  %v1021_v14 = vadd.f32 %v1020_v12, %v3537_v6  ;;  %1824 = vmatprep.subr.mxu0 %v715_v9  ;;  %v2915_v9 = vld [vmem:[%s3409_s15 + $0x118] sm:$0xff]  ;;  %v810_v12 = vld [vmem:[#allocation5 + $0xc30] sm:$0xff] }
 0x185   : > { %1967 = vmatprep.subr.mxu1 %v843_v10  ;;  %v1163_v17 = vpop.f32.mrf.mxu1  ;;  %1596 = vmatprep.mubr.f32.mxu0 %v2901_v18  ;;  %v3551_v45 = vpop.f32.mrf.mxu0  ;;  %v682_v10 = vld [vmem:[#allocation5 + $0x830] sm:$0xff] }
 0x186   : > { %1825 = vmatpush1.msra.mxu0 %v714_v11  ;;  %v3541_v20 = vadd.f32 %v1163_v17, %v1021_v14  ;;  %1968 = vmatpush1.msra.mxu1 %v842_v13  ;;  %v2916_v14 = vld [vmem:[%s3409_s15 + $0x110] sm:$0xff]  ;;  %v940_v17 = vsub.s32 1, %v3530_v50 }
 0x187   : > { %1597 = vmatmul.mubr.f32.gmra.mxu0 %v2902_v21  ;;  %1826 = vmatprep.subr.mxu0 %v711_v15  ;;  %v3555_v54 = vpop.f32.mrf.mxu1  ;;  %v679_v15 = vld [vmem:[#allocation5 + $0x818] sm:$0xff]  ;;  %v678_v21 = vld [vmem:[#allocation5 + $0x810] sm:$0xff] }
 0x188   : > { %1969 = vmatprep.subr.mxu1 %v839_v16  ;;  %1739 = vmatprep.mubr.f32.mxu1 %v2903_v25  ;;  %v807_v16 = vld [vmem:[#allocation5 + $0xc18] sm:$0xff] }
 0x189   : > { %1827 = vmatpush1.msra.mxu0 %v710_v19  ;;  %1970 = vmatpush1.msra.mxu1 %v838_v22  ;;  %v2917_v19 = vld [vmem:[%s3409_s15 + $0x148] sm:$0xff]  ;;  %v803_v25 = vld [vmem:[#allocation5 + $0xbf8] sm:$0xff] }
 0x18a   : > { %1828 = vmatprep.subr.mxu0 %v707_v23  ;;  %1740 = vmatmul.mubr.f32.gmra.mxu1 %v2904_v28  ;;  %v2918_v23 = vld [vmem:[%s3409_s15 + $0x140] sm:$0xff] }
 0x18b   : > { %1971 = vmatprep.subr.mxu1 %v835_v24  ;;  %1602 = vmatprep.mubr.f32.mxu0 %v2905_v31  ;;  %v806_v24 = vld [vmem:[#allocation5 + $0xc10] sm:$0xff]  ;;  %v3581_v31 = vrot.slane %v3534_v63, %v940_v17 }
 0x18c   : > { %1829 = vmatpush1.msra.mxu0 %v706_v26  ;;  %1972 = vmatpush1.msra.mxu1 %v834_v27  ;;  %v931_v27 = vld [vmem:[#allocation5 + $0xff8] sm:$0xff]  ;;  %v798_v63 = vld [vmem:[#allocation5 + $0xbd0] sm:$0xff] }
 0x18d   : > { %1603 = vmatmul.mubr.f32.gmra.mxu0 %v2906_v33  ;;  %1830 = vmatprep.subr.mxu0 %v703_v29  ;;  %v2919_v29 = vld [vmem:[%s3409_s15 + $0x158] sm:$0xff]  ;;  %v930_v33 = vld [vmem:[#allocation5 + $0xff0] sm:$0xff] }
 0x18e   : > { %1973 = vmatprep.subr.mxu1 %v831_v30  ;;  %1745 = vmatprep.mubr.f32.mxu1 %v2907_v37  ;;  %v802_v30 = vld [vmem:[#allocation5 + $0xbf0] sm:$0xff]  ;;  %v927_v37 = vld [vmem:[#allocation5 + $0xfd8] sm:$0xff] }
 0x18f   : > { %1831 = vmatpush1.msra.mxu0 %v702_v32  ;;  %1974 = vmatpush1.msra.mxu1 %v830_v34  ;;  %v914_v17 = vld [vmem:[#allocation5 + $0xf70] sm:$0xff] }
 0x190   : > { %1832 = vmatprep.subr.mxu0 %v699_v35  ;;  %1746 = vmatmul.mubr.f32.gmra.mxu1 %v2908_v40  ;;  %v2920_v35 = vld [vmem:[%s3409_s15 + $0x150] sm:$0xff]  ;;  %v2921_v40 = vld [vmem:[%s3409_s15 + $0x188] sm:$0xff] }
 0x191   : > { %1975 = vmatprep.subr.mxu1 %v827_v36  ;;  %1608 = vmatprep.mubr.f32.mxu0 %v2909_v43  ;;  %v799_v36 = vld [vmem:[#allocation5 + $0xbd8] sm:$0xff]  ;;  %v926_v43 = vld [vmem:[#allocation5 + $0xfd0] sm:$0xff] }
 0x192   : > { %1833 = vmatpush1.msra.mxu0 %v698_v38  ;;  %1976 = vmatpush1.msra.mxu1 %v826_v39 }
 0x193   : > { %1609 = vmatmul.mubr.f32.gmra.mxu0 %v2910_v46  ;;  %1834 = vmatprep.subr.mxu0 %v695_v41 }
 0x194   : > { %1977 = vmatprep.subr.mxu1 %v823_v42  ;;  %v1026_v51 = vpop.f32.mrf.mxu0  ;;  %1751 = vmatprep.mubr.f32.mxu1 %v2911_v52  ;;  %v2922_v42 = vld [vmem:[%s3409_s15 + $0x180] sm:$0xff]  ;;  %v794_v52 = vld [vmem:[#allocation5 + $0xbb0] sm:$0xff] }
 0x195   : > { %1835 = vmatpush1.msra.mxu0 %v694_v44  ;;  %v1027_v55 = vadd.f32 %v1026_v51, %v3537_v6  ;;  %1978 = vmatpush1.msra.mxu1 %v822_v47  ;;  %v795_v44 = vld [vmem:[#allocation5 + $0xbb8] sm:$0xff] }
 0x196   : > { %1836 = vmatprep.subr.mxu0 %v691_v48  ;;  %v3558_v57 = vpop.f32.mrf.mxu0  ;;  %1752 = vmatmul.mubr.f32.gmra.mxu1 %v2912_v58  ;;  %v923_v47 = vld [vmem:[#allocation5 + $0xfb8] sm:$0xff]  ;;  %v2924_v58 = vld [vmem:[%s3409_s15 + $0x190] sm:$0xff] }
 0x197   : > { %1979 = vmatprep.subr.mxu1 %v819_v49  ;;  %v1169_v61 = vpop.f32.mrf.mxu1  ;;  %1614 = vmatprep.mubr.f32.mxu0 %v2913_v62  ;;  %v2923_v51 = vld [vmem:[%s3409_s15 + $0x198] sm:$0xff] }
 0x198   : > { %1837 = vmatpush1.msra.mxu0 %v690_v53  ;;  %v3562_v1 = vadd.f32 %v1169_v61, %v1027_v55  ;;  %1980 = vmatpush1.msra.mxu1 %v818_v56  ;;  %v922_v55 = vld [vmem:[#allocation5 + $0xfb0] sm:$0xff] }
 0x199   : > { %1615 = vmatmul.mubr.f32.gmra.mxu0 %v2914_v2  ;;  %v3565_v5 = vpop.f32.mrf.mxu1  ;;  %1838 = vmatprep.subr.mxu0 %v687_v59  ;;  %v791_v59 = vld [vmem:[#allocation5 + $0xb98] sm:$0xff]  ;;  %v790_v2 = vld [vmem:[#allocation5 + $0xb90] sm:$0xff] }
 0x19a   : > { %1981 = vmatprep.subr.mxu1 %v815_v60  ;;  %v1032_v8 = vpop.f32.mrf.mxu0  ;;  %1757 = vmatprep.mubr.f32.mxu1 %v2915_v9  ;;  %v919_v60 = vld [vmem:[#allocation5 + $0xf98] sm:$0xff] }
 0x19b   : > { %1839 = vmatpush1.msra.mxu0 %v686_v0  ;;  %v1033_v11 = vadd.f32 %v1032_v8, %v3537_v6  ;;  %1982 = vmatpush1.msra.mxu1 %v814_v3  ;;  %v2925_v0 = vld [vmem:[%s3409_s15 + $0x1c8] sm:$0xff]  ;;  %v787_v8 = vld [vmem:[#allocation5 + $0xb78] sm:$0xff] }
 0x19c   : > { %1840 = vmatprep.subr.mxu0 %v683_v4  ;;  %v3569_v13 = vpop.f32.mrf.mxu0  ;;  %1758 = vmatmul.mubr.f32.gmra.mxu1 %v2916_v14  ;;  %v2926_v4 = vld [vmem:[%s3409_s15 + $0x1c0] sm:$0xff]  ;;  %v2927_v14 = vld [vmem:[%s3409_s15 + $0x1d8] sm:$0xff] }
 0x19d   : > { %1983 = vmatprep.subr.mxu1 %v811_v7  ;;  %v1175_v18 = vpop.f32.mrf.mxu1  ;;  %1620 = vmatprep.mubr.f32.mxu0 %v2917_v19  ;;  %v918_v7 = vld [vmem:[#allocation5 + $0xf90] sm:$0xff] }
 0x19e   : > { %1841 = vmatpush1.msra.mxu0 %v682_v10  ;;  %v3574_v22 = vadd.f32 %v1175_v18, %v1033_v11  ;;  %1984 = vmatpush1.msra.mxu1 %v810_v12  ;;  %v915_v10 = vld [vmem:[#allocation5 + $0xf78] sm:$0xff]  ;;  %v2928_v19 = vld [vmem:[%s3409_s15 + $0x1d0] sm:$0xff] }
 0x19f   : > { %1621 = vmatmul.mubr.f32.gmra.mxu0 %v2918_v23  ;;  %v3577_v26 = vpop.f32.mrf.mxu1  ;;  %1842 = vmatprep.subr.mxu0 %v679_v15  ;;  %v786_v15 = vld [vmem:[#allocation5 + $0xb70] sm:$0xff]  ;;  %v911_v23 = vld [vmem:[#allocation5 + $0xf58] sm:$0xff] }
 0x1a0   : > { %1985 = vmatprep.subr.mxu1 %v807_v16  ;;  %v1038_v28 = vpop.f32.mrf.mxu0  ;;  %1763 = vmatprep.mubr.f32.mxu1 %v2919_v29 }
 0x1a1   : > { %1843 = vmatpush1.msra.mxu0 %v678_v21  ;;  %v1039_v32 = vadd.f32 %v1038_v28, %v3537_v6  ;;  %1986 = vmatpush1.msra.mxu1 %v806_v24  ;;  %v783_v21 = vld [vmem:[#allocation5 + $0xb58] sm:$0xff]  ;;  %v782_v28 = vld [vmem:[#allocation5 + $0xb50] sm:$0xff] }
 0x1a2   : > { %1844 = vmatprep.subr.mxu0 %v803_v25  ;;  %v1040_v34 = vpop.f32.mrf.mxu0  ;;  %1764 = vmatmul.mubr.f32.gmra.mxu1 %v2920_v35  ;;  %v907_v35 = vld [vmem:[#allocation5 + $0xf38] sm:$0xff] }
 0x1a3   : > { %1987 = vmatprep.subr.mxu1 %v931_v27  ;;  %v1041_v38 = vadd.f32 %v1040_v34, %v3581_v31  ;;  %v1181_v39 = vpop.f32.mrf.mxu1  ;;  %1626 = vmatprep.mubr.f32.mxu0 %v2921_v40  ;;  %v2929_v27 = vld [vmem:[%s3409_s15 + $0x208] sm:$0xff] }
 0x1a4   : > { %1845 = vmatpush2.msra.mxu0 %v802_v30  ;;  %v3587_v41 = vadd.f32 %v1181_v39, %v1039_v32  ;;  %1988 = vmatpush2.msra.mxu1 %v930_v33  ;;  %v2930_v30 = vld [vmem:[%s3409_s15 + $0x200] sm:$0xff]  ;;  %v910_v32 = vld [vmem:[#allocation5 + $0xf50] sm:$0xff]  ;;  %v779_v33 = vld [vmem:[#allocation5 + $0xb38] sm:$0xff] }
 0x1a5   : > { %1627 = vmatmul.mubr.f32.gmra.mxu0 %v2922_v42  ;;  %v1183_v46 = vpop.f32.mrf.mxu1  ;;  %1846 = vmatprep.subr.mxu0 %v799_v36  ;;  %v778_v39 = vld [vmem:[#allocation5 + $0xb30] sm:$0xff] }
 0x1a6   : > { %1989 = vmatprep.subr.mxu1 %v927_v37  ;;  %v1044_v48 = vpop.f32.mrf.mxu0  ;;  %v3590_v49 = vadd.f32 %v1183_v46, %v1041_v38  ;;  %1769 = vmatprep.mubr.f32.mxu1 %v2923_v51  ;;  %v2931_v38 = vld [vmem:[%s3409_s15 + $0x218] sm:$0xff]  ;;  %v2933_v51 = vld [vmem:[%s3409_s15 + $0x248] sm:$0xff] }
 0x1a7   : > { %1847 = vmatpush2.msra.mxu0 %v798_v63  ;;  %v1045_v53 = vadd.f32 %v1044_v48, %v3537_v6  ;;  %1990 = vmatpush2.msra.mxu1 %v926_v43  ;;  %v906_v63 = vld [vmem:[#allocation5 + $0xf30] sm:$0xff]  ;;  %v903_v46 = vld [vmem:[#allocation5 + $0xf18] sm:$0xff] }
 0x1a8   : > { %1848 = vmatprep.subr.mxu0 %v795_v44  ;;  %v1046_v56 = vpop.f32.mrf.mxu0  ;;  %1770 = vmatmul.mubr.f32.gmra.mxu1 %v2924_v58  ;;  %v2932_v43 = vld [vmem:[%s3409_s15 + $0x210] sm:$0xff]  ;;  %v775_v44 = vld [vmem:[#allocation5 + $0xb18] sm:$0xff] }
 0x1a9   : > { %1991 = vmatprep.subr.mxu1 %v923_v47  ;;  %v1047_v61 = vadd.f32 %v1046_v56, %v3581_v31  ;;  %v1187_v62 = vpop.f32.mrf.mxu1  ;;  %1632 = vmatprep.mubr.f32.mxu0 %v2925_v0  ;;  %v902_v56 = vld [vmem:[#allocation5 + $0xf10] sm:$0xff]  ;;  %v771_v58 = vld [vmem:[#allocation5 + $0xaf8] sm:$0xff] }
 0x1aa   : > { %1849 = vmatpush2.msra.mxu0 %v794_v52  ;;  %v3597_v3 = vadd.f32 %v1187_v62, %v1045_v53  ;;  %1992 = vmatpush2.msra.mxu1 %v922_v55  ;;  %v774_v52 = vld [vmem:[#allocation5 + $0xb10] sm:$0xff]  ;;  %v2934_v55 = vld [vmem:[%s3409_s15 + $0x240] sm:$0xff]  ;;  %v2935_v0 = vld [vmem:[%s3409_s15 + $0x258] sm:$0xff] }
 0x1ab   : > { %1633 = vmatmul.mubr.f32.gmra.mxu0 %v2926_v4  ;;  %v1189_v9 = vpop.f32.mrf.mxu1  ;;  %1850 = vmatprep.subr.mxu0 %v791_v59 }
 0x1ac   : > { %1993 = vmatprep.subr.mxu1 %v919_v60  ;;  %v1050_v11 = vpop.f32.mrf.mxu0  ;;  %v3600_v12 = vadd.f32 %v1189_v9, %v1047_v61  ;;  %1775 = vmatprep.mubr.f32.mxu1 %v2927_v14  ;;  %v899_v60 = vld [vmem:[#allocation5 + $0xef8] sm:$0xff]  ;;  %v2936_v9 = vld [vmem:[%s3409_s15 + $0x250] sm:$0xff] }
 0x1ad   : > { %1851 = vmatpush2.msra.mxu0 %v790_v2  ;;  %v1051_v16 = vadd.f32 %v1050_v11, %v3537_v6  ;;  %1994 = vmatpush2.msra.mxu1 %v918_v7  ;;  %v770_v2 = vld [vmem:[#allocation5 + $0xaf0] sm:$0xff]  ;;  %v895_v11 = vld [vmem:[#allocation5 + $0xed8] sm:$0xff] }
 0x1ae   : > { %1852 = vmatprep.subr.mxu0 %v787_v8  ;;  %v1052_v18 = vpop.f32.mrf.mxu0  ;;  %1776 = vmatmul.mubr.f32.gmra.mxu1 %v2928_v19  ;;  %v898_v7 = vld [vmem:[#allocation5 + $0xef0] sm:$0xff]  ;;  %v2938_v19 = vld [vmem:[%s3409_s15 + $0x280] sm:$0xff] }
 0x1af   : > { %1995 = vmatprep.subr.mxu1 %v915_v10  ;;  %v1053_v24 = vadd.f32 %v1052_v18, %v3581_v31  ;;  %v1193_v25 = vpop.f32.mrf.mxu1  ;;  %1638 = vmatprep.mubr.f32.mxu0 %v2929_v27  ;;  %v767_v10 = vld [vmem:[#allocation5 + $0xad8] sm:$0xff] }
 0x1b0   : > { %1853 = vmatpush2.msra.mxu0 %v786_v15  ;;  %v3607_v29 = vadd.f32 %v1193_v25, %v1051_v16  ;;  %1996 = vmatpush2.msra.mxu1 %v914_v17  ;;  %v2937_v16 = vld [vmem:[%s3409_s15 + $0x288] sm:$0xff]  ;;  %v766_v17 = vld [vmem:[#allocation5 + $0xad0] sm:$0xff]  ;;  %v891_v25 = vld [vmem:[#allocation5 + $0xeb8] sm:$0xff] }
 0x1b1   : > { %1639 = vmatmul.mubr.f32.gmra.mxu0 %v2930_v30  ;;  %v1195_v34 = vpop.f32.mrf.mxu1  ;;  %1854 = vmatprep.subr.mxu0 %v783_v21  ;;  %v894_v21 = vld [vmem:[#allocation5 + $0xed0] sm:$0xff]  ;;  %v2939_v30 = vld [vmem:[%s3409_s15 + $0x298] sm:$0xff] }
 0x1b2   : > { %1997 = vmatprep.subr.mxu1 %v911_v23  ;;  %v1056_v36 = vpop.f32.mrf.mxu0  ;;  %v3610_v37 = vadd.f32 %v1195_v34, %v1053_v24  ;;  %1781 = vmatprep.mubr.f32.mxu1 %v2931_v38  ;;  %v763_v23 = vld [vmem:[#allocation5 + $0xab8] sm:$0xff]  ;;  %v890_v34 = vld [vmem:[#allocation5 + $0xeb0] sm:$0xff] }
 0x1b3   : > { %1855 = vmatpush2.msra.mxu0 %v782_v28  ;;  %v1057_v40 = vadd.f32 %v1056_v36, %v3537_v6  ;;  %1998 = vmatpush2.msra.mxu1 %v910_v32  ;;  %v762_v32 = vld [vmem:[#allocation5 + $0xab0] sm:$0xff]  ;;  %v759_v38 = vld [vmem:[#allocation5 + $0xa98] sm:$0xff] }
 0x1b4   : > { %1856 = vmatprep.subr.mxu0 %v779_v33  ;;  %v1058_v42 = vpop.f32.mrf.mxu0  ;;  %1782 = vmatmul.mubr.f32.gmra.mxu1 %v2932_v43  ;;  %v2940_v36 = vld [vmem:[%s3409_s15 + $0x290] sm:$0xff] }
 0x1b5   : > { %1999 = vmatprep.subr.mxu1 %v907_v35  ;;  %v1059_v47 = vadd.f32 %v1058_v42, %v3581_v31  ;;  %v1199_v48 = vpop.f32.mrf.mxu1  ;;  %1644 = vmatprep.mubr.f32.mxu0 %v2933_v51  ;;  %v2941_v42 = vld [vmem:[%s3409_s15 + $0x2c8] sm:$0xff]  ;;  %v758_v43 = vld [vmem:[#allocation5 + $0xa90] sm:$0xff] }
 0x1b6   : > { %1857 = vmatpush2.msra.mxu0 %v778_v39  ;;  %v3617_v53 = vadd.f32 %v1199_v48, %v1057_v40  ;;  %2000 = vmatpush2.msra.mxu1 %v906_v63  ;;  %v887_v39 = vld [vmem:[#allocation5 + $0xe98] sm:$0xff] }
 0x1b7   : > { %1645 = vmatmul.mubr.f32.gmra.mxu0 %v2934_v55  ;;  %v1201_v59 = vpop.f32.mrf.mxu1  ;;  %1858 = vmatprep.subr.mxu0 %v775_v44  ;;  %v755_v48 = vld [vmem:[#allocation5 + $0xa78] sm:$0xff] }
 0x1b8   : > { %2001 = vmatprep.subr.mxu1 %v903_v46  ;;  %v1062_v61 = vpop.f32.mrf.mxu0  ;;  %v3620_v62 = vadd.f32 %v1201_v59, %v1059_v47  ;;  %1787 = vmatprep.mubr.f32.mxu1 %v2935_v0  ;;  %v2942_v46 = vld [vmem:[%s3409_s15 + $0x2c0] sm:$0xff]  ;;  %v886_v47 = vld [vmem:[#allocation5 + $0xe90] sm:$0xff] }
 0x1b9   : > { %1859 = vmatpush2.msra.mxu0 %v774_v52  ;;  %v1063_v4 = vadd.f32 %v1062_v61, %v3537_v6  ;;  %2002 = vmatpush2.msra.mxu1 %v902_v56  ;;  %v883_v52 = vld [vmem:[#allocation5 + $0xe78] sm:$0xff]  ;;  %v754_v59 = vld [vmem:[#allocation5 + $0xa70] sm:$0xff] }
 0x1ba   : > { %1860 = vmatprep.subr.mxu0 %v771_v58  ;;  %v1064_v8 = vpop.f32.mrf.mxu0  ;;  %1788 = vmatmul.mubr.f32.gmra.mxu1 %v2936_v9  ;;  %v2943_v58 = vld [vmem:[%s3409_s15 + $0x2d8] sm:$0xff]  ;;  %v882_v61 = vld [vmem:[#allocation5 + $0xe70] sm:$0xff] }
 0x1bb   : > { %2003 = vmatprep.subr.mxu1 %v899_v60  ;;  %v1065_v14 = vadd.f32 %v1064_v8, %v3581_v31  ;;  %v1205_v15 = vpop.f32.mrf.mxu1  ;;  %1650 = vmatprep.mubr.f32.mxu0 %v2937_v16  ;;  %v878_v16 = vld [vmem:[#allocation5 + $0xe50] sm:$0xff] }
 0x1bc   : > { %1861 = vmatpush2.msra.mxu0 %v770_v2  ;;  %v3627_v18 = vadd.f32 %v1205_v15, %v1063_v4  ;;  %2004 = vmatpush2.msra.mxu1 %v898_v7  ;;  %v2944_v2 = vld [vmem:[%s3409_s15 + $0x2d0] sm:$0xff]  ;;  %v751_v4 = vld [vmem:[#allocation5 + $0xa58] sm:$0xff]  ;;  %v2946_v15 = vld [vmem:[%s3409_s15 + $0x300] sm:$0xff] }
 0x1bd   : > { %1651 = vmatmul.mubr.f32.gmra.mxu0 %v2938_v19  ;;  %v1207_v24 = vpop.f32.mrf.mxu1  ;;  %1862 = vmatprep.subr.mxu0 %v767_v10  ;;  %v879_v7 = vld [vmem:[#allocation5 + $0xe58] sm:$0xff]  ;;  %v2945_v10 = vld [vmem:[%s3409_s15 + $0x308] sm:$0xff] }
 0x1be   : > { %2005 = vmatprep.subr.mxu1 %v895_v11  ;;  %v1068_v27 = vpop.f32.mrf.mxu0  ;;  %v3630_v28 = vadd.f32 %v1207_v24, %v1065_v14  ;;  %1793 = vmatprep.mubr.f32.mxu1 %v2939_v30  ;;  %v750_v11 = vld [vmem:[#allocation5 + $0xa50] sm:$0xff] }
 0x1bf   : > { %1863 = vmatpush2.msra.mxu0 %v766_v17  ;;  %v1069_v33 = vadd.f32 %v1068_v27, %v3537_v6  ;;  %2006 = vmatpush2.msra.mxu1 %v894_v21  ;;  %v747_v17 = vld [vmem:[#allocation5 + $0xa38] sm:$0xff]  ;;  %v746_v27 = vld [vmem:[#allocation5 + $0xa30] sm:$0xff] }
 0x1c0   : > { %1864 = vmatprep.subr.mxu0 %v763_v23  ;;  %v1070_v35 = vpop.f32.mrf.mxu0  ;;  %1794 = vmatmul.mubr.f32.gmra.mxu1 %v2940_v36  ;;  %v875_v21 = vld [vmem:[#allocation5 + $0xe38] sm:$0xff]  ;;  %v874_v30 = vld [vmem:[#allocation5 + $0xe30] sm:$0xff] }
 0x1c1   : > { %2007 = vmatprep.subr.mxu1 %v891_v25  ;;  %v1071_v40 = vadd.f32 %v1070_v35, %v3581_v31  ;;  %v1211_v63 = vpop.f32.mrf.mxu1  ;;  %1656 = vmatprep.mubr.f32.mxu0 %v2941_v42  ;;  %v2947_v25 = vld [vmem:[%s3409_s15 + $0x318] sm:$0xff]  ;;  %v2948_v36 = vld [vmem:[%s3409_s15 + $0x310] sm:$0xff] }
 0x1c2   : > { %1865 = vmatpush2.msra.mxu0 %v762_v32  ;;  %v3637_v44 = vadd.f32 %v1211_v63, %v1069_v33  ;;  %2008 = vmatpush2.msra.mxu1 %v890_v34  ;;  %v743_v33 = vld [vmem:[#allocation5 + $0xa18] sm:$0xff]  ;;  %v870_v63 = vld [vmem:[#allocation5 + $0xe10] sm:$0xff] }
 0x1c3   : > { %1657 = vmatmul.mubr.f32.gmra.mxu0 %v2942_v46  ;;  %v1213_v51 = vpop.f32.mrf.mxu1  ;;  %1866 = vmatprep.subr.mxu0 %v759_v38  ;;  %v871_v34 = vld [vmem:[#allocation5 + $0xe18] sm:$0xff]  ;;  %v742_v38 = vld [vmem:[#allocation5 + $0xa10] sm:$0xff]  ;;  %v2949_v46 = vld [vmem:[%s3409_s15 + $0x28] sm:$0xff] }
 0x1c4   : > { %2009 = vmatprep.subr.mxu1 %v887_v39  ;;  %v1074_v55 = vpop.f32.mrf.mxu0  ;;  %v3640_v56 = vadd.f32 %v1213_v51, %v1071_v40  ;;  %1799 = vmatprep.mubr.f32.mxu1 %v2943_v58  ;;  %v2950_v51 = vld [vmem:[%s3409_s15 + $0x38] sm:$0xff]  ;;  %v2952_v58 = vld [vmem:[%s3409_s15 + $0x30] sm:$0xff] }
 0x1c5   : > { %1867 = vmatpush2.msra.mxu0 %v758_v43  ;;  %v1075_v60 = vadd.f32 %v1074_v55, %v3537_v6  ;;  %2010 = vmatpush2.msra.mxu1 %v886_v47  ;;  %v2951_v55 = vld [vmem:[%s3409_s15 + $0x20] sm:$0xff] }
 0x1c6   : > { %1868 = vmatprep.subr.mxu0 %v755_v48  ;;  %v1076_v0 = vpop.f32.mrf.mxu0  ;;  %1800 = vmatmul.mubr.f32.gmra.mxu1 %v2944_v2 }
 0x1c7   : > { %2011 = vmatprep.subr.mxu1 %v883_v52  ;;  %v1077_v8 = vadd.f32 %v1076_v0, %v3581_v31  ;;  %v1217_v9 = vpop.f32.mrf.mxu1  ;;  %1662 = vmatprep.mubr.f32.mxu0 %v2945_v10 }
 0x1c8   : > { %1869 = vmatpush2.msra.mxu0 %v754_v59  ;;  %v3647_v14 = vadd.f32 %v1217_v9, %v1075_v60  ;;  %2012 = vmatpush2.msra.mxu1 %v882_v61  ;;  %v2953_v60 = vld [vmem:[%s3409_s15 + $0x68] sm:$0xff]  ;;  %v2954_v61 = vld [vmem:[%s3409_s15 + $0x78] sm:$0xff]  ;;  %v2956_v9 = vld [vmem:[%s3409_s15 + $0x70] sm:$0xff] }
 0x1c9   : > { %1663 = vmatmul.mubr.f32.gmra.mxu0 %v2946_v15  ;;  %v1219_v19 = vpop.f32.mrf.mxu1  ;;  %1870 = vmatprep.subr.mxu0 %v751_v4  ;;  %v2957_v15 = vld [vmem:[%s3409_s15 + $0xa8] sm:$0xff] }
 0x1ca   : > { %2013 = vmatprep.subr.mxu1 %v879_v7  ;;  %v1080_v23 = vpop.f32.mrf.mxu0  ;;  %v3650_v24 = vadd.f32 %v1219_v19, %v1077_v8  ;;  %1805 = vmatprep.mubr.f32.mxu1 %v2947_v25  ;;  %v2955_v8 = vld [vmem:[%s3409_s15 + $0x60] sm:$0xff]  ;;  %v1023_v25 = vadd.f32 %v3551_v45, %v3581_v31 }
 0x1cb   : > { %1871 = vmatpush2.msra.mxu0 %v750_v11  ;;  %v1081_v32 = vadd.f32 %v1080_v23, %v3537_v6  ;;  %2014 = vmatpush2.msra.mxu1 %v878_v16  ;;  %v2958_v16 = vld [vmem:[%s3409_s15 + $0xb8] sm:$0xff]  ;;  %v2963_v45 = vld [vmem:[%s3409_s15 + $0xe0] sm:$0xff] }
 0x1cc   : > { %1872 = vmatprep.subr.mxu0 %v747_v17  ;;  %v1082_v35 = vpop.f32.mrf.mxu0  ;;  %1806 = vmatmul.mubr.f32.gmra.mxu1 %v2948_v36 }
 0x1cd   : > { %2015 = vmatprep.subr.mxu1 %v875_v21  ;;  %v1083_v39 = vadd.f32 %v1082_v35, %v3581_v31  ;;  %v1223_v40 = vpop.f32.mrf.mxu1  ;;  %1873 = vmatpush2.msra.mxu0 %v746_v27  ;;  %v2959_v27 = vld [vmem:[%s3409_s15 + $0xa0] sm:$0xff] }
 0x1ce   : > { %2016 = vmatpush2.msra.mxu1 %v874_v30  ;;  %v3656_v42 = vadd.f32 %v1223_v40, %v1081_v32  ;;  %1874 = vmatprep.subr.mxu0 %v743_v33  ;;  %v2960_v30 = vld [vmem:[%s3409_s15 + $0xb0] sm:$0xff]  ;;  %v2961_v33 = vld [vmem:[%s3409_s15 + $0xe8] sm:$0xff] }
 0x1cf   : > { %2017 = vmatprep.subr.mxu1 %v871_v34  ;;  %v1225_v43 = vpop.f32.mrf.mxu1  ;;  %1875 = vmatpush2.msra.mxu0 %v742_v38  ;;  %v1166_v38 = vadd.f32 %v3555_v54, %v1023_v25  ;;  %v2975_v25 = vld [vmem:[%s3409_s15 + $0x1a0] sm:$0xff] }
 0x1d0   : > { %1876 = vmatprep.mubr.f32.mxu0 %v2949_v46  ;;  %v1086_v47 = vpop.f32.mrf.mxu0  ;;  %v3659_v48 = vadd.f32 %v1225_v43, %v1083_v39  ;;  %2018 = vmatpush2.msra.mxu1 %v870_v63  ;;  %v2964_v39 = vld [vmem:[%s3409_s15 + $0xf0] sm:$0xff]  ;;  %v2965_v63 = vld [vmem:[%s3409_s15 + $0x128] sm:$0xff]  ;;  %v2966_v43 = vld [vmem:[%s3409_s15 + $0x138] sm:$0xff] }
 0x1d1   : > { %2019 = vmatprep.mubr.f32.mxu1 %v2950_v51  ;;  %v1087_v52 = vadd.f32 %v1086_v47, %v3537_v6  ;;  %1877 = vmatmul.mubr.f32.vlgmr.msra.gmra.mxu0 %v2951_v55  ;;  %v1029_v51 = vadd.f32 %v3558_v57, %v3581_v31 }
 0x1d2   : > { %2020 = vmatmul.mubr.f32.vlgmr.msra.gmra.mxu1 %v2952_v58  ;;  %v1088_v59 = vpop.f32.mrf.mxu0  ;;  %1882 = vmatprep.mubr.f32.mxu0 %v2953_v60  ;;  %v2967_v58 = vld [vmem:[%s3409_s15 + $0x120] sm:$0xff]  ;;  %v2969_v60 = vld [vmem:[%s3409_s15 + $0x168] sm:$0xff] }
 0x1d3   : > { %2025 = vmatprep.mubr.f32.mxu1 %v2954_v61  ;;  %v1089_v0 = vadd.f32 %v1088_v59, %v3581_v31  ;;  %v1229_v2 = vpop.f32.mrf.mxu1  ;;  %v2970_v61 = vld [vmem:[%s3409_s15 + $0x178] sm:$0xff]  ;;  %v1172_v57 = vadd.f32 %v3565_v5, %v1029_v51  ;;  %v2983_v51 = vld [vmem:[%s3409_s15 + $0x220] sm:$0xff] }
 0x1d4   : > { %v3668_v4 = vadd.f32 %v1229_v2, %v1087_v52 }
 0x1d5   : > { %v1231_v7 = vpop.f32.mrf.mxu1  ;;  %1883 = vmatmul.mubr.f32.gmra.mxu0 %v2955_v8  ;;  %v2971_v8 = vld [vmem:[%s3409_s15 + $0x160] sm:$0xff] }
 0x1d6   : > { %2026 = vmatmul.mubr.f32.gmra.mxu1 %v2956_v9  ;;  %v1092_v10 = vpop.f32.mrf.mxu0  ;;  %v3672_v11 = vadd.f32 %v1231_v7, %v1089_v0  ;;  %1888 = vmatprep.mubr.f32.mxu0 %v2957_v15  ;;  %v2972_v9 = vld [vmem:[%s3409_s15 + $0x170] sm:$0xff] }
 0x1d7   : > { %2031 = vmatprep.mubr.f32.mxu1 %v2958_v16  ;;  %v1093_v17 = vadd.f32 %v1092_v10, %v3537_v6  ;;  %v2962_v6 = vld [vmem:[%s3409_s15 + $0xf8] sm:$0xff]  ;;  %v1035_v10 = vadd.f32 %v3569_v13, %v3581_v31  ;;  %v2973_v16 = vld [vmem:[%s3409_s15 + $0x1a8] sm:$0xff] }
 0x1d8   : > { %v1094_v19 = vpop.f32.mrf.mxu0 }
 0x1d9   : > { %v1095_v21 = vadd.f32 %v1094_v19, %v3581_v31  ;;  %v1235_v23 = vpop.f32.mrf.mxu1  ;;  %1889 = vmatmul.mubr.f32.gmra.mxu0 %v2959_v27  ;;  %v2976_v27 = vld [vmem:[%s3409_s15 + $0x1b0] sm:$0xff] }
 0x1da   : > { %2032 = vmatmul.mubr.f32.gmra.mxu1 %v2960_v30  ;;  %v3682_v32 = vadd.f32 %v1235_v23, %v1093_v17  ;;  %1894 = vmatprep.mubr.f32.mxu0 %v2961_v33  ;;  %v2974_v17 = vld [vmem:[%s3409_s15 + $0x1b8] sm:$0xff]  ;;  %v1178_v23 = vadd.f32 %v3577_v26, %v1035_v10  ;;  %v2977_v30 = vld [vmem:[%s3409_s15 + $0x1e8] sm:$0xff]  ;;  %v2979_v26 = vld [vmem:[%s3409_s15 + $0x1e0] sm:$0xff] }
 0x1db   : > { %2037 = vmatprep.mubr.f32.mxu1 %v2962_v6  ;;  %v1237_v34 = vpop.f32.mrf.mxu1  ;;  %v2978_v33 = vld [vmem:[%s3409_s15 + $0x1f8] sm:$0xff] }
 0x1dc   : > { %v3686_v35 = vadd.f32 %v1237_v34, %v1095_v21 }
 0x1dd   : > { %v1306_v36 = vpop.f32.mrf.mxu0  ;;  %1895 = vmatmul.mubr.f32.gmra.mxu0 %v2963_v45 }
 0x1de   : > { %2038 = vmatmul.mubr.f32.gmra.mxu1 %v2964_v39  ;;  %v1307_v40 = vadd.f32 %v1306_v36, %v3541_v20  ;;  %1900 = vmatprep.mubr.f32.mxu0 %v2965_v63  ;;  %v2968_v20 = vld [vmem:[%s3409_s15 + $0x130] sm:$0xff]  ;;  %v2982_v39 = vld [vmem:[%s3409_s15 + $0x238] sm:$0xff] }
 0x1df   : > { %2043 = vmatprep.mubr.f32.mxu1 %v2966_v43  ;;  %v1449_v46 = vpop.f32.mrf.mxu1  ;;  %v1308_v47 = vpop.f32.mrf.mxu0 }
 0x1e0   : > { %v3696_v54 = vadd.f32 %v1449_v46, %v1307_v40  ;;  %v1309_v52 = vadd.f32 %v1308_v47, %v1166_v38  ;;  %v2980_v38 = vld [vmem:[%s3409_s15 + $0x1f0] sm:$0xff] }
 0x1e1   : > { %v1451_v55 = vpop.f32.mrf.mxu1  ;;  %1901 = vmatmul.mubr.f32.gmra.mxu0 %v2967_v58  ;;  %v2985_v58 = vld [vmem:[%s3409_s15 + $0x268] sm:$0xff] }
 0x1e2   : > { %2044 = vmatmul.mubr.f32.gmra.mxu1 %v2968_v20  ;;  %v3700_v59 = vadd.f32 %v1451_v55, %v1309_v52  ;;  %1906 = vmatprep.mubr.f32.mxu0 %v2969_v60  ;;  %v2984_v52 = vld [vmem:[%s3409_s15 + $0x230] sm:$0xff]  ;;  %v2986_v20 = vld [vmem:[%s3409_s15 + $0x278] sm:$0xff]  ;;  %2793 = vtanh.f32 %v3696_v54 }
 0x1e3   : > { %2049 = vmatprep.mubr.f32.mxu1 %v2970_v61  ;;  %v1312_v0 = vpop.f32.mrf.mxu0 }
 0x1e4   : > { %v1313_v2 = vadd.f32 %v1312_v0, %v3562_v1  ;;  %2795 = vtanh.f32 %v3700_v59 }
 0x1e5   : > { %v1314_v7 = vpop.f32.mrf.mxu0  ;;  %1907 = vmatmul.mubr.f32.gmra.mxu0 %v2971_v8  ;;  %v2989_v8 = vld [vmem:[%s3409_s15 + $0x2a8] sm:$0xff] }
 0x1e6   : > { %2050 = vmatmul.mubr.f32.gmra.mxu1 %v2972_v9  ;;  %v1315_v15 = vadd.f32 %v1314_v7, %v1172_v57  ;;  %1912 = vmatprep.mubr.f32.mxu0 %v2973_v16  ;;  %v1455_v5 = vpop.f32.mrf.mxu1  ;;  %v2987_v57 = vld [vmem:[%s3409_s15 + $0x260] sm:$0xff]  ;;  %v2990_v9 = vld [vmem:[%s3409_s15 + $0x2b8] sm:$0xff] }
 0x1e7   : > { %2055 = vmatprep.mubr.f32.mxu1 %v2974_v17  ;;  %v3712_v19 = vadd.f32 %v1455_v5, %v1313_v2  ;;  %v2988_v2 = vld [vmem:[%s3409_s15 + $0x270] sm:$0xff]  ;;  %v2991_v17 = vld [vmem:[%s3409_s15 + $0x2a0] sm:$0xff] }
 0x1e8   : > { %v1457_v21 = vpop.f32.mrf.mxu1  ;;  %v2992_v5 = vld [vmem:[%s3409_s15 + $0x2b0] sm:$0xff] }
 0x1e9   : > { %v1318_v1 = vpop.f32.mrf.mxu0  ;;  %1913 = vmatmul.mubr.f32.gmra.mxu0 %v2975_v25  ;;  %v3718_v31 = vadd.f32 %v1457_v21, %v1315_v15  ;;  %v2994_v21 = vld [vmem:[%s3409_s15 + $0x2f8] sm:$0xff]  ;;  %2797 = vtanh.f32 %v3712_v19 }
 0x1ea   : > { %2056 = vmatmul.mubr.f32.gmra.mxu1 %v2976_v27  ;;  %v1319_v13 = vadd.f32 %v1318_v1, %v3574_v22  ;;  %1918 = vmatprep.mubr.f32.mxu0 %v2977_v30  ;;  %v2981_v22 = vld [vmem:[%s3409_s15 + $0x228] sm:$0xff]  ;;  %v2995_v30 = vld [vmem:[%s3409_s15 + $0x2e0] sm:$0xff] }
 0x1eb   : > { %2061 = vmatprep.mubr.f32.mxu1 %v2978_v33  ;;  %v1320_v6 = vpop.f32.mrf.mxu0  ;;  %v2996_v33 = vld [vmem:[%s3409_s15 + $0x2f0] sm:$0xff]  ;;  %2799 = vtanh.f32 %v3718_v31 }
 0x1ec   : > { %v1321_v34 = vadd.f32 %v1320_v6, %v1178_v23  ;;  %v1461_v36 = vpop.f32.mrf.mxu1 }
 0x1ed   : > { %1919 = vmatmul.mubr.f32.gmra.mxu0 %v2979_v26  ;;  %v3724_v45 = vadd.f32 %v1461_v36, %v1319_v13  ;;  %v2998_v36 = vld [vmem:[%s3409_s15 + $0x338] sm:$0xff] }
 0x1ee   : > { %2062 = vmatmul.mubr.f32.gmra.mxu1 %v2980_v38  ;;  %1924 = vmatprep.mubr.f32.mxu0 %v2981_v22  ;;  %v1463_v63 = vpop.f32.mrf.mxu1 }
 0x1ef   : > { %2067 = vmatprep.mubr.f32.mxu1 %v2982_v39  ;;  %v1324_v40 = vpop.f32.mrf.mxu0  ;;  %v3729_v46 = vadd.f32 %v1463_v63, %v1321_v34  ;;  %v2997_v34 = vld [vmem:[%s3409_s15 + $0x328] sm:$0xff]  ;;  %v2999_v39 = vld [vmem:[%s3409_s15 + $0x320] sm:$0xff]  ;;  %2801 = vtanh.f32 %v3724_v45 }
 0x1f0   : > { %v1325_v43 = vadd.f32 %v1324_v40, %v3587_v41  ;;  %v3000_v40 = vld [vmem:[%s3409_s15 + $0x330] sm:$0xff] }
 0x1f1   : > { %v1326_v47 = vpop.f32.mrf.mxu0  ;;  %1925 = vmatmul.mubr.f32.gmra.mxu0 %v2983_v51  ;;  %2803 = vtanh.f32 %v3729_v46 }
 0x1f2   : > { %2068 = vmatmul.mubr.f32.gmra.mxu1 %v2984_v52  ;;  %v1327_v55 = vadd.f32 %v1326_v47, %v3590_v49  ;;  %1930 = vmatprep.mubr.f32.mxu0 %v2985_v58  ;;  %v1467_v60 = vpop.f32.mrf.mxu1 }
 0x1f3   : > { %2073 = vmatprep.mubr.f32.mxu1 %v2986_v20  ;;  %v3736_v61 = vadd.f32 %v1467_v60, %v1325_v43 }
 0x1f4   : > { %v1469_v0 = vpop.f32.mrf.mxu1 }
 0x1f5   : > { %v1330_v41 = vpop.f32.mrf.mxu0  ;;  %1931 = vmatmul.mubr.f32.gmra.mxu0 %v2987_v57  ;;  %v3741_v49 = vadd.f32 %v1469_v0, %v1327_v55  ;;  %2805 = vtanh.f32 %v3736_v61 }
 0x1f6   : > { %2074 = vmatmul.mubr.f32.gmra.mxu1 %v2988_v2  ;;  %v1331_v7 = vadd.f32 %v1330_v41, %v3597_v3  ;;  %1936 = vmatprep.mubr.f32.mxu0 %v2989_v8  ;;  %v2993_v3 = vld [vmem:[%s3409_s15 + $0x2e8] sm:$0xff] }
 0x1f7   : > { %2079 = vmatprep.mubr.f32.mxu1 %v2990_v9  ;;  %v1332_v10 = vpop.f32.mrf.mxu0  ;;  %2807 = vtanh.f32 %v3741_v49 }
 0x1f8   : > { %v1333_v15 = vadd.f32 %v1332_v10, %v3600_v12  ;;  %v1473_v16 = vpop.f32.mrf.mxu1  ;;  %v2285_v10 = vld [vmem:[#allocation8 + $0xf8] sm:$0xff] }
 0x1f9   : > { %1937 = vmatmul.mubr.f32.gmra.mxu0 %v2991_v17  ;;  %v3748_v1 = vadd.f32 %v1473_v16, %v1331_v7  ;;  %2599 = vmatprep.subr.mxu0 %v2285_v10  ;;  %v2284_v17 = vld [vmem:[#allocation8 + $0xf0] sm:$0xff] }
 0x1fa   : > { %2080 = vmatmul.mubr.f32.gmra.mxu1 %v2992_v5  ;;  %1942 = vmatprep.mubr.f32.mxu0 %v2993_v3  ;;  %v1475_v25 = vpop.f32.mrf.mxu1  ;;  %v2268_v5 = vld [vmem:[#allocation8 + $0x70] sm:$0xff] }
 0x1fb   : > { %2085 = vmatprep.mubr.f32.mxu1 %v2994_v21  ;;  %v1336_v23 = vpop.f32.mrf.mxu0  ;;  %v3753_v12 = vadd.f32 %v1475_v25, %v1333_v15  ;;  %2670 = vmatprep.subr.mxu1 %v2285_v10  ;;  %v2283_v21 = vld [vmem:[#allocation8 + $0xe8] sm:$0xff]  ;;  %2809 = vtanh.f32 %v3748_v1 }
 0x1fc   : > { %v1337_v27 = vadd.f32 %v1336_v23, %v3607_v29  ;;  %v2267_v25 = vld [vmem:[#allocation8 + $0x68] sm:$0xff] }
 0x1fd   : > { %v1338_v13 = vpop.f32.mrf.mxu0  ;;  %1943 = vmatmul.mubr.f32.gmra.mxu0 %v2995_v30  ;;  %2811 = vtanh.f32 %v3753_v12 }
 0x1fe   : > { %2086 = vmatmul.mubr.f32.gmra.mxu1 %v2996_v33  ;;  %v1339_v6 = vadd.f32 %v1338_v13, %v3610_v37  ;;  %1948 = vmatprep.mubr.f32.mxu0 %v2997_v34  ;;  %v1479_v26 = vpop.f32.mrf.mxu1  ;;  %v2282_v13 = vld [vmem:[#allocation8 + $0xe0] sm:$0xff]  ;;  %v2281_v34 = vld [vmem:[#allocation8 + $0xd8] sm:$0xff] }
 0x1ff   : > { %2091 = vmatprep.mubr.f32.mxu1 %v2998_v36  ;;  %v3760_v38 = vadd.f32 %v1479_v26, %v1337_v27  ;;  %v2266_v33 = vld [vmem:[#allocation8 + $0x60] sm:$0xff] }
 0x200   : > { %v1481_v29 = vpop.f32.mrf.mxu1 }
 0x201   : > { %v1342_v22 = vpop.f32.mrf.mxu0  ;;  %1949 = vmatmul.mubr.f32.gmra.mxu0 %v2999_v39  ;;  %v3765_v43 = vadd.f32 %v1481_v29, %v1339_v6  ;;  %v2280_v29 = vld [vmem:[#allocation8 + $0xd0] sm:$0xff]  ;;  %2813 = vtanh.f32 %v3760_v38 }
 0x202   : > { %2092 = vmatmul.mubr.f32.gmra.mxu1 %v3000_v40  ;;  %v1343_v63 = vadd.f32 %v1342_v22, %v3617_v53  ;;  %v2264_v40 = vld [vmem:[#allocation8 + $0x50] sm:$0xff] }
 0x203   : > { %v1344_v47 = vpop.f32.mrf.mxu0  ;;  %2815 = vtanh.f32 %v3765_v43 }
 0x204   : > { %v1345_v37 = vadd.f32 %v1344_v47, %v3620_v62  ;;  %v1485_v51 = vpop.f32.mrf.mxu1  ;;  %v2279_v47 = vld [vmem:[#allocation8 + $0xc8] sm:$0xff] }
 0x205   : > { %v3768_v52 = vadd.f32 %v1485_v51, %v1343_v63  ;;  %v2263_v51 = vld [vmem:[#allocation8 + $0x48] sm:$0xff] }
 0x206   : > { %v1487_v58 = vpop.f32.mrf.mxu1 }
 0x207   : > { %v1348_v55 = vpop.f32.mrf.mxu0  ;;  %v3771_v60 = vadd.f32 %v1487_v58, %v1345_v37  ;;  %v2278_v58 = vld [vmem:[#allocation8 + $0xc0] sm:$0xff]  ;;  %2817 = vtanh.f32 %v3768_v52 }
 0x208   : > { %v1349_v20 = vadd.f32 %v1348_v55, %v3627_v18  ;;  %v2269_v18 = vld [vmem:[#allocation8 + $0x78] sm:$0xff] }
 0x209   : > { %v1350_v41 = vpop.f32.mrf.mxu0  ;;  %2600 = vmatpush3.msra.mxu0 %v2269_v18  ;;  %2686 = vmatpush3.msra.mxu1 %v2269_v18  ;;  %2819 = vtanh.f32 %v3771_v60 }
 0x20a   : > { %v1351_v0 = vadd.f32 %v1350_v41, %v3630_v28  ;;  %v1491_v57 = vpop.f32.mrf.mxu1  ;;  %2601 = vmatprep.subr.mxu0 %v2284_v17  ;;  %2671 = vmatprep.subr.mxu1 %v2284_v17 }
 0x20b   : > { %v3774_v2 = vadd.f32 %v1491_v57, %v1349_v20  ;;  %2602 = vmatpush3.msra.mxu0 %v2268_v5  ;;  %2687 = vmatpush3.msra.mxu1 %v2268_v5  ;;  %v2277_v57 = vld [vmem:[#allocation8 + $0xb8] sm:$0xff] }
 0x20c   : > { %v1493_v7 = vpop.f32.mrf.mxu1  ;;  %2603 = vmatprep.subr.mxu0 %v2283_v21  ;;  %2672 = vmatprep.subr.mxu1 %v2283_v21 }
 0x20d   : > { %v1354_v53 = vpop.f32.mrf.mxu0  ;;  %v3777_v62 = vadd.f32 %v1493_v7, %v1351_v0  ;;  %2604 = vmatpush3.msra.mxu0 %v2267_v25  ;;  %2688 = vmatpush3.msra.mxu1 %v2267_v25  ;;  %v2261_v7 = vld [vmem:[#allocation8 + $0x38] sm:$0xff]  ;;  %v2258_v25 = vld [vmem:[#allocation8 + $0x20] sm:$0xff]  ;;  %2821 = vtanh.f32 %v3774_v2 }
 0x20e   : > { %v1355_v8 = vadd.f32 %v1354_v53, %v3637_v44  ;;  %2605 = vmatprep.subr.mxu0 %v2282_v13  ;;  %2673 = vmatprep.subr.mxu1 %v2282_v13  ;;  %v2273_v13 = vld [vmem:[#allocation8 + $0x98] sm:$0xff] }
 0x20f   : > { %v1356_v9 = vpop.f32.mrf.mxu0  ;;  %2606 = vmatpush3.msra.mxu0 %v2266_v33  ;;  %2689 = vmatpush3.msra.mxu1 %v2266_v33  ;;  %v2257_v33 = vld [vmem:[#allocation8 + $0x18] sm:$0xff]  ;;  %2823 = vtanh.f32 %v3777_v62 }
 0x210   : > { %v1357_v15 = vadd.f32 %v1356_v9, %v3640_v56  ;;  %v1497_v16 = vpop.f32.mrf.mxu1  ;;  %2607 = vmatprep.subr.mxu0 %v2281_v34  ;;  %2674 = vmatprep.subr.mxu1 %v2281_v34  ;;  %v2276_v9 = vld [vmem:[#allocation8 + $0xb0] sm:$0xff] }
 0x211   : > { %v3780_v28 = vadd.f32 %v1497_v16, %v1355_v8  ;;  %v2275_v16 = vld [vmem:[#allocation8 + $0xa8] sm:$0xff] }
 0x212   : > { %v1499_v44 = vpop.f32.mrf.mxu1 }
 0x213   : > { %v1360_v3 = vpop.f32.mrf.mxu0  ;;  %v3783_v56 = vadd.f32 %v1499_v44, %v1357_v15  ;;  %v2260_v15 = vld [vmem:[#allocation8 + $0x30] sm:$0xff] }
 0x214   : > { %v1361_v23 = vadd.f32 %v1360_v3, %v3647_v14  ;;  %v2265_v14 = vld [vmem:[#allocation8 + $0x58] sm:$0xff] }
 0x215   : > { %v1362_v27 = vpop.f32.mrf.mxu0  ;;  %2608 = vmatpush3.msra.mxu0 %v2265_v14  ;;  %2690 = vmatpush3.msra.mxu1 %v2265_v14  ;;  %v2256_v14 = vld [vmem:[#allocation8 + $0x10] sm:$0xff] }
 0x216   : > { %v1363_v30 = vadd.f32 %v1362_v27, %v3650_v24  ;;  %v1503_v6 = vpop.f32.mrf.mxu1  ;;  %2609 = vmatprep.subr.mxu0 %v2280_v29  ;;  %2675 = vmatprep.subr.mxu1 %v2280_v29  ;;  %v2270_v29 = vld [vmem:[#allocation8 + $0x80] sm:$0xff] }
 0x217   : > { %v3786_v36 = vadd.f32 %v1503_v6, %v1361_v23  ;;  %2610 = vmatpush3.msra.mxu0 %v2264_v40  ;;  %2691 = vmatpush3.msra.mxu1 %v2264_v40 }
 0x218   : > { %v1505_v22 = vpop.f32.mrf.mxu1  ;;  %2611 = vmatprep.subr.mxu0 %v2279_v47  ;;  %2676 = vmatprep.subr.mxu1 %v2279_v47 }
 0x219   : > { %v1366_v26 = vpop.f32.mrf.mxu0  ;;  %v3789_v24 = vadd.f32 %v1505_v22, %v1363_v30  ;;  %2612 = vmatpush3.msra.mxu0 %v2263_v51  ;;  %2692 = vmatpush3.msra.mxu1 %v2263_v51  ;;  %v2255_v22 = vld [vmem:[#allocation8 + $0x8] sm:$0xff] }
 0x21a   : > { %v1367_v39 = vadd.f32 %v1366_v26, %v3656_v42  ;;  %2613 = vmatprep.subr.mxu0 %v2278_v58  ;;  %v2262_v42 = vld [vmem:[#allocation8 + $0x40] sm:$0xff]  ;;  %2677 = vmatprep.subr.mxu1 %v2278_v58 }
 0x21b   : > { %4200 = vst [vmem:[#allocation16_spill] sm:$0xff] %v3789_v24  ;;  %v1368_v63 = vpop.f32.mrf.mxu0  ;;  %2614 = vmatpush3.msra.mxu0 %v2262_v42  ;;  %2693 = vmatpush3.msra.mxu1 %v2262_v42 }
 0x21c   : > { %v1369_v37 = vadd.f32 %v1368_v63, %v3659_v48  ;;  %v1509_v55 = vpop.f32.mrf.mxu1  ;;  %2615 = vmatprep.subr.mxu0 %v2277_v57  ;;  %2678 = vmatprep.subr.mxu1 %v2277_v57 }
 0x21d   : > { %v3792_v20 = vadd.f32 %v1509_v55, %v1367_v39  ;;  %2616 = vmatpush3.msra.mxu0 %v2261_v7  ;;  %2694 = vmatpush3.msra.mxu1 %v2261_v7  ;;  %v2254_v39 = vld [vmem:[#allocation8] sm:$0xff] }
 0x21e   : > { %v1511_v0 = vpop.f32.mrf.mxu1  ;;  %2617 = vmatprep.subr.mxu0 %v2276_v9  ;;  %2679 = vmatprep.subr.mxu1 %v2276_v9 }
 0x21f   : > { %4201 = vst [vmem:[#allocation17_spill] sm:$0xff] %v3792_v20  ;;  %v1372_v41 = vpop.f32.mrf.mxu0  ;;  %v3795_v48 = vadd.f32 %v1511_v0, %v1369_v37  ;;  %2618 = vmatpush3.msra.mxu0 %v2260_v15  ;;  %2695 = vmatpush3.msra.mxu1 %v2260_v15 }
 0x220   : > { %v1373_v53 = vadd.f32 %v1372_v41, %v3668_v4  ;;  %2619 = vmatprep.subr.mxu0 %v2275_v16  ;;  %v2259_v4 = vld [vmem:[#allocation8 + $0x28] sm:$0xff]  ;;  %2680 = vmatprep.subr.mxu1 %v2275_v16 }
 0x221   : > { %4202 = vst [vmem:[#allocation18_spill] sm:$0xff] %v3795_v48  ;;  %v1374_v8 = vpop.f32.mrf.mxu0  ;;  %2620 = vmatpush3.msra.mxu0 %v2259_v4  ;;  %2696 = vmatpush3.msra.mxu1 %v2259_v4 }
 0x222   : > { %v1375_v10 = vadd.f32 %v1374_v8, %v3672_v11  ;;  %v1515_v18 = vpop.f32.mrf.mxu1  ;;  %v2274_v11 = vld [vmem:[#allocation8 + $0xa0] sm:$0xff] }
 0x223   : > { %v3798_v17 = vadd.f32 %v1515_v18, %v1373_v53  ;;  %2621 = vmatprep.subr.mxu0 %v2274_v11  ;;  %2681 = vmatprep.subr.mxu1 %v2274_v11 }
 0x224   : > { %v1517_v3 = vpop.f32.mrf.mxu1  ;;  %2622 = vmatpush3.msra.mxu0 %v2258_v25  ;;  %2697 = vmatpush3.msra.mxu1 %v2258_v25 }
 0x225   : > { %4203 = vst [vmem:[#allocation19_spill] sm:$0xff] %v3798_v17  ;;  %v1378_v5 = vpop.f32.mrf.mxu0  ;;  %v3801_v21 = vadd.f32 %v1517_v3, %v1375_v10  ;;  %2623 = vmatprep.subr.mxu0 %v2273_v13  ;;  %2682 = vmatprep.subr.mxu1 %v2273_v13 }
 0x226   : > { %v1379_v44 = vadd.f32 %v1378_v5, %v3682_v32  ;;  %2624 = vmatpush3.msra.mxu0 %v2257_v33  ;;  %v2272_v32 = vld [vmem:[#allocation8 + $0x90] sm:$0xff]  ;;  %2698 = vmatpush3.msra.mxu1 %v2257_v33 }
 0x227   : > { %4204 = vst [vmem:[#allocation20_spill] sm:$0xff] %v3801_v21  ;;  %v1380_v23 = vpop.f32.mrf.mxu0  ;;  %2625 = vmatprep.subr.mxu0 %v2272_v32  ;;  %2683 = vmatprep.subr.mxu1 %v2272_v32 }
 0x228   : > { %v1381_v27 = vadd.f32 %v1380_v23, %v3686_v35  ;;  %v1521_v30 = vpop.f32.mrf.mxu1  ;;  %2626 = vmatpush3.msra.mxu0 %v2256_v14  ;;  %v2271_v35 = vld [vmem:[#allocation8 + $0x88] sm:$0xff]  ;;  %2699 = vmatpush3.msra.mxu1 %v2256_v14 }
 0x229   : > { %v3804_v6 = vadd.f32 %v1521_v30, %v1379_v44  ;;  %2627 = vmatprep.subr.mxu0 %v2271_v35  ;;  %2684 = vmatprep.subr.mxu1 %v2271_v35 }
 0x22a   : > { %v1523_v34 = vpop.f32.mrf.mxu1  ;;  %2628 = vmatpush3.msra.mxu0 %v2255_v22  ;;  %2700 = vmatpush3.msra.mxu1 %v2255_v22 }
 0x22b   : > { %4205 = vst [vmem:[#allocation21_spill] sm:$0xff] %v3804_v6  ;;  %v3806_v26 = vadd.f32 %v1523_v34, %v1381_v27  ;;  %2629 = vmatprep.subr.mxu0 %v2270_v29  ;;  %2685 = vmatprep.subr.mxu1 %v2270_v29 }
 0x22c   : > { %2630 = vmatpush3.msra.mxu0 %v2254_v39  ;;  %2701 = vmatpush3.msra.mxu1 %v2254_v39 }
 0x22d   : > { %4206 = vst [vmem:[#allocation22_spill] sm:$0xff] %v3806_v26 }
 0x237   : > { %v1592_v40 = vpop.f32.mrf.mxu0 }
 0x239   : > { %v3808_v63 = vpop.f32.mrf.mxu1  ;;  %v1594_v47 = vpop.f32.mrf.mxu0 }
 0x23b   : > { %v3812_v51 = vpop.f32.mrf.mxu1 }
 0x247   : > { %v3810_v37 = vpop.f32.mrf.mxu0 }
 0x249   : > { %v3814_v55 = vpop.f32.mrf.mxu0 }
 0x24a   : > { %v3816_v58 = vpop.f32.mrf.mxu1 }
 0x24c   : > { %v3820_v41 = vpop.f32.mrf.mxu1 }
 0x24d   : > { %v3818_v42 = vpop.f32.mrf.mxu0 }
 0x24f   : > { %v3822_v0 = vpop.f32.mrf.mxu0 }
 0x250   : > { %v3824_v57 = vpop.f32.mrf.mxu1 }
 0x252   : > { %v3828_v7 = vpop.f32.mrf.mxu1 }
 0x253   : > { %v3826_v53 = vpop.f32.mrf.mxu0 }
 0x255   : > { %v3830_v8 = vpop.f32.mrf.mxu0 }
 0x256   : > { %v3832_v9 = vpop.f32.mrf.mxu1 }
 0x258   : > { %v3836_v15 = vpop.f32.mrf.mxu1 }
 0x259   : > { %v3834_v10 = vpop.f32.mrf.mxu0 }
 0x25b   : > { %v3838_v18 = vpop.f32.mrf.mxu0 }
 0x25c   : > { %v3840_v16 = vpop.f32.mrf.mxu1 }
 0x25e   : > { %v3844_v5 = vpop.f32.mrf.mxu1 }
 0x25f   : > { %v3842_v4 = vpop.f32.mrf.mxu0 }
 0x261   : > { %v3846_v3 = vpop.f32.mrf.mxu0 }
 0x262   : > { %v3848_v44 = vpop.f32.mrf.mxu1 }
 0x264   : > { %v3852_v23 = vpop.f32.mrf.mxu1 }
 0x265   : > { %v3850_v11 = vpop.f32.mrf.mxu0 }
 0x267   : > { %v3854_v25 = vpop.f32.mrf.mxu0 }
 0x268   : > { %v3856_v27 = vpop.f32.mrf.mxu1 }
 0x26a   : > { %v3860_v30 = vpop.f32.mrf.mxu1 }
 0x26b   : > { %v3858_v13 = vpop.f32.mrf.mxu0 }
 0x26d   : > { %v3862_v33 = vpop.f32.mrf.mxu0 }
 0x26e   : > { %v3864_v32 = vpop.f32.mrf.mxu1 }
 0x26f   : > { %4207 = vst [vmem:[#allocation23_spill] sm:$0xff] %v3864_v32 }
 0x270   : > { %v3868_v14 = vpop.f32.mrf.mxu1 }
 0x271   : > { %v3866_v34 = vpop.f32.mrf.mxu0  ;;  %4208 = vst [vmem:[#allocation24_spill] sm:$0xff] %v3868_v14 }
 0x273   : > { %v3870_v35 = vpop.f32.mrf.mxu0 }
 0x274   : > { %v3872_v22 = vpop.f32.mrf.mxu1 }
 0x275   : > { %4209 = vst [vmem:[#allocation25_spill] sm:$0xff] %v3872_v22  ;;  %v944_v22 = vsub.s32 2, %v3530_v50 }
 0x276   : > { %v3876_v39 = vpop.f32.mrf.mxu1 }
 0x277   : > { %v3874_v29 = vpop.f32.mrf.mxu0  ;;  %4210 = vst [vmem:[#allocation26_spill] sm:$0xff] %v3876_v39  ;;  %v948_v39 = vsub.s32 3, %v3530_v50 }
 0x279   : > { %v3878_v6 = vpop.f32.mrf.mxu0 }
 0x27a   : > { %v3880_v26 = vpop.f32.mrf.mxu1 }
 0x27b   : > { %4211 = vst [vmem:[#allocation27_spill] sm:$0xff] %v3880_v26 }
 0x27c   : > { %v3884_v21 = vpop.f32.mrf.mxu1 }
 0x27d   : > { %v3882_v17 = vpop.f32.mrf.mxu0  ;;  %4212 = vst [vmem:[#allocation28_spill] sm:$0xff] %v3884_v21  ;;  %v3001_v21 = vld [vmem:[#allocation7] sm:$0xf] }
 0x27f   : > { %v3886_v20 = vpop.f32.mrf.mxu0 }
 0x280   : > { %4213 = vst [vmem:[#allocation29_spill] sm:$0xff] %v3886_v20  ;;  %v3888_v48 = vpop.f32.mrf.mxu1  ;;  %v3902_v20 = vrot.slane %v3001_v21, %v944_v22 }
 0x281   : > { %4214 = vst [vmem:[#allocation30_spill] sm:$0xff] %v3888_v48 }
 0x282   : > { %v3890_v24 = vpop.f32.mrf.mxu1  ;;  %v1593_v54 = vadd.f32 %v1592_v40, %v3902_v20  ;;  %v1599_v46 = vadd.f32 %v3810_v37, %v3902_v20  ;;  %v1605_v12 = vadd.f32 %v3818_v42, %v3902_v20  ;;  %v3937_v37 = vpop.eup %2793  ;;  %v1611_v2 = vadd.f32 %v3826_v53, %v3902_v20 }
 0x283   : > { %4215 = vst [vmem:[#allocation31_spill] sm:$0xff] %v3890_v24  ;;  %v3892_v14 = vpop.f32.mrf.mxu0  ;;  %v3908_v24 = vrot.slane %v3001_v21, %v948_v39 }
 0x284   : > { %v1736_v45 = vadd.f32 %v3808_v63, %v1593_v54  ;;  %v1742_v38 = vadd.f32 %v3816_v58, %v1599_v46  ;;  %v1748_v58 = vadd.f32 %v3824_v57, %v1605_v12 }
 0x285   : > { %v3899_v26 = vpop.f32.mrf.mxu0  ;;  %v1595_v19 = vadd.f32 %v1594_v47, %v3908_v24  ;;  %v1601_v1 = vadd.f32 %v3814_v55, %v3908_v24  ;;  %v1607_v52 = vadd.f32 %v3822_v0, %v3908_v24  ;;  %v1613_v62 = vadd.f32 %v3830_v8, %v3908_v24 }
 0x286   : > { %v3896_v32 = vpop.f32.mrf.mxu1  ;;  %v1623_v8 = vadd.f32 %v3842_v4, %v3902_v20 }
 0x287   : > { %v1738_v49 = vadd.f32 %v3812_v51, %v1595_v19  ;;  %v3941_v51 = vpop.eup %2795  ;;  %v1744_v19 = vadd.f32 %v3820_v41, %v1601_v1 }
 0x288   : > { %v3904_v48 = vpop.f32.mrf.mxu1  ;;  %v3946_v42 = vpop.eup %2797 }
 0x289   : > { %v3911_v50 = vpop.f32.mrf.mxu0 }
 0x28b   : > { %v3923_v31 = vpop.f32.mrf.mxu0 }
 0x28c   : > { %v3915_v59 = vpop.f32.mrf.mxu1 }
 0x28e   : > { %v3920_v22 = vpop.f32.mrf.mxu1 }
 0x28f   : > { %4216 = vst [vmem:[#allocation32_spill] sm:$0xff] %v3920_v22  ;;  %v3949_v22 = vpop.eup %2799 }
 0x291   : > { %v1878_v61 = vpop.f32.mrf.mxu0 }
 0x292   : > { %v2021_v21 = vpop.f32.mrf.mxu1  ;;  %v1879_v40 = vadd.f32 %v1878_v61, %v1736_v45 }
 0x293   : > { %v1880_v63 = vpop.f32.mrf.mxu0 }
 0x294   : > { %v2023_v47 = vpop.f32.mrf.mxu1  ;;  %v2022_v43 = vadd.f32 %v2021_v21, %v1879_v40  ;;  %v1881_v39 = vadd.f32 %v1880_v63, %v1738_v49  ;;  %v3955_v21 = vpop.eup %2801  ;;  %v1750_v63 = vadd.f32 %v3828_v7, %v1607_v52  ;;  %v1619_v7 = vadd.f32 %v3838_v18, %v3908_v24 }
 0x295   : > { %v1884_v55 = vpop.f32.mrf.mxu0  ;;  %v3957_v1 = vpop.eup %2803 }
 0x296   : > { %v2027_v54 = vpop.f32.mrf.mxu1  ;;  %v2124_v45 = vmul.f32 0.5, %v2022_v43  ;;  %v2024_v61 = vadd.f32 %v2023_v47, %v1881_v39  ;;  %v1885_v60 = vadd.f32 %v1884_v55, %v1742_v38  ;;  %v3963_v53 = vpop.eup %2805  ;;  %v1754_v55 = vadd.f32 %v3832_v9, %v1611_v2 }
 0x297   : > { %v1886_v46 = vpop.f32.mrf.mxu0  ;;  %v3965_v39 = vpop.eup %2807  ;;  %v1756_v9 = vadd.f32 %v3836_v15, %v1613_v62  ;;  %v1766_v15 = vadd.f32 %v3848_v44, %v1623_v8 }
 0x298   : > { %v2029_v0 = vpop.f32.mrf.mxu1  ;;  %2825 = vtanh.f32 %v2124_v45  ;;  %v2125_v49 = vmul.f32 0.5, %v2024_v61  ;;  %v2028_v40 = vadd.f32 %v2027_v54, %v1885_v60  ;;  %v1887_v41 = vadd.f32 %v1886_v46, %v1744_v19  ;;  %v3974_v19 = vpop.eup %2809 }
 0x299   : > { %2827 = vtanh.f32 %v3780_v28  ;;  %v1890_v57 = vpop.f32.mrf.mxu0  ;;  %v1617_v28 = vadd.f32 %v3834_v10, %v3902_v20  ;;  %v1625_v10 = vadd.f32 %v3846_v3, %v3908_v24 }
 0x29a   : > { %v2033_v12 = vpop.f32.mrf.mxu1  ;;  %2829 = vtanh.f32 %v2125_v49  ;;  %v2126_v47 = vmul.f32 0.5, %v2028_v40  ;;  %v2030_v38 = vadd.f32 %v2029_v0, %v1887_v41  ;;  %v1891_v43 = vadd.f32 %v1890_v57, %v1748_v58  ;;  %v3976_v58 = vpop.eup %2811 }
 0x29b   : > { %v1892_v52 = vpop.f32.mrf.mxu0  ;;  %v3982_v4 = vpop.eup %2813  ;;  %v1760_v41 = vadd.f32 %v3840_v16, %v1617_v28  ;;  %v1631_v16 = vadd.f32 %v3854_v25, %v3908_v24  ;;  %v1647_v25 = vadd.f32 %v3874_v29, %v3902_v20 }
 0x29c   : > { %v2035_v54 = vpop.f32.mrf.mxu1  ;;  %2831 = vtanh.f32 %v2126_v47  ;;  %v2127_v45 = vmul.f32 0.5, %v2030_v38  ;;  %v2034_v61 = vadd.f32 %v2033_v12, %v1891_v43  ;;  %v1893_v60 = vadd.f32 %v1892_v52, %v1750_v63  ;;  %v3984_v40 = vpop.eup %2815 }
 0x29d   : > { %2833 = vtanh.f32 %v3783_v56  ;;  %v1896_v18 = vpop.f32.mrf.mxu0  ;;  %v1762_v56 = vadd.f32 %v3844_v5, %v1619_v7  ;;  %v3990_v62 = vpop.eup %2817  ;;  %v1629_v43 = vadd.f32 %v3850_v11, %v3902_v20  ;;  %v1635_v5 = vadd.f32 %v3858_v13, %v3902_v20 }
 0x29e   : > { %v2039_v2 = vpop.f32.mrf.mxu1  ;;  %2835 = vtanh.f32 %v2127_v45  ;;  %v2128_v46 = vmul.f32 0.5, %v2034_v61  ;;  %v2036_v0 = vadd.f32 %v2035_v54, %v1893_v60  ;;  %v1897_v49 = vadd.f32 %v1896_v18, %v1754_v55  ;;  %v3992_v38 = vpop.eup %2819 }
 0x29f   : > { %2837 = vtanh.f32 %v3786_v36  ;;  %v1898_v63 = vpop.f32.mrf.mxu0  ;;  %v1768_v36 = vadd.f32 %v3852_v23, %v1625_v10  ;;  %v4001_v28 = vpop.eup %2821  ;;  %v1637_v54 = vadd.f32 %v3862_v33, %v3908_v24  ;;  %v1641_v11 = vadd.f32 %v3866_v34, %v3902_v20  ;;  %v4217_v34 = vld [vmem:[#allocation23_spill] sm:$0xff] }
 0x2a0   : > { %v2041_v3 = vpop.f32.mrf.mxu1  ;;  %2839 = vtanh.f32 %v2128_v46  ;;  %v2129_v57 = vmul.f32 0.5, %v2036_v0  ;;  %v2040_v12 = vadd.f32 %v2039_v2, %v1897_v49  ;;  %v1899_v47 = vadd.f32 %v1898_v63, %v1756_v9  ;;  %v4011_v61 = vpop.eup %2823 }
 0x2a1   : > { %v1902_v44 = vpop.f32.mrf.mxu0  ;;  %v1643_v23 = vadd.f32 %v3870_v35, %v3908_v24  ;;  %v1772_v33 = vadd.f32 %v3856_v27, %v1629_v43  ;;  %v1774_v2 = vadd.f32 %v3860_v30, %v1631_v16  ;;  %v1778_v46 = vadd.f32 %v4217_v34, %v1635_v5  ;;  %v4220_v30 = vld [vmem:[#allocation26_spill] sm:$0xff] }
 0x2a2   : > { %v2045_v55 = vpop.f32.mrf.mxu1  ;;  %2841 = vtanh.f32 %v2129_v57  ;;  %v2130_v7 = vmul.f32 0.5, %v2040_v12  ;;  %v2042_v8 = vadd.f32 %v2041_v3, %v1899_v47  ;;  %v1903_v52 = vadd.f32 %v1902_v44, %v1760_v41  ;;  %v4219_v47 = vld [vmem:[#allocation25_spill] sm:$0xff]  ;;  %v4221_v44 = vld [vmem:[#allocation27_spill] sm:$0xff] }
 0x2a3   : > { %v1904_v13 = vpop.f32.mrf.mxu0  ;;  %v1649_v35 = vadd.f32 %v3878_v6, %v3908_v24  ;;  %v4022_v27 = vadd.f32 %v4219_v47, %v1641_v11  ;;  %v4025_v43 = vadd.f32 %v4220_v30, %v1643_v23 }
 0x2a4   : > { %v2047_v45 = vpop.f32.mrf.mxu1  ;;  %2843 = vtanh.f32 %v2130_v7  ;;  %v2131_v60 = vmul.f32 0.5, %v2042_v8  ;;  %v2046_v9 = vadd.f32 %v2045_v55, %v1903_v52  ;;  %v1905_v10 = vadd.f32 %v1904_v13, %v1762_v56  ;;  %v4218_v56 = vld [vmem:[#allocation24_spill] sm:$0xff] }
 0x2a5   : > { %v2826_v18 = vpop.eup %2825  ;;  %v1908_v0 = vpop.f32.mrf.mxu0  ;;  %v1780_v12 = vadd.f32 %v4218_v56, %v1637_v54  ;;  %v4028_v55 = vadd.f32 %v4221_v44, %v1647_v25  ;;  %v1653_v13 = vadd.f32 %v3882_v17, %v3902_v20 }
 0x2a6   : > { %v2051_v29 = vpop.f32.mrf.mxu1  ;;  %v4018_v49 = vpop.eup %2827  ;;  %v2176_v41 = vadd.f32 1.0, %v2826_v18  ;;  %2845 = vtanh.f32 %v2131_v60  ;;  %v2132_v63 = vmul.f32 0.5, %v2046_v9  ;;  %v2048_v3 = vadd.f32 %v2047_v45, %v1905_v10 }
 0x2a7   : > { %v2830_v57 = vpop.eup %2829  ;;  %v1909_v16 = vadd.f32 %v1908_v0, %v1766_v15  ;;  %v1910_v5 = vpop.f32.mrf.mxu0  ;;  %v4222_v15 = vld [vmem:[#allocation28_spill] sm:$0xff]  ;;  %v4223_v0 = vld [vmem:[#allocation29_spill] sm:$0xff] }
 0x2a8   : > { %v2053_v6 = vpop.f32.mrf.mxu1  ;;  %v2177_v7 = vadd.f32 1.0, %v2830_v57  ;;  %2847 = vtanh.f32 %v2132_v63  ;;  %v2133_v8 = vmul.f32 0.5, %v2048_v3  ;;  %v2202_v54 = vmul.f32 0.5, %v2176_v41 }
 0x2a9   : > { %v2832_v52 = vpop.eup %2831  ;;  %v2052_v45 = vadd.f32 %v2051_v29, %v1909_v16  ;;  %v1911_v11 = vadd.f32 %v1910_v5, %v1768_v36  ;;  %v1914_v60 = vpop.f32.mrf.mxu0  ;;  %v4035_v10 = vadd.f32 %v4222_v15, %v1649_v35  ;;  %v1655_v63 = vadd.f32 %v4223_v0, %v3908_v24  ;;  %v4224_v15 = vld [vmem:[#allocation30_spill] sm:$0xff] }
 0x2aa   : > { %v2057_v9 = vpop.f32.mrf.mxu1  ;;  %v4032_v23 = vpop.eup %2833  ;;  %v2203_v18 = vmul.f32 0.5, %v2177_v7  ;;  %v2178_v25 = vadd.f32 1.0, %v2832_v52  ;;  %2849 = vtanh.f32 %v2133_v8  ;;  %v1915_v17 = vadd.f32 %v1914_v60, %v1772_v33 }
 0x2ab   : > { %v2836_v34 = vpop.eup %2835  ;;  %v2134_v3 = vmul.f32 0.5, %v2052_v45  ;;  %v2054_v57 = vadd.f32 %v2053_v6, %v1911_v11  ;;  %v1916_v41 = vpop.f32.mrf.mxu0  ;;  %v2228_v5 = vmul.f32 %v3937_v37, %v2202_v54 }
 0x2ac   : > { %v2059_v29 = vpop.f32.mrf.mxu1  ;;  %v4039_v36 = vpop.eup %2837  ;;  %v2204_v56 = vmul.f32 0.5, %v2178_v25  ;;  %v2179_v47 = vadd.f32 1.0, %v2836_v34  ;;  %v1917_v30 = vadd.f32 %v1916_v41, %v1774_v2  ;;  %v2229_v35 = vmul.f32 %v3941_v51, %v2203_v18 }
 0x2ad   : > { %v2840_v16 = vpop.eup %2839  ;;  %2851 = vtanh.f32 %v2134_v3  ;;  %v2135_v44 = vmul.f32 0.5, %v2054_v57  ;;  %v2058_v7 = vadd.f32 %v2057_v9, %v1915_v17  ;;  %v1920_v8 = vpop.f32.mrf.mxu0  ;;  %v4044_v25 = vadd.f32 %v4224_v15, %v1653_v13 }
 0x2ae   : > { %v2063_v52 = vpop.f32.mrf.mxu1  ;;  %v2205_v45 = vmul.f32 0.5, %v2179_v47  ;;  %v2180_v6 = vadd.f32 1.0, %v2840_v16  ;;  %v2060_v33 = vadd.f32 %v2059_v29, %v1917_v30  ;;  %v1921_v11 = vadd.f32 %v1920_v8, %v1778_v46  ;;  %2357 = vmatprep.mubr.f32.mxu0 %v2229_v35  ;;  %v4225_v35 = vld [vmem:[#allocation31_spill] sm:$0xff] }
 0x2af   : > { %v2842_v60 = vpop.eup %2841  ;;  %v1659_v51 = vadd.f32 %v3892_v14, %v3902_v20  ;;  %2853 = vtanh.f32 %v2135_v44  ;;  %v2136_v2 = vmul.f32 0.5, %v2058_v7  ;;  %v1922_v37 = vpop.f32.mrf.mxu0  ;;  %2358 = vmatmul.mubr.f32.vlgmr.msra.gmra.mxu0 %v2228_v5  ;;  %v2230_v0 = vmul.f32 %v3946_v42, %v2204_v56 }
 0x2b0   : > { %v2065_v54 = vpop.f32.mrf.mxu1  ;;  %v2181_v9 = vadd.f32 1.0, %v2842_v60  ;;  %v2137_v18 = vmul.f32 0.5, %v2060_v33  ;;  %v2064_v34 = vadd.f32 %v2063_v52, %v1921_v11  ;;  %v2206_v46 = vmul.f32 0.5, %v2180_v6 }
 0x2b1   : > { %v2844_v3 = vpop.eup %2843  ;;  %2855 = vtanh.f32 %v2136_v2  ;;  %v1923_v57 = vadd.f32 %v1922_v37, %v1780_v12  ;;  %v1926_v17 = vpop.f32.mrf.mxu0  ;;  %v2231_v41 = vmul.f32 %v3949_v22, %v2205_v45  ;;  %v1798_v16 = vadd.f32 %v4225_v35, %v1655_v63 }
 0x2b2   : > { %v2069_v13 = vpop.f32.mrf.mxu1  ;;  %v2207_v29 = vmul.f32 0.5, %v2181_v9  ;;  %v2182_v14 = vadd.f32 1.0, %v2844_v3  ;;  %2857 = vtanh.f32 %v2137_v18  ;;  %v2138_v47 = vmul.f32 0.5, %v2064_v34 }
 0x2b3   : > { %v2846_v30 = vpop.eup %2845  ;;  %v1661_v5 = vadd.f32 %v3899_v26, %v3908_v24  ;;  %v2066_v44 = vadd.f32 %v2065_v54, %v1923_v57  ;;  %v1927_v42 = vadd.f32 %v1926_v17, %v4022_v27  ;;  %2362 = vmatprep.mubr.f32.mxu0 %v2231_v41  ;;  %v1928_v56 = vpop.f32.mrf.mxu0  ;;  %v2232_v26 = vmul.f32 %v3955_v21, %v2206_v46 }
 0x2b4   : > { %v2071_v12 = vpop.f32.mrf.mxu1  ;;  %v2208_v7 = vmul.f32 0.5, %v2182_v14  ;;  %v2183_v8 = vadd.f32 1.0, %v2846_v30  ;;  %2859 = vtanh.f32 %v2138_v47  ;;  %v1929_v22 = vadd.f32 %v1928_v56, %v4025_v43  ;;  %2363 = vmatmul.mubr.f32.gmra.mxu0 %v2230_v0 }
 0x2b5   : > { %v2848_v52 = vpop.eup %2847  ;;  %v2139_v45 = vmul.f32 0.5, %v2066_v44  ;;  %v2070_v6 = vadd.f32 %v2069_v13, %v1927_v42  ;;  %v1932_v33 = vpop.f32.mrf.mxu0  ;;  %v2233_v11 = vmul.f32 %v3957_v1, %v2207_v29  ;;  %v1802_v54 = vadd.f32 %v3896_v32, %v1659_v51 }
 0x2b6   : > { %v2075_v63 = vpop.f32.mrf.mxu1  ;;  %v2209_v60 = vmul.f32 0.5, %v2183_v8  ;;  %v2184_v27 = vadd.f32 1.0, %v2848_v52  ;;  %v2072_v15 = vadd.f32 %v2071_v12, %v1929_v22  ;;  %v1933_v2 = vadd.f32 %v1932_v33, %v4028_v55 }
 0x2b7   : > { %v2850_v37 = vpop.eup %2849  ;;  %v1665_v43 = vadd.f32 %v3911_v50, %v3902_v20  ;;  %2861 = vtanh.f32 %v2139_v45  ;;  %v2140_v9 = vmul.f32 0.5, %v2070_v6  ;;  %2367 = vmatprep.mubr.f32.mxu0 %v2233_v11  ;;  %v1934_v18 = vpop.f32.mrf.mxu0  ;;  %v2234_v21 = vmul.f32 %v3963_v53, %v2208_v7  ;;  %v4226_v45 = vld [vmem:[#allocation32_spill] sm:$0xff] }
 0x2b8   : > { %v2077_v34 = vpop.f32.mrf.mxu1  ;;  %v2185_v0 = vadd.f32 1.0, %v2850_v37  ;;  %v2141_v1 = vmul.f32 0.5, %v2072_v15  ;;  %v2076_v3 = vadd.f32 %v2075_v63, %v1933_v2  ;;  %2368 = vmatmul.mubr.f32.gmra.mxu0 %v2232_v26  ;;  %v2210_v46 = vmul.f32 0.5, %v2184_v27 }
 0x2b9   : > { %2863 = vtanh.f32 %v2140_v9  ;;  %v1935_v55 = vadd.f32 %v1934_v18, %v4035_v10  ;;  %v1938_v57 = vpop.f32.mrf.mxu0  ;;  %v2235_v51 = vmul.f32 %v3965_v39, %v2209_v60  ;;  %v1804_v41 = vadd.f32 %v3904_v48, %v1661_v5 }
 0x2ba   : > { %v2081_v32 = vpop.f32.mrf.mxu1  ;;  %v2852_v20 = vpop.eup %2851  ;;  %v2211_v50 = vmul.f32 0.5, %v2185_v0  ;;  %2865 = vtanh.f32 %v2141_v1  ;;  %v2142_v17 = vmul.f32 0.5, %v2076_v3  ;;  %v1939_v13 = vadd.f32 %v1938_v57, %v4044_v25 }
 0x2bb   : > { %v1667_v29 = vadd.f32 %v3923_v31, %v3908_v24  ;;  %v2186_v53 = vadd.f32 1.0, %v2852_v20  ;;  %v2078_v14 = vadd.f32 %v2077_v34, %v1935_v55  ;;  %2372 = vmatprep.mubr.f32.mxu0 %v2235_v51  ;;  %v1940_v47 = vpop.f32.mrf.mxu0  ;;  %v1808_v42 = vadd.f32 %v3915_v59, %v1665_v43  ;;  %v4227_v34 = vld [vmem:[#allocation16_spill] sm:$0xff] }
 0x2bc   : > { %v2083_v10 = vpop.f32.mrf.mxu1  ;;  %v2854_v30 = vpop.eup %2853  ;;  %2867 = vtanh.f32 %v2142_v17  ;;  %v2082_v35 = vadd.f32 %v2081_v32, %v1939_v13  ;;  %v1941_v39 = vadd.f32 %v1940_v47, %v1798_v16  ;;  %2373 = vmatmul.mubr.f32.gmra.mxu0 %v2234_v21  ;;  %v2237_v44 = vmul.f32 %v3976_v58, %v2211_v50  ;;  %v4228_v50 = vld [vmem:[#allocation18_spill] sm:$0xff]  ;;  %v4229_v47 = vld [vmem:[#allocation17_spill] sm:$0xff] }
 0x2bd   : > { %v2212_v25 = vmul.f32 0.5, %v2186_v53  ;;  %v2187_v56 = vadd.f32 1.0, %v2854_v30  ;;  %v2143_v48 = vmul.f32 0.5, %v2078_v14  ;;  %v1944_v5 = vpop.f32.mrf.mxu0  ;;  %v2236_v22 = vmul.f32 %v3974_v19, %v2210_v46 }
 0x2be   : > { %v2087_v12 = vpop.f32.mrf.mxu1  ;;  %v2856_v24 = vpop.eup %2855  ;;  %v2144_v31 = vmul.f32 0.5, %v2082_v35  ;;  %v2084_v7 = vadd.f32 %v2083_v10, %v1941_v39  ;;  %v1945_v8 = vadd.f32 %v1944_v5, %v1802_v54  ;;  %2377 = vmatprep.mubr.f32.mxu0 %v2237_v44  ;;  %v1810_v16 = vadd.f32 %v4226_v45, %v1667_v29  ;;  %v4233_v45 = vld [vmem:[#allocation21_spill] sm:$0xff] }
 0x2bf   : > { %v2858_v52 = vpop.eup %2857  ;;  %v2213_v6 = vmul.f32 0.5, %v2187_v56  ;;  %v2188_v33 = vadd.f32 1.0, %v2856_v24  ;;  %2869 = vtanh.f32 %v2143_v48  ;;  %v1946_v58 = vpop.f32.mrf.mxu0  ;;  %v2238_v54 = vmul.f32 %v3982_v4, %v2212_v25  ;;  %v4231_v48 = vld [vmem:[#allocation19_spill] sm:$0xff] }
 0x2c0   : > { %v2089_v59 = vpop.f32.mrf.mxu1  ;;  %v2189_v63 = vadd.f32 1.0, %v2858_v52  ;;  %2871 = vtanh.f32 %v2144_v31  ;;  %v2145_v11 = vmul.f32 0.5, %v2084_v7  ;;  %v2088_v26 = vadd.f32 %v2087_v12, %v1945_v8  ;;  %2378 = vmatmul.mubr.f32.gmra.mxu0 %v2236_v22  ;;  %v4232_v31 = vld [vmem:[#allocation22_spill] sm:$0xff] }
 0x2c1   : > { %v2860_v60 = vpop.eup %2859  ;;  %v2214_v27 = vmul.f32 0.5, %v2188_v33  ;;  %v1947_v15 = vadd.f32 %v1946_v58, %v1804_v41  ;;  %v1950_v2 = vpop.f32.mrf.mxu0  ;;  %v2239_v19 = vmul.f32 %v3984_v40, %v2213_v6 }
 0x2c2   : > { %v2093_v37 = vpop.f32.mrf.mxu1  ;;  %v2215_v43 = vmul.f32 0.5, %v2189_v63  ;;  %v2190_v9 = vadd.f32 1.0, %v2860_v60  ;;  %2873 = vtanh.f32 %v2145_v11  ;;  %v2146_v18 = vmul.f32 0.5, %v2088_v26 }
 0x2c3   : > { %2875 = vtanh.f32 %v4227_v34  ;;  %v2090_v0 = vadd.f32 %v2089_v59, %v1947_v15  ;;  %v1951_v1 = vadd.f32 %v1950_v2, %v1808_v42  ;;  %2382 = vmatprep.mubr.f32.mxu0 %v2239_v19  ;;  %v1952_v3 = vpop.f32.mrf.mxu0  ;;  %v2240_v13 = vmul.f32 %v3990_v62, %v2214_v27  ;;  %v4230_v62 = vld [vmem:[#allocation20_spill] sm:$0xff] }
 0x2c4   : > { %v2862_v21 = vpop.eup %2861  ;;  %2877 = vtanh.f32 %v2146_v18  ;;  %v1953_v46 = vadd.f32 %v1952_v3, %v1810_v16  ;;  %2383 = vmatmul.mubr.f32.gmra.mxu0 %v2238_v54  ;;  %v2241_v55 = vmul.f32 %v3992_v38, %v2215_v43  ;;  %v2216_v57 = vmul.f32 0.5, %v2190_v9  ;;  %v2095_v51 = vpop.f32.mrf.mxu1 }
 0x2c5   : > { %v2191_v40 = vadd.f32 1.0, %v2862_v21  ;;  %v2147_v32 = vmul.f32 0.5, %v2090_v0  ;;  %v2094_v4 = vadd.f32 %v2093_v37, %v1951_v1  ;;  %2879 = vtanh.f32 %v4228_v50 }
 0x2c6   : > { %v2864_v20 = vpop.eup %2863  ;;  %v2096_v17 = vadd.f32 %v2095_v51, %v1953_v46  ;;  %2387 = vmatprep.mubr.f32.mxu0 %v2241_v55  ;;  %v2242_v35 = vmul.f32 %v4001_v28, %v2216_v57 }
 0x2c7   : > { %v2866_v41 = vpop.eup %2865  ;;  %v2217_v29 = vmul.f32 0.5, %v2191_v40  ;;  %v2192_v53 = vadd.f32 1.0, %v2864_v20  ;;  %2881 = vtanh.f32 %v2147_v32  ;;  %v2148_v14 = vmul.f32 0.5, %v2094_v4  ;;  %v4089_v32 = vld [vmem:[#allocation10] ss:$0 sm:$0xff] }
 0x2c8   : > { %2883 = vtanh.f32 %v4229_v47  ;;  %v2193_v38 = vadd.f32 1.0, %v2866_v41  ;;  %v2149_v10 = vmul.f32 0.5, %v2096_v17  ;;  %2388 = vmatmul.mubr.f32.gmra.mxu0 %v2240_v13 }
 0x2c9   : > { %v2868_v30 = vpop.eup %2867  ;;  %2885 = vtanh.f32 %v2148_v14  ;;  %v2243_v39 = vmul.f32 %v4011_v61, %v2217_v29  ;;  %v2218_v44 = vmul.f32 0.5, %v2192_v53 }
 0x2ca   : > { %v2219_v42 = vmul.f32 0.5, %v2193_v38  ;;  %v2194_v25 = vadd.f32 1.0, %v2868_v30  ;;  %2887 = vtanh.f32 %v2149_v10 }
 0x2cb   : > { %2889 = vtanh.f32 %v4230_v62  ;;  %2392 = vmatprep.mubr.f32.mxu1 %v2243_v39  ;;  %v2244_v61 = vmul.f32 %v4018_v49, %v2218_v44 }
 0x2cc   : > { %v2870_v56 = vpop.eup %2869  ;;  %2891 = vtanh.f32 %v4231_v48  ;;  %2393 = vmatmul.mubr.f32.vlgmr.msra.gmra.mxu1 %v2242_v35  ;;  %v2245_v5 = vmul.f32 %v4032_v23, %v2219_v42  ;;  %v2220_v28 = vmul.f32 0.5, %v2194_v25 }
 0x2cd   : > { %v2872_v12 = vpop.eup %2871  ;;  %v2195_v24 = vadd.f32 1.0, %v2870_v56  ;;  %2893 = vtanh.f32 %v4232_v31 }
 0x2ce   : > { %v2196_v7 = vadd.f32 1.0, %v2872_v12  ;;  %2397 = vmatprep.mubr.f32.mxu1 %v2245_v5  ;;  %2895 = vtanh.f32 %v4233_v45  ;;  %v2246_v63 = vmul.f32 %v4039_v36, %v2220_v28 }
 0x2cf   : > { %v2874_v8 = vpop.eup %2873  ;;  %v2221_v22 = vmul.f32 0.5, %v2195_v24 }
 0x2d0   : > { %v2876_v52 = vpop.eup %2875  ;;  %v2197_v16 = vadd.f32 1.0, %v2874_v8  ;;  %2398 = vmatmul.mubr.f32.gmra.mxu1 %v2244_v61  ;;  %v2222_v58 = vmul.f32 0.5, %v2196_v7 }
 0x2d1   : > { %v2878_v6 = vpop.eup %2877  ;;  %v2247_v33 = vmul.f32 %v2876_v52, %v2221_v22 }
 0x2d2   : > { %v2223_v23 = vmul.f32 0.5, %v2197_v16  ;;  %v2198_v59 = vadd.f32 1.0, %v2878_v6  ;;  %v2880_v11 = vpop.eup %2879 }
 0x2d3   : > { %2402 = vmatprep.mubr.f32.mxu1 %v2247_v33 }
 0x2d4   : > { %v2882_v26 = vpop.eup %2881  ;;  %2403 = vmatmul.mubr.f32.gmra.mxu1 %v2246_v63  ;;  %v2249_v60 = vmul.f32 %v2880_v11, %v2223_v23  ;;  %v2224_v2 = vmul.f32 0.5, %v2198_v59 }
 0x2d5   : > { %v2884_v49 = vpop.eup %2883  ;;  %v2199_v27 = vadd.f32 1.0, %v2882_v26 }
 0x2d6   : > { %v2886_v15 = vpop.eup %2885  ;;  %2407 = vmatprep.mubr.f32.mxu1 %v2249_v60  ;;  %v2248_v37 = vmul.f32 %v2884_v49, %v2222_v58 }
 0x2d7   : > { %v2888_v19 = vpop.eup %2887  ;;  %v2225_v54 = vmul.f32 0.5, %v2199_v27  ;;  %v2200_v43 = vadd.f32 1.0, %v2886_v15 }
 0x2d8   : > { %v2890_v9 = vpop.eup %2889  ;;  %v2201_v18 = vadd.f32 1.0, %v2888_v19  ;;  %2408 = vmatmul.mubr.f32.gmra.mxu1 %v2248_v37 }
 0x2d9   : > { %v2892_v34 = vpop.eup %2891  ;;  %v2251_v36 = vmul.f32 %v2890_v9, %v2225_v54  ;;  %v2226_v0 = vmul.f32 0.5, %v2200_v43 }
 0x2da   : > { %v2227_v1 = vmul.f32 0.5, %v2201_v18  ;;  %v2250_v3 = vmul.f32 %v2892_v34, %v2224_v2  ;;  %v2894_v21 = vpop.eup %2893 }
 0x2db   : > { %2412 = vmatprep.mubr.f32.mxu1 %v2251_v36  ;;  %v2896_v55 = vpop.eup %2895 }
 0x2dc   : > { %2413 = vmatmul.mubr.f32.gmra.mxu1 %v2250_v3  ;;  %v2253_v46 = vmul.f32 %v2894_v21, %v2227_v1  ;;  %v2252_v57 = vmul.f32 %v2896_v55, %v2226_v0 }
 0x2de   : > { %2417 = vmatprep.mubr.f32.mxu1 %v2253_v46 }
 0x2e0   : > { %2418 = vmatmul.mubr.f32.gmra.mxu1 %v2252_v57 }
 0x36f   : > { %v2631_v40 = vpop.f32.mrf.mxu0 }
 0x371   : > { %v2632_v4 = vpop.f32.mrf.mxu0 }
 0x372   : > { %v2633_v51 = vadd.f32 %v2632_v4, %v2631_v40 }
 0x374   : > { %v2360_v20 = vadd.f32 %v2633_v51, %v4089_v32  ;;  %v2634_v50 = vpop.f32.mrf.mxu0 }
 0x376   : > { %2423 = vst [vmem:[%s4092_s7] sm:$0xff] %v2360_v20  ;;  %v2635_v17 = vpop.f32.mrf.mxu0 }
 0x377   : > { %v2636_v13 = vadd.f32 %v2635_v17, %v2634_v50 }
 0x378   : > { %v2637_v41 = vpop.f32.mrf.mxu0 }
 0x379   : > { %v2365_v29 = vadd.f32 %v2636_v13, %v4089_v32 }
 0x37a   : > { %v2638_v53 = vpop.f32.mrf.mxu0 }
 0x37b   : > { %2424 = vst [vmem:[%s4092_s7 + $0x8] sm:$0xff] %v2365_v29  ;;  %v2639_v14 = vadd.f32 %v2638_v53, %v2637_v41 }
 0x37c   : > { %v2640_v47 = vpop.f32.mrf.mxu0 }
 0x37d   : > { %v2370_v38 = vadd.f32 %v2639_v14, %v4089_v32 }
 0x37e   : > { %v2641_v10 = vpop.f32.mrf.mxu0 }
 0x37f   : > { %2425 = vst [vmem:[%s4092_s7 + $0x10] sm:$0xff] %v2370_v38  ;;  %v2642_v30 = vadd.f32 %v2641_v10, %v2640_v47 }
 0x380   : > { %v2643_v35 = vpop.f32.mrf.mxu0 }
 0x381   : > { %v2375_v39 = vadd.f32 %v2642_v30, %v4089_v32 }
 0x382   : > { %v2644_v44 = vpop.f32.mrf.mxu0 }
 0x383   : > { %2426 = vst [vmem:[%s4092_s7 + $0x18] sm:$0xff] %v2375_v39  ;;  %v2645_v42 = vadd.f32 %v2644_v44, %v2643_v35 }
 0x384   : > { %v2646_v25 = vpop.f32.mrf.mxu0 }
 0x385   : > { %v2380_v62 = vadd.f32 %v2645_v42, %v4089_v32 }
 0x386   : > { %v2647_v56 = vpop.f32.mrf.mxu0 }
 0x387   : > { %2427 = vst [vmem:[%s4092_s7 + $0x20] sm:$0xff] %v2380_v62  ;;  %v2648_v48 = vadd.f32 %v2647_v56, %v2646_v25 }
 0x388   : > { %v2649_v5 = vpop.f32.mrf.mxu0 }
 0x389   : > { %v2385_v12 = vadd.f32 %v2648_v48, %v4089_v32 }
 0x38a   : > { %v2650_v24 = vpop.f32.mrf.mxu0 }
 0x38b   : > { %2428 = vst [vmem:[%s4092_s7 + $0x28] sm:$0xff] %v2385_v12  ;;  %v2651_v31 = vadd.f32 %v2650_v24, %v2649_v5 }
 0x38c   : > { %v2652_v28 = vpop.f32.mrf.mxu1 }
 0x38d   : > { %v2390_v7 = vadd.f32 %v2651_v31, %v4089_v32 }
 0x38e   : > { %v2653_v61 = vpop.f32.mrf.mxu1 }
 0x38f   : > { %2429 = vst [vmem:[%s4092_s7 + $0x30] sm:$0xff] %v2390_v7  ;;  %v2654_v8 = vadd.f32 %v2653_v61, %v2652_v28 }
 0x390   : > { %v2655_v22 = vpop.f32.mrf.mxu1 }
 0x391   : > { %v2395_v52 = vadd.f32 %v2654_v8, %v4089_v32 }
 0x392   : > { %v2656_v45 = vpop.f32.mrf.mxu1 }
 0x393   : > { %2430 = vst [vmem:[%s4092_s7 + $0x38] sm:$0xff] %v2395_v52  ;;  %v2657_v16 = vadd.f32 %v2656_v45, %v2655_v22 }
 0x394   : > { %v2658_v6 = vpop.f32.mrf.mxu1 }
 0x395   : > { %v2400_v33 = vadd.f32 %v2657_v16, %v4089_v32 }
 0x396   : > { %v2659_v58 = vpop.f32.mrf.mxu1 }
 0x397   : > { %2431 = vst [vmem:[%s4092_s7 + $0x40] sm:$0xff] %v2400_v33  ;;  %v2660_v23 = vadd.f32 %v2659_v58, %v2658_v6 }
 0x398   : > { %v2661_v59 = vpop.f32.mrf.mxu1 }
 0x399   : > { %v2405_v63 = vadd.f32 %v2660_v23, %v4089_v32 }
 0x39a   : > { %v2662_v11 = vpop.f32.mrf.mxu1 }
 0x39b   : > { %2432 = vst [vmem:[%s4092_s7 + $0x48] sm:$0xff] %v2405_v63  ;;  %v2663_v26 = vadd.f32 %v2662_v11, %v2661_v59 }
 0x39c   : > { %v2664_v60 = vpop.f32.mrf.mxu1 }
 0x39d   : > { %v2410_v49 = vadd.f32 %v2663_v26, %v4089_v32 }
 0x39e   : > { %v2665_v27 = vpop.f32.mrf.mxu1 }
 0x39f   : > { %2433 = vst [vmem:[%s4092_s7 + $0x50] sm:$0xff] %v2410_v49  ;;  %v2666_v15 = vadd.f32 %v2665_v27, %v2664_v60 }
 0x3a0   : > { %v2667_v2 = vpop.f32.mrf.mxu1 }
 0x3a1   : > { %v2415_v37 = vadd.f32 %v2666_v15, %v4089_v32 }
 0x3a2   : > { %v2668_v19 = vpop.f32.mrf.mxu1 }
 0x3a3   : > { %2434 = vst [vmem:[%s4092_s7 + $0x58] sm:$0xff] %v2415_v37  ;;  %v2669_v54 = vadd.f32 %v2668_v19, %v2667_v2  ;;  %2443 = sbr.rel (!%p4234_p4) target bundleno = 963 (0x3c3), region = 64 }
 0x3a5   : > { %v2420_v43 = vadd.f32 %v2669_v54, %v4089_v32 }
 0x3a7   : > { %2435 = vst [vmem:[%s4092_s7 + $0x60] sm:$0xff] %v2420_v43 }
 0x3a8   : > { %s4243_s12 = smov (!%p2446_p6, %s2445_s12), 13 }
 0x3a9   : > { %s4123_s26 = sshll.u32 %s4243_s12, 7 }
 0x3aa   : > { %s2450_s17 = ssub.s32 1664, %s4123_s26 }
 0x3ab   : > { %2451 = vsyncadd %s2437_s10, %s2450_s17  ;;  %p2588_p8 = scmp.ne.s32.totalorder %s4123_s26, 0  ;;  %s2597_s30 = smul.u32 1664, %s3271_s22 }
 0x3ac   : > { %s2456_s28 = sshll.u32 %s4092_s7, 4  ;;  %s3217_s13 = smov [#allocation11]   ;;  %s4136_s28 = int_to_ptr.vmem [resolvable:$true] %s2456_s28 }
 0x3ad   : > { %s4134_s8 = scalar_lea.hbm %s4186_s5, %s2597_s30  ;;  %s3132_s11 = scalar_lea.vmem %s4136_s28, %s4123_s26 }
 0x3ae   : > { %p3133_p11 = scmp.ne.s32.totalorder %s4136_s28, %s3132_s11  ;;  %s3136_s14 = sshll.u32 %s3217_s13, 4  ;;  %s3137_s14 = int_to_ptr.vmem [resolvable:$false] %s3136_s14 }
 0x3af   : > { %s3138_s22 = scalar_lea.vmem %s3137_s14, 3328  ;;  %p3139_p1 = scmp.lt.s32.totalorder %s4136_s28, %s3137_s14 }
 0x3b0   : > { %p3134_p0 = pnand %p3133_p11, %p2588_p8  ;;  %p3140_p7 = scmp.lt.s32.totalorder %s3138_s22, %s3132_s11 }
 0x3b2   : > { %p3135_p2 = pneg %p3134_p0  ;;  %p3141_p3 = por %p3140_p7, %p3139_p1 }
 0x3b4   : > { %p3142_p5 = pnand %p3141_p3, %p3135_p2 }
 0x3b6   : > { %3145 = shalt.err (!%p3142_p5)
}
 0x3b7   : > { %s3146_s15 = scalar_lea.hbm %s4134_s8, %s4123_s26  ;;  %s3150_s16 = scalar_lea.hbm %s4186_s5, 3200 }
 0x3b8   : > { %p3147_p13 = scmp.ne.s32.totalorder %s4134_s8, %s3146_s15  ;;  %p3151_p4 = scmp.lt.s32.totalorder %s4134_s8, %s4186_s5 }
 0x3b9   : > { %p3152_p6 = scmp.lt.s32.totalorder %s3150_s16, %s3146_s15 }
 0x3ba   : > { %p3148_p9 = pnand %p3147_p13, %p2588_p8 }
 0x3bb   : > { %p3153_p11 = por %p3152_p6, %p3151_p4 }
 0x3bc   : > { %p3149_p12 = pneg %p3148_p9 }
 0x3be   : > { %p3154_p0 = pnand %p3153_p11, %p3149_p12 }
 0x3c0   : > { %3157 = shalt.err (!%p3154_p0)
}
 0x3c1   : > { %s3218_s30 = smov 128   ;;  %s3219_s23 = smov 8  }
 0x3c2   : > { %2462 = dma.vmem_to_hbm [thread:$0]  (%p2588_p8), %s4136_s28, %s4123_s26, %s4134_s8, %s2437_s10, %s3218_s30, %s3218_s30, %s3219_s23  }
 0x3c3 PF: > { %s2471_s25 = sand.u32 1, %s3192_s18   ;;  %p4235_p2 = scmp.ne.s32.totalorder %s4192_s6, 0 }
 0x3c4   : > { %s2472_s11 = scalar_lea.sflag [#allocation4], %s2471_s25 }
 0x3c5   : > { %p2737_p1 = pnand %p2573_p10, %p4235_p2 }
 0x3c7   : > { %p2738_p7 = pneg %p2737_p1 }
 0x3c9   : > { %3187 = dma.done.wait (%p2738_p7), %s2472_s11, 1664  }
 0x3ca   : > { %3189 = vsyncadd (%p2738_p7), %s2472_s11, 4294965632  ;;  %p20_p3 = scmp.ge.s32.totalorder %s3275_s24, 4   ;;  %s4236_s18 = smov %s3196_s19 }
 0x3cb   : > { %s4237_s19 = smov %s3200_s20  ;;  %s4238_s20 = smov %s3287_s27 }
 0x3cc   : > { %s4239_s21 = smov %s3275_s24  ;;  %22 = sbr.rel (!%p20_p3) target bundleno = 7 (0x7), region = 101 }
 0x3d1   :  { %2477 = vsyncpa [#allocation3], 1 }
 0x3d2   :  { %2479 = vsyncpa [#allocation3 + $0x1], 1 }
 0x3d3   :  { %2480 = vsyncpa [#allocation6], 1 }
 0x3d4   :  { %2481 = vsyncpa [#allocation9], 1 }
 0x3d5   :  { %2482 = vsyncpa [#allocation4], 1 }
 0x3d6   :  { %2484 = vsyncpa [#allocation4 + $0x1], 1 }

</bundles_post_ra>
